<compile_context>
chip_gen: v7x
topology: tpu7x:2x2x1
jax: 0.10.0
libtpu: 0.0.40
codegen_flags: <defaults>
</compile_context>

<pallas_src>
import functools

import jax
import jax.numpy as jnp
from jax import lax
from jax.experimental import pallas as pl
from jax.experimental.pallas import tpu as pltpu


# ---------------------------------------------------------------------------
# Generation-aware VMEM budgeting (v5e/v6e: 128 MiB, v7x: 64 MiB per TC).
# ---------------------------------------------------------------------------
def _vmem_capacity_bytes():
    try:
        return int(pltpu.get_tpu_info().vmem_capacity_bytes)
    except Exception:
        return 64 * 2**20                     # conservative fallback (v7x per-TC)


def _vmem_block_budget_bytes():
    cap = _vmem_capacity_bytes()
    # ~40% of physical VMEM for our (double-buffered) blocks, capped at 48 MiB.
    return int(min(cap * 2 // 5, 48 * 2**20))


def _vmem_limit_bytes(need):
    cap = _vmem_capacity_bytes()
    hi = max(32 * 2**20, cap * 3 // 4 - 8 * 2**20)   # leave compiler headroom
    return int(min(hi, max(32 * 2**20, 2 * need)))


# ---------------------------------------------------------------------------
# Pallas kernel: direct tap-loop conv + bias/eval-BN shift + activation.
#   x_ref    : (1, Hin, Win, Cin)   bf16   (padded; space-to-depth'd if stride 2)
#   w_ref    : (taps, Cin, Cout)    bf16   (fully VMEM-resident)
#   shift_ref: (1, Cout)            f32
#   o_ref    : (1, OH, OW, Cout)    bf16/f32
# All slices are contiguous (stride-2 handled by space-to-depth in the wrapper).
# ---------------------------------------------------------------------------
def _tap_conv_kernel(x_ref, w_ref, shift_ref, o_ref, *, tap_h, tap_w, oh, ow, act):
    shift = shift_ref[...]                                    # (1, Cout) f32
    c_out = o_ref.shape[-1]
    for oy in range(oh):                                      # static unroll
        acc = jnp.zeros((ow, c_out), jnp.float32)
        for ty in range(tap_h):
            for tx in range(tap_w):
                xrow = x_ref[0, oy + ty, pl.ds(tx, ow), :]    # (OW, Cin) bf16
                acc = acc + jnp.dot(xrow, w_ref[ty * tap_w + tx],
                                    preferred_element_type=jnp.float32)
        y = acc + shift                                       # f32 epilogue
        if act == "leaky_relu":
            y = jnp.where(y > 0, y, 0.2 * y)
        else:
            y = jax.nn.sigmoid(y)
        o_ref[0, oy, :, :] = y.astype(o_ref.dtype)


def _tap_conv_call(xin, w_taps, shift, *, rows, ow, tap_h, tap_w, act,
                   out_dtype, vmem_need):
    n, hin, win, cin = xin.shape
    n_taps, _, c_out = w_taps.shape
    kernel = functools.partial(_tap_conv_kernel, tap_h=tap_h, tap_w=tap_w,
                               oh=rows, ow=ow, act=act)
    return pl.pallas_call(
        kernel,
        out_shape=jax.ShapeDtypeStruct((n, rows, ow, c_out), out_dtype),
        grid_spec=pltpu.PrefetchScalarGridSpec(
            num_scalar_prefetch=0,
            grid=(n,),                                        # one step per image
            in_specs=[
                pl.BlockSpec((1, hin, win, cin), lambda b: (b, 0, 0, 0)),
                pl.BlockSpec((n_taps, cin, c_out), lambda b: (0, 0, 0)),
                pl.BlockSpec((1, c_out), lambda b: (0, 0)),
            ],
            out_specs=pl.BlockSpec((1, rows, ow, c_out), lambda b: (b, 0, 0, 0)),
        ),
        compiler_params=pltpu.CompilerParams(
            dimension_semantics=("parallel",),
            vmem_limit_bytes=_vmem_limit_bytes(vmem_need),
        ),
    )(xin, w_taps, shift)


# ---------------------------------------------------------------------------
# Wrapper-side layout plumbing: zero-pad (pad=1) and, for stride-2 layers,
# a 2x2 space-to-depth so the in-kernel conv is always stride 1.
# ---------------------------------------------------------------------------
def _pad_and_s2d(x, stride):
    x = jnp.pad(x, ((0, 0), (1, 1), (1, 1), (0, 0)))
    if stride == 1:
        return x
    n, hp, wp, c = x.shape
    if hp % 2:
        x = jnp.pad(x, ((0, 0), (0, 1), (0, 0), (0, 0)))
        hp += 1
    if wp % 2:
        x = jnp.pad(x, ((0, 0), (0, 0), (0, 1), (0, 0)))
        wp += 1
    x = x.reshape(n, hp // 2, 2, wp // 2, 2, c)
    x = jnp.transpose(x, (0, 1, 3, 2, 4, 5)).reshape(n, hp // 2, wp // 2, 4 * c)
    return x


_MAX_ROWS_PER_CALL = 64     # bounds the static per-output-row unroll in the kernel


def tap_conv_layer(x_nhwc, p, *, out_dtype):
    """Conv2d(k=4, pad=1, stride in {1,2}) + folded affine + activation."""
    stride, act = p["stride"], p["act"]
    w_taps, shift = p["w_taps"], p["shift"]
    n, h, w, _ = x_nhwc.shape
    oh = (h + 2 - 4) // stride + 1
    ow = (w + 2 - 4) // stride + 1
    tap = 2 if stride == 2 else 4

    xin = _pad_and_s2d(x_nhwc, stride)                 # (N, Hin, Win, Cin_eff) bf16
    _, hin, win, cin = xin.shape
    n_taps, _, c_out = w_taps.shape
    assert n_taps == tap * tap and cin == w_taps.shape[1]
    out_isz = jnp.dtype(out_dtype).itemsize

    def vmem_need(rows):
        return (2 * (rows + tap - 1) * win * cin * 2   # input block (bf16, dbl-buf)
                + 2 * w_taps.size * 2                  # resident weight block
                + 2 * rows * ow * c_out * out_isz      # output block
                + 2 * 2 * c_out * 4)                   # shift

    budget = _vmem_block_budget_bytes()
    rows = min(oh, _MAX_ROWS_PER_CALL)
    while rows > 1 and vmem_need(rows) > budget:
        rows = max(1, rows // 2)

    chunks, r0 = [], 0
    while r0 < oh:
        r = min(rows, oh - r0)
        # output rows [r0, r0+r) need (stride-1, tap-tap) input rows [r0, r0+r+tap-1)
        x_chunk = lax.slice_in_dim(xin, r0, r0 + r + tap - 1, axis=1)
        chunks.append(_tap_conv_call(
            x_chunk, w_taps, shift, rows=r, ow=ow, tap_h=tap, tap_w=tap,
            act=act, out_dtype=out_dtype, vmem_need=vmem_need(r)))
        r0 += r
    return chunks[0] if len(chunks) == 1 else jnp.concatenate(chunks, axis=1)


# ---------------------------------------------------------------------------
# Parameter construction (deterministic, mirrors NLayerDiscriminator.__init__).
# norm_layer = BatchNorm2d  =>  use_bias=False on the normalized convs.
# ---------------------------------------------------------------------------
def init_params(key, input_nc=3, ndf=8, n_layers=3):
    kh = kw = 4
    eps = 1e-5
    cfgs = [(input_nc, ndf, 2, True, False, "leaky_relu")]
    nf_mult = 1
    for n in range(1, n_layers):
        nf_prev, nf_mult = nf_mult, min(2 ** n, 8)
        cfgs.append((ndf * nf_prev, ndf * nf_mult, 2, False, True, "leaky_relu"))
    nf_prev, nf_mult = nf_mult, min(2 ** n_layers, 8)
    cfgs.append((ndf * nf_prev, ndf * nf_mult, 1, False, True, "leaky_relu"))
    cfgs.append((ndf * nf_mult, 1, 1, True, False, "sigmoid"))

    params = []
    for (cin, cout, stride, use_bias, use_bn, act) in cfgs:
        key, k1, k2, k3, k4, k5, k6 = jax.random.split(key, 7)
        wgt = 0.05 * jax.random.normal(k1, (cout, cin, kh, kw), jnp.float32)  # OIHW
        if use_bn:
            gamma = 1.0 + 0.1 * jax.random.normal(k3, (cout,), jnp.float32)
            beta = 0.1 * jax.random.normal(k4, (cout,), jnp.float32)
            rmean = 0.1 * jax.random.normal(k5, (cout,), jnp.float32)
            rvar = 1.0 + 0.1 * jax.random.uniform(k6, (cout,), jnp.float32)
            scale = gamma / jnp.sqrt(rvar + eps)
            shift = beta - rmean * scale
        else:
            bias = (0.05 * jax.random.normal(k2, (cout,), jnp.float32)
                    if use_bias else jnp.zeros((cout,), jnp.float32))
            scale = jnp.ones((cout,), jnp.float32)
            shift = bias

        # Fold per-channel scale (eval BatchNorm) into the weights once.
        w_folded = wgt * scale[:, None, None, None]               # (O, I, KH, KW)

        if stride == 2:
            # stride-2 4x4 conv == stride-1 2x2-tap conv on space-to-depth input:
            #   w_taps[py*2+px, (ry*2+rx)*I + i, o] = w_folded[o, i, 2py+ry, 2px+rx]
            wt = w_folded.reshape(cout, cin, 2, 2, 2, 2)          # (O,I,py,ry,px,rx)
            wt = jnp.transpose(wt, (2, 4, 3, 5, 1, 0))            # (py,px,ry,rx,I,O)
            w_taps = wt.reshape(4, 4 * cin, cout)
        else:
            #   w_taps[ky*4+kx, i, o] = w_folded[o, i, ky, kx]
            wt = jnp.transpose(w_folded, (2, 3, 1, 0))            # (KH,KW,I,O)
            w_taps = wt.reshape(kh * kw, cin, cout)
        w_taps = w_taps.astype(jnp.bfloat16)

        # HWIO copy of the same folded weights for the pure-JAX reference conv.
        w_hwio = jnp.transpose(w_folded, (2, 3, 1, 0)).astype(jnp.bfloat16)

        params.append(dict(w_taps=w_taps, w_hwio=w_hwio,
                           shift=shift.reshape(1, cout).astype(jnp.float32),
                           stride=stride, act=act))
    return params


def discriminator_forward(x_nchw, params):
    x = jnp.transpose(x_nchw, (0, 2, 3, 1)).astype(jnp.bfloat16)   # NCHW -> NHWC bf16
    for i, p in enumerate(params):
        last = i == len(params) - 1
        x = tap_conv_layer(x, p, out_dtype=jnp.float32 if last else jnp.bfloat16)
    return jnp.transpose(x, (0, 3, 1, 2))                          # NHWC -> NCHW


# Pure-JAX reference (independent conv path, same bf16 quantization points).
def reference_forward(x_nchw, params):
    x = jnp.transpose(x_nchw, (0, 2, 3, 1)).astype(jnp.bfloat16)
    for i, p in enumerate(params):
        last = i == len(params) - 1
        y = lax.conv_general_dilated(
            x, p["w_hwio"], (p["stride"], p["stride"]),
            padding=((1, 1), (1, 1)),
            dimension_numbers=("NHWC", "HWIO", "NHWC"),
            preferred_element_type=jnp.float32)
        y = y + p["shift"].reshape(1, 1, 1, -1)
        if p["act"] == "leaky_relu":
            y = jnp.where(y > 0, y, 0.2 * y)
        else:
            y = jax.nn.sigmoid(y)
        x = y.astype(jnp.float32 if last else jnp.bfloat16)
    return jnp.transpose(x, (0, 3, 1, 2))


if __name__ == "__main__":
    key = jax.random.PRNGKey(0)
    kx, kp = jax.random.split(key)

    # Small shapes: batch=2, input_nc=3, spatial=32 (survives 5 convs), ndf=8.
    x = jax.random.normal(kx, (2, 3, 32, 32), jnp.float32)
    params = init_params(kp, input_nc=3, ndf=8, n_layers=3)

    out = jax.block_until_ready(discriminator_forward(x, params))
    ref = jax.block_until_ready(reference_forward(x, params))

    assert out.shape == ref.shape == (2, 1, 2, 2), out.shape
    assert out.dtype == jnp.float32, out.dtype
    max_err = float(jnp.max(jnp.abs(out - ref)))
    assert jnp.allclose(out, ref, atol=2e-2, rtol=2e-2), max_err

    print("KERNEL_OK")
</pallas_src>

<mosaic_0001>
module attributes {stable_mosaic.version = 11 : i64} {
  func.func @_tap_conv_kernel(%arg0: i32, %arg1: memref<1x17x17x12xbf16, #tpu.memory_space<vmem>>, %arg2: memref<4x12x8xbf16, #tpu.memory_space<vmem>>, %arg3: memref<1x8xf32, #tpu.memory_space<vmem>>, %arg4: memref<1x16x16x8xbf16, #tpu.memory_space<vmem>>) attributes {dimension_semantics = [#tpu.dimension_semantics<parallel>], iteration_bounds = array<i64: 2>, scalar_prefetch = 0 : i64, scratch_operands = 0 : i64, tpu.core_type = #tpu.core_type<tc>, window_params = [{transform_indices = @transform_0, window_bounds = array<i64: 1, 17, 17, 12>}, {pipeline_mode = #tpu.pipeline_mode<synchronous>, transform_indices = @transform_1, window_bounds = array<i64: 4, 12, 8>}, {pipeline_mode = #tpu.pipeline_mode<synchronous>, transform_indices = @transform_2, window_bounds = array<i64: 1, 8>}, {transform_indices = @transform_3, window_bounds = array<i64: 1, 16, 16, 8>}]} {
    %c0 = arith.constant 0 : index
    %c0_0 = arith.constant 0 : index
    %0 = vector.load %arg3[%c0, %c0_0] : memref<1x8xf32, #tpu.memory_space<vmem>>, vector<1x8xf32>
    %cst = arith.constant 0.000000e+00 : f32
    %1 = vector.broadcast %cst : f32 to vector<16x8xf32>
    %c0_1 = arith.constant 0 : index
    %c0_2 = arith.constant 0 : index
    %c0_3 = arith.constant 0 : index
    %c0_4 = arith.constant 0 : index
    %2 = vector.load %arg1[%c0_1, %c0_2, %c0_3, %c0_4] : memref<1x17x17x12xbf16, #tpu.memory_space<vmem>>, vector<1x1x16x12xbf16>
    %3 = vector.shape_cast %2 : vector<1x1x16x12xbf16> to vector<16x12xbf16>
    %c0_5 = arith.constant 0 : index
    %c0_6 = arith.constant 0 : index
    %c0_7 = arith.constant 0 : index
    %4 = vector.load %arg2[%c0_5, %c0_6, %c0_7] : memref<4x12x8xbf16, #tpu.memory_space<vmem>>, vector<1x12x8xbf16>
    %5 = vector.shape_cast %4 : vector<1x12x8xbf16> to vector<12x8xbf16>
    %cst_8 = arith.constant dense<0.000000e+00> : vector<16x8xf32>
    %6 = tpu.matmul %3, %5, %cst_8 {dimension_numbers = #tpu.dot_dimension_numbers<[1], [0], [0], [1], [0, 0, 1, 1], [], []>} : vector<16x12xbf16>, vector<12x8xbf16>, vector<16x8xf32> -> vector<16x8xf32>
    %7 = arith.addf %1, %6 : vector<16x8xf32>
    %c0_9 = arith.constant 0 : index
    %c0_10 = arith.constant 0 : index
    %c1 = arith.constant 1 : index
    %c0_11 = arith.constant 0 : index
    %8 = vector.load %arg1[%c0_9, %c0_10, %c1, %c0_11] : memref<1x17x17x12xbf16, #tpu.memory_space<vmem>>, vector<1x1x16x12xbf16>
    %9 = vector.shape_cast %8 : vector<1x1x16x12xbf16> to vector<16x12xbf16>
    %c1_12 = arith.constant 1 : index
    %c0_13 = arith.constant 0 : index
    %c0_14 = arith.constant 0 : index
    %10 = vector.load %arg2[%c1_12, %c0_13, %c0_14] : memref<4x12x8xbf16, #tpu.memory_space<vmem>>, vector<1x12x8xbf16>
    %11 = vector.shape_cast %10 : vector<1x12x8xbf16> to vector<12x8xbf16>
    %cst_15 = arith.constant dense<0.000000e+00> : vector<16x8xf32>
    %12 = tpu.matmul %9, %11, %cst_15 {dimension_numbers = #tpu.dot_dimension_numbers<[1], [0], [0], [1], [0, 0, 1, 1], [], []>} : vector<16x12xbf16>, vector<12x8xbf16>, vector<16x8xf32> -> vector<16x8xf32>
    %13 = arith.addf %7, %12 : vector<16x8xf32>
    %c0_16 = arith.constant 0 : index
    %c1_17 = arith.constant 1 : index
    %c0_18 = arith.constant 0 : index
    %c0_19 = arith.constant 0 : index
    %14 = vector.load %arg1[%c0_16, %c1_17, %c0_18, %c0_19] : memref<1x17x17x12xbf16, #tpu.memory_space<vmem>>, vector<1x1x16x12xbf16>
    %15 = vector.shape_cast %14 : vector<1x1x16x12xbf16> to vector<16x12xbf16>
    %c2 = arith.constant 2 : index
    %c0_20 = arith.constant 0 : index
    %c0_21 = arith.constant 0 : index
    %16 = vector.load %arg2[%c2, %c0_20, %c0_21] : memref<4x12x8xbf16, #tpu.memory_space<vmem>>, vector<1x12x8xbf16>
    %17 = vector.shape_cast %16 : vector<1x12x8xbf16> to vector<12x8xbf16>
    %cst_22 = arith.constant dense<0.000000e+00> : vector<16x8xf32>
    %18 = tpu.matmul %15, %17, %cst_22 {dimension_numbers = #tpu.dot_dimension_numbers<[1], [0], [0], [1], [0, 0, 1, 1], [], []>} : vector<16x12xbf16>, vector<12x8xbf16>, vector<16x8xf32> -> vector<16x8xf32>
    %19 = arith.addf %13, %18 : vector<16x8xf32>
    %c0_23 = arith.constant 0 : index
    %c1_24 = arith.constant 1 : index
    %c1_25 = arith.constant 1 : index
    %c0_26 = arith.constant 0 : index
    %20 = vector.load %arg1[%c0_23, %c1_24, %c1_25, %c0_26] : memref<1x17x17x12xbf16, #tpu.memory_space<vmem>>, vector<1x1x16x12xbf16>
    %21 = vector.shape_cast %20 : vector<1x1x16x12xbf16> to vector<16x12xbf16>
    %c3 = arith.constant 3 : index
    %c0_27 = arith.constant 0 : index
    %c0_28 = arith.constant 0 : index
    %22 = vector.load %arg2[%c3, %c0_27, %c0_28] : memref<4x12x8xbf16, #tpu.memory_space<vmem>>, vector<1x12x8xbf16>
    %23 = vector.shape_cast %22 : vector<1x12x8xbf16> to vector<12x8xbf16>
    %cst_29 = arith.constant dense<0.000000e+00> : vector<16x8xf32>
    %24 = tpu.matmul %21, %23, %cst_29 {dimension_numbers = #tpu.dot_dimension_numbers<[1], [0], [0], [1], [0, 0, 1, 1], [], []>} : vector<16x12xbf16>, vector<12x8xbf16>, vector<16x8xf32> -> vector<16x8xf32>
    %25 = arith.addf %19, %24 : vector<16x8xf32>
    %26 = vector.broadcast %0 : vector<1x8xf32> to vector<16x8xf32>
    %27 = arith.addf %25, %26 : vector<16x8xf32>
    %cst_30 = arith.constant 0.000000e+00 : f32
    %28 = vector.broadcast %cst_30 : f32 to vector<16x8xf32>
    %29 = arith.cmpf ogt, %27, %28 : vector<16x8xf32>
    %cst_31 = arith.constant 2.000000e-01 : f32
    %30 = vector.broadcast %cst_31 : f32 to vector<16x8xf32>
    %31 = arith.mulf %30, %27 : vector<16x8xf32>
    %32 = arith.select %29, %27, %31 : vector<16x8xi1>, vector<16x8xf32>
    %33 = arith.truncf %32 : vector<16x8xf32> to vector<16x8xbf16>
    %c0_32 = arith.constant 0 : index
    %c0_33 = arith.constant 0 : index
    %c0_34 = arith.constant 0 : index
    %c0_35 = arith.constant 0 : index
    %34 = vector.load %arg4[%c0_32, %c0_33, %c0_34, %c0_35] : memref<1x16x16x8xbf16, #tpu.memory_space<vmem>>, vector<1x1x16x8xbf16>
    %35 = vector.shape_cast %34 : vector<1x1x16x8xbf16> to vector<16x8xbf16>
    %36 = vector.shape_cast %33 : vector<16x8xbf16> to vector<1x1x16x8xbf16>
    tpu.vector_store %arg4[%c0_32, %c0_33, %c0_34, %c0_35], %36 {strides = array<i32>} : memref<1x16x16x8xbf16, #tpu.memory_space<vmem>>, vector<1x1x16x8xbf16>,
    %cst_36 = arith.constant 0.000000e+00 : f32
    %37 = vector.broadcast %cst_36 : f32 to vector<16x8xf32>
    %c0_37 = arith.constant 0 : index
    %c1_38 = arith.constant 1 : index
    %c0_39 = arith.constant 0 : index
    %c0_40 = arith.constant 0 : index
    %38 = vector.load %arg1[%c0_37, %c1_38, %c0_39, %c0_40] : memref<1x17x17x12xbf16, #tpu.memory_space<vmem>>, vector<1x1x16x12xbf16>
    %39 = vector.shape_cast %38 : vector<1x1x16x12xbf16> to vector<16x12xbf16>
    %c0_41 = arith.constant 0 : index
    %c0_42 = arith.constant 0 : index
    %c0_43 = arith.constant 0 : index
    %40 = vector.load %arg2[%c0_41, %c0_42, %c0_43] : memref<4x12x8xbf16, #tpu.memory_space<vmem>>, vector<1x12x8xbf16>
    %41 = vector.shape_cast %40 : vector<1x12x8xbf16> to vector<12x8xbf16>
    %cst_44 = arith.constant dense<0.000000e+00> : vector<16x8xf32>
    %42 = tpu.matmul %39, %41, %cst_44 {dimension_numbers = #tpu.dot_dimension_numbers<[1], [0], [0], [1], [0, 0, 1, 1], [], []>} : vector<16x12xbf16>, vector<12x8xbf16>, vector<16x8xf32> -> vector<16x8xf32>
    %43 = arith.addf %37, %42 : vector<16x8xf32>
    %c0_45 = arith.constant 0 : index
    %c1_46 = arith.constant 1 : index
    %c1_47 = arith.constant 1 : index
    %c0_48 = arith.constant 0 : index
    %44 = vector.load %arg1[%c0_45, %c1_46, %c1_47, %c0_48] : memref<1x17x17x12xbf16, #tpu.memory_space<vmem>>, vector<1x1x16x12xbf16>
    %45 = vector.shape_cast %44 : vector<1x1x16x12xbf16> to vector<16x12xbf16>
    %c1_49 = arith.constant 1 : index
    %c0_50 = arith.constant 0 : index
    %c0_51 = arith.constant 0 : index
    %46 = vector.load %arg2[%c1_49, %c0_50, %c0_51] : memref<4x12x8xbf16, #tpu.memory_space<vmem>>, vector<1x12x8xbf16>
    %47 = vector.shape_cast %46 : vector<1x12x8xbf16> to vector<12x8xbf16>
    %cst_52 = arith.constant dense<0.000000e+00> : vector<16x8xf32>
    %48 = tpu.matmul %45, %47, %cst_52 {dimension_numbers = #tpu.dot_dimension_numbers<[1], [0], [0], [1], [0, 0, 1, 1], [], []>} : vector<16x12xbf16>, vector<12x8xbf16>, vector<16x8xf32> -> vector<16x8xf32>
    %49 = arith.addf %43, %48 : vector<16x8xf32>
    %c0_53 = arith.constant 0 : index
    %c2_54 = arith.constant 2 : index
    %c0_55 = arith.constant 0 : index
    %c0_56 = arith.constant 0 : index
    %50 = vector.load %arg1[%c0_53, %c2_54, %c0_55, %c0_56] : memref<1x17x17x12xbf16, #tpu.memory_space<vmem>>, vector<1x1x16x12xbf16>
    %51 = vector.shape_cast %50 : vector<1x1x16x12xbf16> to vector<16x12xbf16>
    %c2_57 = arith.constant 2 : index
    %c0_58 = arith.constant 0 : index
    %c0_59 = arith.constant 0 : index
    %52 = vector.load %arg2[%c2_57, %c0_58, %c0_59] : memref<4x12x8xbf16, #tpu.memory_space<vmem>>, vector<1x12x8xbf16>
    %53 = vector.shape_cast %52 : vector<1x12x8xbf16> to vector<12x8xbf16>
    %cst_60 = arith.constant dense<0.000000e+00> : vector<16x8xf32>
    %54 = tpu.matmul %51, %53, %cst_60 {dimension_numbers = #tpu.dot_dimension_numbers<[1], [0], [0], [1], [0, 0, 1, 1], [], []>} : vector<16x12xbf16>, vector<12x8xbf16>, vector<16x8xf32> -> vector<16x8xf32>
    %55 = arith.addf %49, %54 : vector<16x8xf32>
    %c0_61 = arith.constant 0 : index
    %c2_62 = arith.constant 2 : index
    %c1_63 = arith.constant 1 : index
    %c0_64 = arith.constant 0 : index
    %56 = vector.load %arg1[%c0_61, %c2_62, %c1_63, %c0_64] : memref<1x17x17x12xbf16, #tpu.memory_space<vmem>>, vector<1x1x16x12xbf16>
    %57 = vector.shape_cast %56 : vector<1x1x16x12xbf16> to vector<16x12xbf16>
    %c3_65 = arith.constant 3 : index
    %c0_66 = arith.constant 0 : index
    %c0_67 = arith.constant 0 : index
    %58 = vector.load %arg2[%c3_65, %c0_66, %c0_67] : memref<4x12x8xbf16, #tpu.memory_space<vmem>>, vector<1x12x8xbf16>
    %59 = vector.shape_cast %58 : vector<1x12x8xbf16> to vector<12x8xbf16>
    %cst_68 = arith.constant dense<0.000000e+00> : vector<16x8xf32>
    %60 = tpu.matmul %57, %59, %cst_68 {dimension_numbers = #tpu.dot_dimension_numbers<[1], [0], [0], [1], [0, 0, 1, 1], [], []>} : vector<16x12xbf16>, vector<12x8xbf16>, vector<16x8xf32> -> vector<16x8xf32>
    %61 = arith.addf %55, %60 : vector<16x8xf32>
    %62 = vector.broadcast %0 : vector<1x8xf32> to vector<16x8xf32>
    %63 = arith.addf %61, %62 : vector<16x8xf32>
    %cst_69 = arith.constant 0.000000e+00 : f32
    %64 = vector.broadcast %cst_69 : f32 to vector<16x8xf32>
    %65 = arith.cmpf ogt, %63, %64 : vector<16x8xf32>
    %cst_70 = arith.constant 2.000000e-01 : f32
    %66 = vector.broadcast %cst_70 : f32 to vector<16x8xf32>
    %67 = arith.mulf %66, %63 : vector<16x8xf32>
    %68 = arith.select %65, %63, %67 : vector<16x8xi1>, vector<16x8xf32>
    %69 = arith.truncf %68 : vector<16x8xf32> to vector<16x8xbf16>
    %c0_71 = arith.constant 0 : index
    %c1_72 = arith.constant 1 : index
    %c0_73 = arith.constant 0 : index
    %c0_74 = arith.constant 0 : index
    %70 = vector.load %arg4[%c0_71, %c1_72, %c0_73, %c0_74] : memref<1x16x16x8xbf16, #tpu.memory_space<vmem>>, vector<1x1x16x8xbf16>
    %71 = vector.shape_cast %70 : vector<1x1x16x8xbf16> to vector<16x8xbf16>
    %72 = vector.shape_cast %69 : vector<16x8xbf16> to vector<1x1x16x8xbf16>
    tpu.vector_store %arg4[%c0_71, %c1_72, %c0_73, %c0_74], %72 {strides = array<i32>} : memref<1x16x16x8xbf16, #tpu.memory_space<vmem>>, vector<1x1x16x8xbf16>,
    %cst_75 = arith.constant 0.000000e+00 : f32
    %73 = vector.broadcast %cst_75 : f32 to vector<16x8xf32>
    %c0_76 = arith.constant 0 : index
    %c2_77 = arith.constant 2 : index
    %c0_78 = arith.constant 0 : index
    %c0_79 = arith.constant 0 : index
    %74 = vector.load %arg1[%c0_76, %c2_77, %c0_78, %c0_79] : memref<1x17x17x12xbf16, #tpu.memory_space<vmem>>, vector<1x1x16x12xbf16>
    %75 = vector.shape_cast %74 : vector<1x1x16x12xbf16> to vector<16x12xbf16>
    %c0_80 = arith.constant 0 : index
    %c0_81 = arith.constant 0 : index
    %c0_82 = arith.constant 0 : index
    %76 = vector.load %arg2[%c0_80, %c0_81, %c0_82] : memref<4x12x8xbf16, #tpu.memory_space<vmem>>, vector<1x12x8xbf16>
    %77 = vector.shape_cast %76 : vector<1x12x8xbf16> to vector<12x8xbf16>
    %cst_83 = arith.constant dense<0.000000e+00> : vector<16x8xf32>
    %78 = tpu.matmul %75, %77, %cst_83 {dimension_numbers = #tpu.dot_dimension_numbers<[1], [0], [0], [1], [0, 0, 1, 1], [], []>} : vector<16x12xbf16>, vector<12x8xbf16>, vector<16x8xf32> -> vector<16x8xf32>
    %79 = arith.addf %73, %78 : vector<16x8xf32>
    %c0_84 = arith.constant 0 : index
    %c2_85 = arith.constant 2 : index
    %c1_86 = arith.constant 1 : index
    %c0_87 = arith.constant 0 : index
    %80 = vector.load %arg1[%c0_84, %c2_85, %c1_86, %c0_87] : memref<1x17x17x12xbf16, #tpu.memory_space<vmem>>, vector<1x1x16x12xbf16>
    %81 = vector.shape_cast %80 : vector<1x1x16x12xbf16> to vector<16x12xbf16>
    %c1_88 = arith.constant 1 : index
    %c0_89 = arith.constant 0 : index
    %c0_90 = arith.constant 0 : index
    %82 = vector.load %arg2[%c1_88, %c0_89, %c0_90] : memref<4x12x8xbf16, #tpu.memory_space<vmem>>, vector<1x12x8xbf16>
    %83 = vector.shape_cast %82 : vector<1x12x8xbf16> to vector<12x8xbf16>
    %cst_91 = arith.constant dense<0.000000e+00> : vector<16x8xf32>
    %84 = tpu.matmul %81, %83, %cst_91 {dimension_numbers = #tpu.dot_dimension_numbers<[1], [0], [0], [1], [0, 0, 1, 1], [], []>} : vector<16x12xbf16>, vector<12x8xbf16>, vector<16x8xf32> -> vector<16x8xf32>
    %85 = arith.addf %79, %84 : vector<16x8xf32>
    %c0_92 = arith.constant 0 : index
    %c3_93 = arith.constant 3 : index
    %c0_94 = arith.constant 0 : index
    %c0_95 = arith.constant 0 : index
    %86 = vector.load %arg1[%c0_92, %c3_93, %c0_94, %c0_95] : memref<1x17x17x12xbf16, #tpu.memory_space<vmem>>, vector<1x1x16x12xbf16>
    %87 = vector.shape_cast %86 : vector<1x1x16x12xbf16> to vector<16x12xbf16>
    %c2_96 = arith.constant 2 : index
    %c0_97 = arith.constant 0 : index
    %c0_98 = arith.constant 0 : index
    %88 = vector.load %arg2[%c2_96, %c0_97, %c0_98] : memref<4x12x8xbf16, #tpu.memory_space<vmem>>, vector<1x12x8xbf16>
    %89 = vector.shape_cast %88 : vector<1x12x8xbf16> to vector<12x8xbf16>
    %cst_99 = arith.constant dense<0.000000e+00> : vector<16x8xf32>
    %90 = tpu.matmul %87, %89, %cst_99 {dimension_numbers = #tpu.dot_dimension_numbers<[1], [0], [0], [1], [0, 0, 1, 1], [], []>} : vector<16x12xbf16>, vector<12x8xbf16>, vector<16x8xf32> -> vector<16x8xf32>
    %91 = arith.addf %85, %90 : vector<16x8xf32>
    %c0_100 = arith.constant 0 : index
    %c3_101 = arith.constant 3 : index
    %c1_102 = arith.constant 1 : index
    %c0_103 = arith.constant 0 : index
    %92 = vector.load %arg1[%c0_100, %c3_101, %c1_102, %c0_103] : memref<1x17x17x12xbf16, #tpu.memory_space<vmem>>, vector<1x1x16x12xbf16>
    %93 = vector.shape_cast %92 : vector<1x1x16x12xbf16> to vector<16x12xbf16>
    %c3_104 = arith.constant 3 : index
    %c0_105 = arith.constant 0 : index
    %c0_106 = arith.constant 0 : index
    %94 = vector.load %arg2[%c3_104, %c0_105, %c0_106] : memref<4x12x8xbf16, #tpu.memory_space<vmem>>, vector<1x12x8xbf16>
    %95 = vector.shape_cast %94 : vector<1x12x8xbf16> to vector<12x8xbf16>
    %cst_107 = arith.constant dense<0.000000e+00> : vector<16x8xf32>
    %96 = tpu.matmul %93, %95, %cst_107 {dimension_numbers = #tpu.dot_dimension_numbers<[1], [0], [0], [1], [0, 0, 1, 1], [], []>} : vector<16x12xbf16>, vector<12x8xbf16>, vector<16x8xf32> -> vector<16x8xf32>
    %97 = arith.addf %91, %96 : vector<16x8xf32>
    %98 = vector.broadcast %0 : vector<1x8xf32> to vector<16x8xf32>
    %99 = arith.addf %97, %98 : vector<16x8xf32>
    %cst_108 = arith.constant 0.000000e+00 : f32
    %100 = vector.broadcast %cst_108 : f32 to vector<16x8xf32>
    %101 = arith.cmpf ogt, %99, %100 : vector<16x8xf32>
    %cst_109 = arith.constant 2.000000e-01 : f32
    %102 = vector.broadcast %cst_109 : f32 to vector<16x8xf32>
    %103 = arith.mulf %102, %99 : vector<16x8xf32>
    %104 = arith.select %101, %99, %103 : vector<16x8xi1>, vector<16x8xf32>
    %105 = arith.truncf %104 : vector<16x8xf32> to vector<16x8xbf16>
    %c0_110 = arith.constant 0 : index
    %c2_111 = arith.constant 2 : index
    %c0_112 = arith.constant 0 : index
    %c0_113 = arith.constant 0 : index
    %106 = vector.load %arg4[%c0_110, %c2_111, %c0_112, %c0_113] : memref<1x16x16x8xbf16, #tpu.memory_space<vmem>>, vector<1x1x16x8xbf16>
    %107 = vector.shape_cast %106 : vector<1x1x16x8xbf16> to vector<16x8xbf16>
    %108 = vector.shape_cast %105 : vector<16x8xbf16> to vector<1x1x16x8xbf16>
    tpu.vector_store %arg4[%c0_110, %c2_111, %c0_112, %c0_113], %108 {strides = array<i32>} : memref<1x16x16x8xbf16, #tpu.memory_space<vmem>>, vector<1x1x16x8xbf16>,
    %cst_114 = arith.constant 0.000000e+00 : f32
    %109 = vector.broadcast %cst_114 : f32 to vector<16x8xf32>
    %c0_115 = arith.constant 0 : index
    %c3_116 = arith.constant 3 : index
    %c0_117 = arith.constant 0 : index
    %c0_118 = arith.constant 0 : index
    %110 = vector.load %arg1[%c0_115, %c3_116, %c0_117, %c0_118] : memref<1x17x17x12xbf16, #tpu.memory_space<vmem>>, vector<1x1x16x12xbf16>
    %111 = vector.shape_cast %110 : vector<1x1x16x12xbf16> to vector<16x12xbf16>
    %c0_119 = arith.constant 0 : index
    %c0_120 = arith.constant 0 : index
    %c0_121 = arith.constant 0 : index
    %112 = vector.load %arg2[%c0_119, %c0_120, %c0_121] : memref<4x12x8xbf16, #tpu.memory_space<vmem>>, vector<1x12x8xbf16>
    %113 = vector.shape_cast %112 : vector<1x12x8xbf16> to vector<12x8xbf16>
    %cst_122 = arith.constant dense<0.000000e+00> : vector<16x8xf32>
    %114 = tpu.matmul %111, %113, %cst_122 {dimension_numbers = #tpu.dot_dimension_numbers<[1], [0], [0], [1], [0, 0, 1, 1], [], []>} : vector<16x12xbf16>, vector<12x8xbf16>, vector<16x8xf32> -> vector<16x8xf32>
    %115 = arith.addf %109, %114 : vector<16x8xf32>
    %c0_123 = arith.constant 0 : index
    %c3_124 = arith.constant 3 : index
    %c1_125 = arith.constant 1 : index
    %c0_126 = arith.constant 0 : index
    %116 = vector.load %arg1[%c0_123, %c3_124, %c1_125, %c0_126] : memref<1x17x17x12xbf16, #tpu.memory_space<vmem>>, vector<1x1x16x12xbf16>
    %117 = vector.shape_cast %116 : vector<1x1x16x12xbf16> to vector<16x12xbf16>
    %c1_127 = arith.constant 1 : index
    %c0_128 = arith.constant 0 : index
    %c0_129 = arith.constant 0 : index
    %118 = vector.load %arg2[%c1_127, %c0_128, %c0_129] : memref<4x12x8xbf16, #tpu.memory_space<vmem>>, vector<1x12x8xbf16>
    %119 = vector.shape_cast %118 : vector<1x12x8xbf16> to vector<12x8xbf16>
    %cst_130 = arith.constant dense<0.000000e+00> : vector<16x8xf32>
    %120 = tpu.matmul %117, %119, %cst_130 {dimension_numbers = #tpu.dot_dimension_numbers<[1], [0], [0], [1], [0, 0, 1, 1], [], []>} : vector<16x12xbf16>, vector<12x8xbf16>, vector<16x8xf32> -> vector<16x8xf32>
    %121 = arith.addf %115, %120 : vector<16x8xf32>
    %c0_131 = arith.constant 0 : index
    %c4 = arith.constant 4 : index
    %c0_132 = arith.constant 0 : index
    %c0_133 = arith.constant 0 : index
    %122 = vector.load %arg1[%c0_131, %c4, %c0_132, %c0_133] : memref<1x17x17x12xbf16, #tpu.memory_space<vmem>>, vector<1x1x16x12xbf16>
    %123 = vector.shape_cast %122 : vector<1x1x16x12xbf16> to vector<16x12xbf16>
    %c2_134 = arith.constant 2 : index
    %c0_135 = arith.constant 0 : index
    %c0_136 = arith.constant 0 : index
    %124 = vector.load %arg2[%c2_134, %c0_135, %c0_136] : memref<4x12x8xbf16, #tpu.memory_space<vmem>>, vector<1x12x8xbf16>
    %125 = vector.shape_cast %124 : vector<1x12x8xbf16> to vector<12x8xbf16>
    %cst_137 = arith.constant dense<0.000000e+00> : vector<16x8xf32>
    %126 = tpu.matmul %123, %125, %cst_137 {dimension_numbers = #tpu.dot_dimension_numbers<[1], [0], [0], [1], [0, 0, 1, 1], [], []>} : vector<16x12xbf16>, vector<12x8xbf16>, vector<16x8xf32> -> vector<16x8xf32>
    %127 = arith.addf %121, %126 : vector<16x8xf32>
    %c0_138 = arith.constant 0 : index
    %c4_139 = arith.constant 4 : index
    %c1_140 = arith.constant 1 : index
    %c0_141 = arith.constant 0 : index
    %128 = vector.load %arg1[%c0_138, %c4_139, %c1_140, %c0_141] : memref<1x17x17x12xbf16, #tpu.memory_space<vmem>>, vector<1x1x16x12xbf16>
    %129 = vector.shape_cast %128 : vector<1x1x16x12xbf16> to vector<16x12xbf16>
    %c3_142 = arith.constant 3 : index
    %c0_143 = arith.constant 0 : index
    %c0_144 = arith.constant 0 : index
    %130 = vector.load %arg2[%c3_142, %c0_143, %c0_144] : memref<4x12x8xbf16, #tpu.memory_space<vmem>>, vector<1x12x8xbf16>
    %131 = vector.shape_cast %130 : vector<1x12x8xbf16> to vector<12x8xbf16>
    %cst_145 = arith.constant dense<0.000000e+00> : vector<16x8xf32>
    %132 = tpu.matmul %129, %131, %cst_145 {dimension_numbers = #tpu.dot_dimension_numbers<[1], [0], [0], [1], [0, 0, 1, 1], [], []>} : vector<16x12xbf16>, vector<12x8xbf16>, vector<16x8xf32> -> vector<16x8xf32>
    %133 = arith.addf %127, %132 : vector<16x8xf32>
    %134 = vector.broadcast %0 : vector<1x8xf32> to vector<16x8xf32>
    %135 = arith.addf %133, %134 : vector<16x8xf32>
    %cst_146 = arith.constant 0.000000e+00 : f32
    %136 = vector.broadcast %cst_146 : f32 to vector<16x8xf32>
    %137 = arith.cmpf ogt, %135, %136 : vector<16x8xf32>
    %cst_147 = arith.constant 2.000000e-01 : f32
    %138 = vector.broadcast %cst_147 : f32 to vector<16x8xf32>
    %139 = arith.mulf %138, %135 : vector<16x8xf32>
    %140 = arith.select %137, %135, %139 : vector<16x8xi1>, vector<16x8xf32>
    %141 = arith.truncf %140 : vector<16x8xf32> to vector<16x8xbf16>
    %c0_148 = arith.constant 0 : index
    %c3_149 = arith.constant 3 : index
    %c0_150 = arith.constant 0 : index
    %c0_151 = arith.constant 0 : index
    %142 = vector.load %arg4[%c0_148, %c3_149, %c0_150, %c0_151] : memref<1x16x16x8xbf16, #tpu.memory_space<vmem>>, vector<1x1x16x8xbf16>
    %143 = vector.shape_cast %142 : vector<1x1x16x8xbf16> to vector<16x8xbf16>
    %144 = vector.shape_cast %141 : vector<16x8xbf16> to vector<1x1x16x8xbf16>
    tpu.vector_store %arg4[%c0_148, %c3_149, %c0_150, %c0_151], %144 {strides = array<i32>} : memref<1x16x16x8xbf16, #tpu.memory_space<vmem>>, vector<1x1x16x8xbf16>,
    %cst_152 = arith.constant 0.000000e+00 : f32
    %145 = vector.broadcast %cst_152 : f32 to vector<16x8xf32>
    %c0_153 = arith.constant 0 : index
    %c4_154 = arith.constant 4 : index
    %c0_155 = arith.constant 0 : index
    %c0_156 = arith.constant 0 : index
    %146 = vector.load %arg1[%c0_153, %c4_154, %c0_155, %c0_156] : memref<1x17x17x12xbf16, #tpu.memory_space<vmem>>, vector<1x1x16x12xbf16>
    %147 = vector.shape_cast %146 : vector<1x1x16x12xbf16> to vector<16x12xbf16>
    %c0_157 = arith.constant 0 : index
    %c0_158 = arith.constant 0 : index
    %c0_159 = arith.constant 0 : index
    %148 = vector.load %arg2[%c0_157, %c0_158, %c0_159] : memref<4x12x8xbf16, #tpu.memory_space<vmem>>, vector<1x12x8xbf16>
    %149 = vector.shape_cast %148 : vector<1x12x8xbf16> to vector<12x8xbf16>
    %cst_160 = arith.constant dense<0.000000e+00> : vector<16x8xf32>
    %150 = tpu.matmul %147, %149, %cst_160 {dimension_numbers = #tpu.dot_dimension_numbers<[1], [0], [0], [1], [0, 0, 1, 1], [], []>} : vector<16x12xbf16>, vector<12x8xbf16>, vector<16x8xf32> -> vector<16x8xf32>
    %151 = arith.addf %145, %150 : vector<16x8xf32>
    %c0_161 = arith.constant 0 : index
    %c4_162 = arith.constant 4 : index
    %c1_163 = arith.constant 1 : index
    %c0_164 = arith.constant 0 : index
    %152 = vector.load %arg1[%c0_161, %c4_162, %c1_163, %c0_164] : memref<1x17x17x12xbf16, #tpu.memory_space<vmem>>, vector<1x1x16x12xbf16>
    %153 = vector.shape_cast %152 : vector<1x1x16x12xbf16> to vector<16x12xbf16>
    %c1_165 = arith.constant 1 : index
    %c0_166 = arith.constant 0 : index
    %c0_167 = arith.constant 0 : index
    %154 = vector.load %arg2[%c1_165, %c0_166, %c0_167] : memref<4x12x8xbf16, #tpu.memory_space<vmem>>, vector<1x12x8xbf16>
    %155 = vector.shape_cast %154 : vector<1x12x8xbf16> to vector<12x8xbf16>
    %cst_168 = arith.constant dense<0.000000e+00> : vector<16x8xf32>
    %156 = tpu.matmul %153, %155, %cst_168 {dimension_numbers = #tpu.dot_dimension_numbers<[1], [0], [0], [1], [0, 0, 1, 1], [], []>} : vector<16x12xbf16>, vector<12x8xbf16>, vector<16x8xf32> -> vector<16x8xf32>
    %157 = arith.addf %151, %156 : vector<16x8xf32>
    %c0_169 = arith.constant 0 : index
    %c5 = arith.constant 5 : index
    %c0_170 = arith.constant 0 : index
    %c0_171 = arith.constant 0 : index
    %158 = vector.load %arg1[%c0_169, %c5, %c0_170, %c0_171] : memref<1x17x17x12xbf16, #tpu.memory_space<vmem>>, vector<1x1x16x12xbf16>
    %159 = vector.shape_cast %158 : vector<1x1x16x12xbf16> to vector<16x12xbf16>
    %c2_172 = arith.constant 2 : index
    %c0_173 = arith.constant 0 : index
    %c0_174 = arith.constant 0 : index
    %160 = vector.load %arg2[%c2_172, %c0_173, %c0_174] : memref<4x12x8xbf16, #tpu.memory_space<vmem>>, vector<1x12x8xbf16>
    %161 = vector.shape_cast %160 : vector<1x12x8xbf16> to vector<12x8xbf16>
    %cst_175 = arith.constant dense<0.000000e+00> : vector<16x8xf32>
    %162 = tpu.matmul %159, %161, %cst_175 {dimension_numbers = #tpu.dot_dimension_numbers<[1], [0], [0], [1], [0, 0, 1, 1], [], []>} : vector<16x12xbf16>, vector<12x8xbf16>, vector<16x8xf32> -> vector<16x8xf32>
    %163 = arith.addf %157, %162 : vector<16x8xf32>
    %c0_176 = arith.constant 0 : index
    %c5_177 = arith.constant 5 : index
    %c1_178 = arith.constant 1 : index
    %c0_179 = arith.constant 0 : index
    %164 = vector.load %arg1[%c0_176, %c5_177, %c1_178, %c0_179] : memref<1x17x17x12xbf16, #tpu.memory_space<vmem>>, vector<1x1x16x12xbf16>
    %165 = vector.shape_cast %164 : vector<1x1x16x12xbf16> to vector<16x12xbf16>
    %c3_180 = arith.constant 3 : index
    %c0_181 = arith.constant 0 : index
    %c0_182 = arith.constant 0 : index
    %166 = vector.load %arg2[%c3_180, %c0_181, %c0_182] : memref<4x12x8xbf16, #tpu.memory_space<vmem>>, vector<1x12x8xbf16>
    %167 = vector.shape_cast %166 : vector<1x12x8xbf16> to vector<12x8xbf16>
    %cst_183 = arith.constant dense<0.000000e+00> : vector<16x8xf32>
    %168 = tpu.matmul %165, %167, %cst_183 {dimension_numbers = #tpu.dot_dimension_numbers<[1], [0], [0], [1], [0, 0, 1, 1], [], []>} : vector<16x12xbf16>, vector<12x8xbf16>, vector<16x8xf32> -> vector<16x8xf32>
    %169 = arith.addf %163, %168 : vector<16x8xf32>
    %170 = vector.broadcast %0 : vector<1x8xf32> to vector<16x8xf32>
    %171 = arith.addf %169, %170 : vector<16x8xf32>
    %cst_184 = arith.constant 0.000000e+00 : f32
    %172 = vector.broadcast %cst_184 : f32 to vector<16x8xf32>
    %173 = arith.cmpf ogt, %171, %172 : vector<16x8xf32>
    %cst_185 = arith.constant 2.000000e-01 : f32
    %174 = vector.broadcast %cst_185 : f32 to vector<16x8xf32>
    %175 = arith.mulf %174, %171 : vector<16x8xf32>
    %176 = arith.select %173, %171, %175 : vector<16x8xi1>, vector<16x8xf32>
    %177 = arith.truncf %176 : vector<16x8xf32> to vector<16x8xbf16>
    %c0_186 = arith.constant 0 : index
    %c4_187 = arith.constant 4 : index
    %c0_188 = arith.constant 0 : index
    %c0_189 = arith.constant 0 : index
    %178 = vector.load %arg4[%c0_186, %c4_187, %c0_188, %c0_189] : memref<1x16x16x8xbf16, #tpu.memory_space<vmem>>, vector<1x1x16x8xbf16>
    %179 = vector.shape_cast %178 : vector<1x1x16x8xbf16> to vector<16x8xbf16>
    %180 = vector.shape_cast %177 : vector<16x8xbf16> to vector<1x1x16x8xbf16>
    tpu.vector_store %arg4[%c0_186, %c4_187, %c0_188, %c0_189], %180 {strides = array<i32>} : memref<1x16x16x8xbf16, #tpu.memory_space<vmem>>, vector<1x1x16x8xbf16>,
    %cst_190 = arith.constant 0.000000e+00 : f32
    %181 = vector.broadcast %cst_190 : f32 to vector<16x8xf32>
    %c0_191 = arith.constant 0 : index
    %c5_192 = arith.constant 5 : index
    %c0_193 = arith.constant 0 : index
    %c0_194 = arith.constant 0 : index
    %182 = vector.load %arg1[%c0_191, %c5_192, %c0_193, %c0_194] : memref<1x17x17x12xbf16, #tpu.memory_space<vmem>>, vector<1x1x16x12xbf16>
    %183 = vector.shape_cast %182 : vector<1x1x16x12xbf16> to vector<16x12xbf16>
    %c0_195 = arith.constant 0 : index
    %c0_196 = arith.constant 0 : index
    %c0_197 = arith.constant 0 : index
    %184 = vector.load %arg2[%c0_195, %c0_196, %c0_197] : memref<4x12x8xbf16, #tpu.memory_space<vmem>>, vector<1x12x8xbf16>
    %185 = vector.shape_cast %184 : vector<1x12x8xbf16> to vector<12x8xbf16>
    %cst_198 = arith.constant dense<0.000000e+00> : vector<16x8xf32>
    %186 = tpu.matmul %183, %185, %cst_198 {dimension_numbers = #tpu.dot_dimension_numbers<[1], [0], [0], [1], [0, 0, 1, 1], [], []>} : vector<16x12xbf16>, vector<12x8xbf16>, vector<16x8xf32> -> vector<16x8xf32>
    %187 = arith.addf %181, %186 : vector<16x8xf32>
    %c0_199 = arith.constant 0 : index
    %c5_200 = arith.constant 5 : index
    %c1_201 = arith.constant 1 : index
    %c0_202 = arith.constant 0 : index
    %188 = vector.load %arg1[%c0_199, %c5_200, %c1_201, %c0_202] : memref<1x17x17x12xbf16, #tpu.memory_space<vmem>>, vector<1x1x16x12xbf16>
    %189 = vector.shape_cast %188 : vector<1x1x16x12xbf16> to vector<16x12xbf16>
    %c1_203 = arith.constant 1 : index
    %c0_204 = arith.constant 0 : index
    %c0_205 = arith.constant 0 : index
    %190 = vector.load %arg2[%c1_203, %c0_204, %c0_205] : memref<4x12x8xbf16, #tpu.memory_space<vmem>>, vector<1x12x8xbf16>
    %191 = vector.shape_cast %190 : vector<1x12x8xbf16> to vector<12x8xbf16>
    %cst_206 = arith.constant dense<0.000000e+00> : vector<16x8xf32>
    %192 = tpu.matmul %189, %191, %cst_206 {dimension_numbers = #tpu.dot_dimension_numbers<[1], [0], [0], [1], [0, 0, 1, 1], [], []>} : vector<16x12xbf16>, vector<12x8xbf16>, vector<16x8xf32> -> vector<16x8xf32>
    %193 = arith.addf %187, %192 : vector<16x8xf32>
    %c0_207 = arith.constant 0 : index
    %c6 = arith.constant 6 : index
    %c0_208 = arith.constant 0 : index
    %c0_209 = arith.constant 0 : index
    %194 = vector.load %arg1[%c0_207, %c6, %c0_208, %c0_209] : memref<1x17x17x12xbf16, #tpu.memory_space<vmem>>, vector<1x1x16x12xbf16>
    %195 = vector.shape_cast %194 : vector<1x1x16x12xbf16> to vector<16x12xbf16>
    %c2_210 = arith.constant 2 : index
    %c0_211 = arith.constant 0 : index
    %c0_212 = arith.constant 0 : index
    %196 = vector.load %arg2[%c2_210, %c0_211, %c0_212] : memref<4x12x8xbf16, #tpu.memory_space<vmem>>, vector<1x12x8xbf16>
    %197 = vector.shape_cast %196 : vector<1x12x8xbf16> to vector<12x8xbf16>
    %cst_213 = arith.constant dense<0.000000e+00> : vector<16x8xf32>
    %198 = tpu.matmul %195, %197, %cst_213 {dimension_numbers = #tpu.dot_dimension_numbers<[1], [0], [0], [1], [0, 0, 1, 1], [], []>} : vector<16x12xbf16>, vector<12x8xbf16>, vector<16x8xf32> -> vector<16x8xf32>
    %199 = arith.addf %193, %198 : vector<16x8xf32>
    %c0_214 = arith.constant 0 : index
    %c6_215 = arith.constant 6 : index
    %c1_216 = arith.constant 1 : index
    %c0_217 = arith.constant 0 : index
    %200 = vector.load %arg1[%c0_214, %c6_215, %c1_216, %c0_217] : memref<1x17x17x12xbf16, #tpu.memory_space<vmem>>, vector<1x1x16x12xbf16>
    %201 = vector.shape_cast %200 : vector<1x1x16x12xbf16> to vector<16x12xbf16>
    %c3_218 = arith.constant 3 : index
    %c0_219 = arith.constant 0 : index
    %c0_220 = arith.constant 0 : index
    %202 = vector.load %arg2[%c3_218, %c0_219, %c0_220] : memref<4x12x8xbf16, #tpu.memory_space<vmem>>, vector<1x12x8xbf16>
    %203 = vector.shape_cast %202 : vector<1x12x8xbf16> to vector<12x8xbf16>
    %cst_221 = arith.constant dense<0.000000e+00> : vector<16x8xf32>
    %204 = tpu.matmul %201, %203, %cst_221 {dimension_numbers = #tpu.dot_dimension_numbers<[1], [0], [0], [1], [0, 0, 1, 1], [], []>} : vector<16x12xbf16>, vector<12x8xbf16>, vector<16x8xf32> -> vector<16x8xf32>
    %205 = arith.addf %199, %204 : vector<16x8xf32>
    %206 = vector.broadcast %0 : vector<1x8xf32> to vector<16x8xf32>
    %207 = arith.addf %205, %206 : vector<16x8xf32>
    %cst_222 = arith.constant 0.000000e+00 : f32
    %208 = vector.broadcast %cst_222 : f32 to vector<16x8xf32>
    %209 = arith.cmpf ogt, %207, %208 : vector<16x8xf32>
    %cst_223 = arith.constant 2.000000e-01 : f32
    %210 = vector.broadcast %cst_223 : f32 to vector<16x8xf32>
    %211 = arith.mulf %210, %207 : vector<16x8xf32>
    %212 = arith.select %209, %207, %211 : vector<16x8xi1>, vector<16x8xf32>
    %213 = arith.truncf %212 : vector<16x8xf32> to vector<16x8xbf16>
    %c0_224 = arith.constant 0 : index
    %c5_225 = arith.constant 5 : index
    %c0_226 = arith.constant 0 : index
    %c0_227 = arith.constant 0 : index
    %214 = vector.load %arg4[%c0_224, %c5_225, %c0_226, %c0_227] : memref<1x16x16x8xbf16, #tpu.memory_space<vmem>>, vector<1x1x16x8xbf16>
    %215 = vector.shape_cast %214 : vector<1x1x16x8xbf16> to vector<16x8xbf16>
    %216 = vector.shape_cast %213 : vector<16x8xbf16> to vector<1x1x16x8xbf16>
    tpu.vector_store %arg4[%c0_224, %c5_225, %c0_226, %c0_227], %216 {strides = array<i32>} : memref<1x16x16x8xbf16, #tpu.memory_space<vmem>>, vector<1x1x16x8xbf16>,
    %cst_228 = arith.constant 0.000000e+00 : f32
    %217 = vector.broadcast %cst_228 : f32 to vector<16x8xf32>
    %c0_229 = arith.constant 0 : index
    %c6_230 = arith.constant 6 : index
    %c0_231 = arith.constant 0 : index
    %c0_232 = arith.constant 0 : index
    %218 = vector.load %arg1[%c0_229, %c6_230, %c0_231, %c0_232] : memref<1x17x17x12xbf16, #tpu.memory_space<vmem>>, vector<1x1x16x12xbf16>
    %219 = vector.shape_cast %218 : vector<1x1x16x12xbf16> to vector<16x12xbf16>
    %c0_233 = arith.constant 0 : index
    %c0_234 = arith.constant 0 : index
    %c0_235 = arith.constant 0 : index
    %220 = vector.load %arg2[%c0_233, %c0_234, %c0_235] : memref<4x12x8xbf16, #tpu.memory_space<vmem>>, vector<1x12x8xbf16>
    %221 = vector.shape_cast %220 : vector<1x12x8xbf16> to vector<12x8xbf16>
    %cst_236 = arith.constant dense<0.000000e+00> : vector<16x8xf32>
    %222 = tpu.matmul %219, %221, %cst_236 {dimension_numbers = #tpu.dot_dimension_numbers<[1], [0], [0], [1], [0, 0, 1, 1], [], []>} : vector<16x12xbf16>, vector<12x8xbf16>, vector<16x8xf32> -> vector<16x8xf32>
    %223 = arith.addf %217, %222 : vector<16x8xf32>
    %c0_237 = arith.constant 0 : index
    %c6_238 = arith.constant 6 : index
    %c1_239 = arith.constant 1 : index
    %c0_240 = arith.constant 0 : index
    %224 = vector.load %arg1[%c0_237, %c6_238, %c1_239, %c0_240] : memref<1x17x17x12xbf16, #tpu.memory_space<vmem>>, vector<1x1x16x12xbf16>
    %225 = vector.shape_cast %224 : vector<1x1x16x12xbf16> to vector<16x12xbf16>
    %c1_241 = arith.constant 1 : index
    %c0_242 = arith.constant 0 : index
    %c0_243 = arith.constant 0 : index
    %226 = vector.load %arg2[%c1_241, %c0_242, %c0_243] : memref<4x12x8xbf16, #tpu.memory_space<vmem>>, vector<1x12x8xbf16>
    %227 = vector.shape_cast %226 : vector<1x12x8xbf16> to vector<12x8xbf16>
    %cst_244 = arith.constant dense<0.000000e+00> : vector<16x8xf32>
    %228 = tpu.matmul %225, %227, %cst_244 {dimension_numbers = #tpu.dot_dimension_numbers<[1], [0], [0], [1], [0, 0, 1, 1], [], []>} : vector<16x12xbf16>, vector<12x8xbf16>, vector<16x8xf32> -> vector<16x8xf32>
    %229 = arith.addf %223, %228 : vector<16x8xf32>
    %c0_245 = arith.constant 0 : index
    %c7 = arith.constant 7 : index
    %c0_246 = arith.constant 0 : index
    %c0_247 = arith.constant 0 : index
    %230 = vector.load %arg1[%c0_245, %c7, %c0_246, %c0_247] : memref<1x17x17x12xbf16, #tpu.memory_space<vmem>>, vector<1x1x16x12xbf16>
    %231 = vector.shape_cast %230 : vector<1x1x16x12xbf16> to vector<16x12xbf16>
    %c2_248 = arith.constant 2 : index
    %c0_249 = arith.constant 0 : index
    %c0_250 = arith.constant 0 : index
    %232 = vector.load %arg2[%c2_248, %c0_249, %c0_250] : memref<4x12x8xbf16, #tpu.memory_space<vmem>>, vector<1x12x8xbf16>
    %233 = vector.shape_cast %232 : vector<1x12x8xbf16> to vector<12x8xbf16>
    %cst_251 = arith.constant dense<0.000000e+00> : vector<16x8xf32>
    %234 = tpu.matmul %231, %233, %cst_251 {dimension_numbers = #tpu.dot_dimension_numbers<[1], [0], [0], [1], [0, 0, 1, 1], [], []>} : vector<16x12xbf16>, vector<12x8xbf16>, vector<16x8xf32> -> vector<16x8xf32>
    %235 = arith.addf %229, %234 : vector<16x8xf32>
    %c0_252 = arith.constant 0 : index
    %c7_253 = arith.constant 7 : index
    %c1_254 = arith.constant 1 : index
    %c0_255 = arith.constant 0 : index
    %236 = vector.load %arg1[%c0_252, %c7_253, %c1_254, %c0_255] : memref<1x17x17x12xbf16, #tpu.memory_space<vmem>>, vector<1x1x16x12xbf16>
    %237 = vector.shape_cast %236 : vector<1x1x16x12xbf16> to vector<16x12xbf16>
    %c3_256 = arith.constant 3 : index
    %c0_257 = arith.constant 0 : index
    %c0_258 = arith.constant 0 : index
    %238 = vector.load %arg2[%c3_256, %c0_257, %c0_258] : memref<4x12x8xbf16, #tpu.memory_space<vmem>>, vector<1x12x8xbf16>
    %239 = vector.shape_cast %238 : vector<1x12x8xbf16> to vector<12x8xbf16>
    %cst_259 = arith.constant dense<0.000000e+00> : vector<16x8xf32>
    %240 = tpu.matmul %237, %239, %cst_259 {dimension_numbers = #tpu.dot_dimension_numbers<[1], [0], [0], [1], [0, 0, 1, 1], [], []>} : vector<16x12xbf16>, vector<12x8xbf16>, vector<16x8xf32> -> vector<16x8xf32>
    %241 = arith.addf %235, %240 : vector<16x8xf32>
    %242 = vector.broadcast %0 : vector<1x8xf32> to vector<16x8xf32>
    %243 = arith.addf %241, %242 : vector<16x8xf32>
    %cst_260 = arith.constant 0.000000e+00 : f32
    %244 = vector.broadcast %cst_260 : f32 to vector<16x8xf32>
    %245 = arith.cmpf ogt, %243, %244 : vector<16x8xf32>
    %cst_261 = arith.constant 2.000000e-01 : f32
    %246 = vector.broadcast %cst_261 : f32 to vector<16x8xf32>
    %247 = arith.mulf %246, %243 : vector<16x8xf32>
    %248 = arith.select %245, %243, %247 : vector<16x8xi1>, vector<16x8xf32>
    %249 = arith.truncf %248 : vector<16x8xf32> to vector<16x8xbf16>
    %c0_262 = arith.constant 0 : index
    %c6_263 = arith.constant 6 : index
    %c0_264 = arith.constant 0 : index
    %c0_265 = arith.constant 0 : index
    %250 = vector.load %arg4[%c0_262, %c6_263, %c0_264, %c0_265] : memref<1x16x16x8xbf16, #tpu.memory_space<vmem>>, vector<1x1x16x8xbf16>
    %251 = vector.shape_cast %250 : vector<1x1x16x8xbf16> to vector<16x8xbf16>
    %252 = vector.shape_cast %249 : vector<16x8xbf16> to vector<1x1x16x8xbf16>
    tpu.vector_store %arg4[%c0_262, %c6_263, %c0_264, %c0_265], %252 {strides = array<i32>} : memref<1x16x16x8xbf16, #tpu.memory_space<vmem>>, vector<1x1x16x8xbf16>,
    %cst_266 = arith.constant 0.000000e+00 : f32
    %253 = vector.broadcast %cst_266 : f32 to vector<16x8xf32>
    %c0_267 = arith.constant 0 : index
    %c7_268 = arith.constant 7 : index
    %c0_269 = arith.constant 0 : index
    %c0_270 = arith.constant 0 : index
    %254 = vector.load %arg1[%c0_267, %c7_268, %c0_269, %c0_270] : memref<1x17x17x12xbf16, #tpu.memory_space<vmem>>, vector<1x1x16x12xbf16>
    %255 = vector.shape_cast %254 : vector<1x1x16x12xbf16> to vector<16x12xbf16>
    %c0_271 = arith.constant 0 : index
    %c0_272 = arith.constant 0 : index
    %c0_273 = arith.constant 0 : index
    %256 = vector.load %arg2[%c0_271, %c0_272, %c0_273] : memref<4x12x8xbf16, #tpu.memory_space<vmem>>, vector<1x12x8xbf16>
    %257 = vector.shape_cast %256 : vector<1x12x8xbf16> to vector<12x8xbf16>
    %cst_274 = arith.constant dense<0.000000e+00> : vector<16x8xf32>
    %258 = tpu.matmul %255, %257, %cst_274 {dimension_numbers = #tpu.dot_dimension_numbers<[1], [0], [0], [1], [0, 0, 1, 1], [], []>} : vector<16x12xbf16>, vector<12x8xbf16>, vector<16x8xf32> -> vector<16x8xf32>
    %259 = arith.addf %253, %258 : vector<16x8xf32>
    %c0_275 = arith.constant 0 : index
    %c7_276 = arith.constant 7 : index
    %c1_277 = arith.constant 1 : index
    %c0_278 = arith.constant 0 : index
    %260 = vector.load %arg1[%c0_275, %c7_276, %c1_277, %c0_278] : memref<1x17x17x12xbf16, #tpu.memory_space<vmem>>, vector<1x1x16x12xbf16>
    %261 = vector.shape_cast %260 : vector<1x1x16x12xbf16> to vector<16x12xbf16>
    %c1_279 = arith.constant 1 : index
    %c0_280 = arith.constant 0 : index
    %c0_281 = arith.constant 0 : index
    %262 = vector.load %arg2[%c1_279, %c0_280, %c0_281] : memref<4x12x8xbf16, #tpu.memory_space<vmem>>, vector<1x12x8xbf16>
    %263 = vector.shape_cast %262 : vector<1x12x8xbf16> to vector<12x8xbf16>
    %cst_282 = arith.constant dense<0.000000e+00> : vector<16x8xf32>
    %264 = tpu.matmul %261, %263, %cst_282 {dimension_numbers = #tpu.dot_dimension_numbers<[1], [0], [0], [1], [0, 0, 1, 1], [], []>} : vector<16x12xbf16>, vector<12x8xbf16>, vector<16x8xf32> -> vector<16x8xf32>
    %265 = arith.addf %259, %264 : vector<16x8xf32>
    %c0_283 = arith.constant 0 : index
    %c8 = arith.constant 8 : index
    %c0_284 = arith.constant 0 : index
    %c0_285 = arith.constant 0 : index
    %266 = vector.load %arg1[%c0_283, %c8, %c0_284, %c0_285] : memref<1x17x17x12xbf16, #tpu.memory_space<vmem>>, vector<1x1x16x12xbf16>
    %267 = vector.shape_cast %266 : vector<1x1x16x12xbf16> to vector<16x12xbf16>
    %c2_286 = arith.constant 2 : index
    %c0_287 = arith.constant 0 : index
    %c0_288 = arith.constant 0 : index
    %268 = vector.load %arg2[%c2_286, %c0_287, %c0_288] : memref<4x12x8xbf16, #tpu.memory_space<vmem>>, vector<1x12x8xbf16>
    %269 = vector.shape_cast %268 : vector<1x12x8xbf16> to vector<12x8xbf16>
    %cst_289 = arith.constant dense<0.000000e+00> : vector<16x8xf32>
    %270 = tpu.matmul %267, %269, %cst_289 {dimension_numbers = #tpu.dot_dimension_numbers<[1], [0], [0], [1], [0, 0, 1, 1], [], []>} : vector<16x12xbf16>, vector<12x8xbf16>, vector<16x8xf32> -> vector<16x8xf32>
    %271 = arith.addf %265, %270 : vector<16x8xf32>
    %c0_290 = arith.constant 0 : index
    %c8_291 = arith.constant 8 : index
    %c1_292 = arith.constant 1 : index
    %c0_293 = arith.constant 0 : index
    %272 = vector.load %arg1[%c0_290, %c8_291, %c1_292, %c0_293] : memref<1x17x17x12xbf16, #tpu.memory_space<vmem>>, vector<1x1x16x12xbf16>
    %273 = vector.shape_cast %272 : vector<1x1x16x12xbf16> to vector<16x12xbf16>
    %c3_294 = arith.constant 3 : index
    %c0_295 = arith.constant 0 : index
    %c0_296 = arith.constant 0 : index
    %274 = vector.load %arg2[%c3_294, %c0_295, %c0_296] : memref<4x12x8xbf16, #tpu.memory_space<vmem>>, vector<1x12x8xbf16>
    %275 = vector.shape_cast %274 : vector<1x12x8xbf16> to vector<12x8xbf16>
    %cst_297 = arith.constant dense<0.000000e+00> : vector<16x8xf32>
    %276 = tpu.matmul %273, %275, %cst_297 {dimension_numbers = #tpu.dot_dimension_numbers<[1], [0], [0], [1], [0, 0, 1, 1], [], []>} : vector<16x12xbf16>, vector<12x8xbf16>, vector<16x8xf32> -> vector<16x8xf32>
    %277 = arith.addf %271, %276 : vector<16x8xf32>
    %278 = vector.broadcast %0 : vector<1x8xf32> to vector<16x8xf32>
    %279 = arith.addf %277, %278 : vector<16x8xf32>
    %cst_298 = arith.constant 0.000000e+00 : f32
    %280 = vector.broadcast %cst_298 : f32 to vector<16x8xf32>
    %281 = arith.cmpf ogt, %279, %280 : vector<16x8xf32>
    %cst_299 = arith.constant 2.000000e-01 : f32
    %282 = vector.broadcast %cst_299 : f32 to vector<16x8xf32>
    %283 = arith.mulf %282, %279 : vector<16x8xf32>
    %284 = arith.select %281, %279, %283 : vector<16x8xi1>, vector<16x8xf32>
    %285 = arith.truncf %284 : vector<16x8xf32> to vector<16x8xbf16>
    %c0_300 = arith.constant 0 : index
    %c7_301 = arith.constant 7 : index
    %c0_302 = arith.constant 0 : index
    %c0_303 = arith.constant 0 : index
    %286 = vector.load %arg4[%c0_300, %c7_301, %c0_302, %c0_303] : memref<1x16x16x8xbf16, #tpu.memory_space<vmem>>, vector<1x1x16x8xbf16>
    %287 = vector.shape_cast %286 : vector<1x1x16x8xbf16> to vector<16x8xbf16>
    %288 = vector.shape_cast %285 : vector<16x8xbf16> to vector<1x1x16x8xbf16>
    tpu.vector_store %arg4[%c0_300, %c7_301, %c0_302, %c0_303], %288 {strides = array<i32>} : memref<1x16x16x8xbf16, #tpu.memory_space<vmem>>, vector<1x1x16x8xbf16>,
    %cst_304 = arith.constant 0.000000e+00 : f32
    %289 = vector.broadcast %cst_304 : f32 to vector<16x8xf32>
    %c0_305 = arith.constant 0 : index
    %c8_306 = arith.constant 8 : index
    %c0_307 = arith.constant 0 : index
    %c0_308 = arith.constant 0 : index
    %290 = vector.load %arg1[%c0_305, %c8_306, %c0_307, %c0_308] : memref<1x17x17x12xbf16, #tpu.memory_space<vmem>>, vector<1x1x16x12xbf16>
    %291 = vector.shape_cast %290 : vector<1x1x16x12xbf16> to vector<16x12xbf16>
    %c0_309 = arith.constant 0 : index
    %c0_310 = arith.constant 0 : index
    %c0_311 = arith.constant 0 : index
    %292 = vector.load %arg2[%c0_309, %c0_310, %c0_311] : memref<4x12x8xbf16, #tpu.memory_space<vmem>>, vector<1x12x8xbf16>
    %293 = vector.shape_cast %292 : vector<1x12x8xbf16> to vector<12x8xbf16>
    %cst_312 = arith.constant dense<0.000000e+00> : vector<16x8xf32>
    %294 = tpu.matmul %291, %293, %cst_312 {dimension_numbers = #tpu.dot_dimension_numbers<[1], [0], [0], [1], [0, 0, 1, 1], [], []>} : vector<16x12xbf16>, vector<12x8xbf16>, vector<16x8xf32> -> vector<16x8xf32>
    %295 = arith.addf %289, %294 : vector<16x8xf32>
    %c0_313 = arith.constant 0 : index
    %c8_314 = arith.constant 8 : index
    %c1_315 = arith.constant 1 : index
    %c0_316 = arith.constant 0 : index
    %296 = vector.load %arg1[%c0_313, %c8_314, %c1_315, %c0_316] : memref<1x17x17x12xbf16, #tpu.memory_space<vmem>>, vector<1x1x16x12xbf16>
    %297 = vector.shape_cast %296 : vector<1x1x16x12xbf16> to vector<16x12xbf16>
    %c1_317 = arith.constant 1 : index
    %c0_318 = arith.constant 0 : index
    %c0_319 = arith.constant 0 : index
    %298 = vector.load %arg2[%c1_317, %c0_318, %c0_319] : memref<4x12x8xbf16, #tpu.memory_space<vmem>>, vector<1x12x8xbf16>
    %299 = vector.shape_cast %298 : vector<1x12x8xbf16> to vector<12x8xbf16>
    %cst_320 = arith.constant dense<0.000000e+00> : vector<16x8xf32>
    %300 = tpu.matmul %297, %299, %cst_320 {dimension_numbers = #tpu.dot_dimension_numbers<[1], [0], [0], [1], [0, 0, 1, 1], [], []>} : vector<16x12xbf16>, vector<12x8xbf16>, vector<16x8xf32> -> vector<16x8xf32>
    %301 = arith.addf %295, %300 : vector<16x8xf32>
    %c0_321 = arith.constant 0 : index
    %c9 = arith.constant 9 : index
    %c0_322 = arith.constant 0 : index
    %c0_323 = arith.constant 0 : index
    %302 = vector.load %arg1[%c0_321, %c9, %c0_322, %c0_323] : memref<1x17x17x12xbf16, #tpu.memory_space<vmem>>, vector<1x1x16x12xbf16>
    %303 = vector.shape_cast %302 : vector<1x1x16x12xbf16> to vector<16x12xbf16>
    %c2_324 = arith.constant 2 : index
    %c0_325 = arith.constant 0 : index
    %c0_326 = arith.constant 0 : index
    %304 = vector.load %arg2[%c2_324, %c0_325, %c0_326] : memref<4x12x8xbf16, #tpu.memory_space<vmem>>, vector<1x12x8xbf16>
    %305 = vector.shape_cast %304 : vector<1x12x8xbf16> to vector<12x8xbf16>
    %cst_327 = arith.constant dense<0.000000e+00> : vector<16x8xf32>
    %306 = tpu.matmul %303, %305, %cst_327 {dimension_numbers = #tpu.dot_dimension_numbers<[1], [0], [0], [1], [0, 0, 1, 1], [], []>} : vector<16x12xbf16>, vector<12x8xbf16>, vector<16x8xf32> -> vector<16x8xf32>
    %307 = arith.addf %301, %306 : vector<16x8xf32>
    %c0_328 = arith.constant 0 : index
    %c9_329 = arith.constant 9 : index
    %c1_330 = arith.constant 1 : index
    %c0_331 = arith.constant 0 : index
    %308 = vector.load %arg1[%c0_328, %c9_329, %c1_330, %c0_331] : memref<1x17x17x12xbf16, #tpu.memory_space<vmem>>, vector<1x1x16x12xbf16>
    %309 = vector.shape_cast %308 : vector<1x1x16x12xbf16> to vector<16x12xbf16>
    %c3_332 = arith.constant 3 : index
    %c0_333 = arith.constant 0 : index
    %c0_334 = arith.constant 0 : index
    %310 = vector.load %arg2[%c3_332, %c0_333, %c0_334] : memref<4x12x8xbf16, #tpu.memory_space<vmem>>, vector<1x12x8xbf16>
    %311 = vector.shape_cast %310 : vector<1x12x8xbf16> to vector<12x8xbf16>
    %cst_335 = arith.constant dense<0.000000e+00> : vector<16x8xf32>
    %312 = tpu.matmul %309, %311, %cst_335 {dimension_numbers = #tpu.dot_dimension_numbers<[1], [0], [0], [1], [0, 0, 1, 1], [], []>} : vector<16x12xbf16>, vector<12x8xbf16>, vector<16x8xf32> -> vector<16x8xf32>
    %313 = arith.addf %307, %312 : vector<16x8xf32>
    %314 = vector.broadcast %0 : vector<1x8xf32> to vector<16x8xf32>
    %315 = arith.addf %313, %314 : vector<16x8xf32>
    %cst_336 = arith.constant 0.000000e+00 : f32
    %316 = vector.broadcast %cst_336 : f32 to vector<16x8xf32>
    %317 = arith.cmpf ogt, %315, %316 : vector<16x8xf32>
    %cst_337 = arith.constant 2.000000e-01 : f32
    %318 = vector.broadcast %cst_337 : f32 to vector<16x8xf32>
    %319 = arith.mulf %318, %315 : vector<16x8xf32>
    %320 = arith.select %317, %315, %319 : vector<16x8xi1>, vector<16x8xf32>
    %321 = arith.truncf %320 : vector<16x8xf32> to vector<16x8xbf16>
    %c0_338 = arith.constant 0 : index
    %c8_339 = arith.constant 8 : index
    %c0_340 = arith.constant 0 : index
    %c0_341 = arith.constant 0 : index
    %322 = vector.load %arg4[%c0_338, %c8_339, %c0_340, %c0_341] : memref<1x16x16x8xbf16, #tpu.memory_space<vmem>>, vector<1x1x16x8xbf16>
    %323 = vector.shape_cast %322 : vector<1x1x16x8xbf16> to vector<16x8xbf16>
    %324 = vector.shape_cast %321 : vector<16x8xbf16> to vector<1x1x16x8xbf16>
    tpu.vector_store %arg4[%c0_338, %c8_339, %c0_340, %c0_341], %324 {strides = array<i32>} : memref<1x16x16x8xbf16, #tpu.memory_space<vmem>>, vector<1x1x16x8xbf16>,
    %cst_342 = arith.constant 0.000000e+00 : f32
    %325 = vector.broadcast %cst_342 : f32 to vector<16x8xf32>
    %c0_343 = arith.constant 0 : index
    %c9_344 = arith.constant 9 : index
    %c0_345 = arith.constant 0 : index
    %c0_346 = arith.constant 0 : index
    %326 = vector.load %arg1[%c0_343, %c9_344, %c0_345, %c0_346] : memref<1x17x17x12xbf16, #tpu.memory_space<vmem>>, vector<1x1x16x12xbf16>
    %327 = vector.shape_cast %326 : vector<1x1x16x12xbf16> to vector<16x12xbf16>
    %c0_347 = arith.constant 0 : index
    %c0_348 = arith.constant 0 : index
    %c0_349 = arith.constant 0 : index
    %328 = vector.load %arg2[%c0_347, %c0_348, %c0_349] : memref<4x12x8xbf16, #tpu.memory_space<vmem>>, vector<1x12x8xbf16>
    %329 = vector.shape_cast %328 : vector<1x12x8xbf16> to vector<12x8xbf16>
    %cst_350 = arith.constant dense<0.000000e+00> : vector<16x8xf32>
    %330 = tpu.matmul %327, %329, %cst_350 {dimension_numbers = #tpu.dot_dimension_numbers<[1], [0], [0], [1], [0, 0, 1, 1], [], []>} : vector<16x12xbf16>, vector<12x8xbf16>, vector<16x8xf32> -> vector<16x8xf32>
    %331 = arith.addf %325, %330 : vector<16x8xf32>
    %c0_351 = arith.constant 0 : index
    %c9_352 = arith.constant 9 : index
    %c1_353 = arith.constant 1 : index
    %c0_354 = arith.constant 0 : index
    %332 = vector.load %arg1[%c0_351, %c9_352, %c1_353, %c0_354] : memref<1x17x17x12xbf16, #tpu.memory_space<vmem>>, vector<1x1x16x12xbf16>
    %333 = vector.shape_cast %332 : vector<1x1x16x12xbf16> to vector<16x12xbf16>
    %c1_355 = arith.constant 1 : index
    %c0_356 = arith.constant 0 : index
    %c0_357 = arith.constant 0 : index
    %334 = vector.load %arg2[%c1_355, %c0_356, %c0_357] : memref<4x12x8xbf16, #tpu.memory_space<vmem>>, vector<1x12x8xbf16>
    %335 = vector.shape_cast %334 : vector<1x12x8xbf16> to vector<12x8xbf16>
    %cst_358 = arith.constant dense<0.000000e+00> : vector<16x8xf32>
    %336 = tpu.matmul %333, %335, %cst_358 {dimension_numbers = #tpu.dot_dimension_numbers<[1], [0], [0], [1], [0, 0, 1, 1], [], []>} : vector<16x12xbf16>, vector<12x8xbf16>, vector<16x8xf32> -> vector<16x8xf32>
    %337 = arith.addf %331, %336 : vector<16x8xf32>
    %c0_359 = arith.constant 0 : index
    %c10 = arith.constant 10 : index
    %c0_360 = arith.constant 0 : index
    %c0_361 = arith.constant 0 : index
    %338 = vector.load %arg1[%c0_359, %c10, %c0_360, %c0_361] : memref<1x17x17x12xbf16, #tpu.memory_space<vmem>>, vector<1x1x16x12xbf16>
    %339 = vector.shape_cast %338 : vector<1x1x16x12xbf16> to vector<16x12xbf16>
    %c2_362 = arith.constant 2 : index
    %c0_363 = arith.constant 0 : index
    %c0_364 = arith.constant 0 : index
    %340 = vector.load %arg2[%c2_362, %c0_363, %c0_364] : memref<4x12x8xbf16, #tpu.memory_space<vmem>>, vector<1x12x8xbf16>
    %341 = vector.shape_cast %340 : vector<1x12x8xbf16> to vector<12x8xbf16>
    %cst_365 = arith.constant dense<0.000000e+00> : vector<16x8xf32>
    %342 = tpu.matmul %339, %341, %cst_365 {dimension_numbers = #tpu.dot_dimension_numbers<[1], [0], [0], [1], [0, 0, 1, 1], [], []>} : vector<16x12xbf16>, vector<12x8xbf16>, vector<16x8xf32> -> vector<16x8xf32>
    %343 = arith.addf %337, %342 : vector<16x8xf32>
    %c0_366 = arith.constant 0 : index
    %c10_367 = arith.constant 10 : index
    %c1_368 = arith.constant 1 : index
    %c0_369 = arith.constant 0 : index
    %344 = vector.load %arg1[%c0_366, %c10_367, %c1_368, %c0_369] : memref<1x17x17x12xbf16, #tpu.memory_space<vmem>>, vector<1x1x16x12xbf16>
    %345 = vector.shape_cast %344 : vector<1x1x16x12xbf16> to vector<16x12xbf16>
    %c3_370 = arith.constant 3 : index
    %c0_371 = arith.constant 0 : index
    %c0_372 = arith.constant 0 : index
    %346 = vector.load %arg2[%c3_370, %c0_371, %c0_372] : memref<4x12x8xbf16, #tpu.memory_space<vmem>>, vector<1x12x8xbf16>
    %347 = vector.shape_cast %346 : vector<1x12x8xbf16> to vector<12x8xbf16>
    %cst_373 = arith.constant dense<0.000000e+00> : vector<16x8xf32>
    %348 = tpu.matmul %345, %347, %cst_373 {dimension_numbers = #tpu.dot_dimension_numbers<[1], [0], [0], [1], [0, 0, 1, 1], [], []>} : vector<16x12xbf16>, vector<12x8xbf16>, vector<16x8xf32> -> vector<16x8xf32>
    %349 = arith.addf %343, %348 : vector<16x8xf32>
    %350 = vector.broadcast %0 : vector<1x8xf32> to vector<16x8xf32>
    %351 = arith.addf %349, %350 : vector<16x8xf32>
    %cst_374 = arith.constant 0.000000e+00 : f32
    %352 = vector.broadcast %cst_374 : f32 to vector<16x8xf32>
    %353 = arith.cmpf ogt, %351, %352 : vector<16x8xf32>
    %cst_375 = arith.constant 2.000000e-01 : f32
    %354 = vector.broadcast %cst_375 : f32 to vector<16x8xf32>
    %355 = arith.mulf %354, %351 : vector<16x8xf32>
    %356 = arith.select %353, %351, %355 : vector<16x8xi1>, vector<16x8xf32>
    %357 = arith.truncf %356 : vector<16x8xf32> to vector<16x8xbf16>
    %c0_376 = arith.constant 0 : index
    %c9_377 = arith.constant 9 : index
    %c0_378 = arith.constant 0 : index
    %c0_379 = arith.constant 0 : index
    %358 = vector.load %arg4[%c0_376, %c9_377, %c0_378, %c0_379] : memref<1x16x16x8xbf16, #tpu.memory_space<vmem>>, vector<1x1x16x8xbf16>
    %359 = vector.shape_cast %358 : vector<1x1x16x8xbf16> to vector<16x8xbf16>
    %360 = vector.shape_cast %357 : vector<16x8xbf16> to vector<1x1x16x8xbf16>
    tpu.vector_store %arg4[%c0_376, %c9_377, %c0_378, %c0_379], %360 {strides = array<i32>} : memref<1x16x16x8xbf16, #tpu.memory_space<vmem>>, vector<1x1x16x8xbf16>,
    %cst_380 = arith.constant 0.000000e+00 : f32
    %361 = vector.broadcast %cst_380 : f32 to vector<16x8xf32>
    %c0_381 = arith.constant 0 : index
    %c10_382 = arith.constant 10 : index
    %c0_383 = arith.constant 0 : index
    %c0_384 = arith.constant 0 : index
    %362 = vector.load %arg1[%c0_381, %c10_382, %c0_383, %c0_384] : memref<1x17x17x12xbf16, #tpu.memory_space<vmem>>, vector<1x1x16x12xbf16>
    %363 = vector.shape_cast %362 : vector<1x1x16x12xbf16> to vector<16x12xbf16>
    %c0_385 = arith.constant 0 : index
    %c0_386 = arith.constant 0 : index
    %c0_387 = arith.constant 0 : index
    %364 = vector.load %arg2[%c0_385, %c0_386, %c0_387] : memref<4x12x8xbf16, #tpu.memory_space<vmem>>, vector<1x12x8xbf16>
    %365 = vector.shape_cast %364 : vector<1x12x8xbf16> to vector<12x8xbf16>
    %cst_388 = arith.constant dense<0.000000e+00> : vector<16x8xf32>
    %366 = tpu.matmul %363, %365, %cst_388 {dimension_numbers = #tpu.dot_dimension_numbers<[1], [0], [0], [1], [0, 0, 1, 1], [], []>} : vector<16x12xbf16>, vector<12x8xbf16>, vector<16x8xf32> -> vector<16x8xf32>
    %367 = arith.addf %361, %366 : vector<16x8xf32>
    %c0_389 = arith.constant 0 : index
    %c10_390 = arith.constant 10 : index
    %c1_391 = arith.constant 1 : index
    %c0_392 = arith.constant 0 : index
    %368 = vector.load %arg1[%c0_389, %c10_390, %c1_391, %c0_392] : memref<1x17x17x12xbf16, #tpu.memory_space<vmem>>, vector<1x1x16x12xbf16>
    %369 = vector.shape_cast %368 : vector<1x1x16x12xbf16> to vector<16x12xbf16>
    %c1_393 = arith.constant 1 : index
    %c0_394 = arith.constant 0 : index
    %c0_395 = arith.constant 0 : index
    %370 = vector.load %arg2[%c1_393, %c0_394, %c0_395] : memref<4x12x8xbf16, #tpu.memory_space<vmem>>, vector<1x12x8xbf16>
    %371 = vector.shape_cast %370 : vector<1x12x8xbf16> to vector<12x8xbf16>
    %cst_396 = arith.constant dense<0.000000e+00> : vector<16x8xf32>
    %372 = tpu.matmul %369, %371, %cst_396 {dimension_numbers = #tpu.dot_dimension_numbers<[1], [0], [0], [1], [0, 0, 1, 1], [], []>} : vector<16x12xbf16>, vector<12x8xbf16>, vector<16x8xf32> -> vector<16x8xf32>
    %373 = arith.addf %367, %372 : vector<16x8xf32>
    %c0_397 = arith.constant 0 : index
    %c11 = arith.constant 11 : index
    %c0_398 = arith.constant 0 : index
    %c0_399 = arith.constant 0 : index
    %374 = vector.load %arg1[%c0_397, %c11, %c0_398, %c0_399] : memref<1x17x17x12xbf16, #tpu.memory_space<vmem>>, vector<1x1x16x12xbf16>
    %375 = vector.shape_cast %374 : vector<1x1x16x12xbf16> to vector<16x12xbf16>
    %c2_400 = arith.constant 2 : index
    %c0_401 = arith.constant 0 : index
    %c0_402 = arith.constant 0 : index
    %376 = vector.load %arg2[%c2_400, %c0_401, %c0_402] : memref<4x12x8xbf16, #tpu.memory_space<vmem>>, vector<1x12x8xbf16>
    %377 = vector.shape_cast %376 : vector<1x12x8xbf16> to vector<12x8xbf16>
    %cst_403 = arith.constant dense<0.000000e+00> : vector<16x8xf32>
    %378 = tpu.matmul %375, %377, %cst_403 {dimension_numbers = #tpu.dot_dimension_numbers<[1], [0], [0], [1], [0, 0, 1, 1], [], []>} : vector<16x12xbf16>, vector<12x8xbf16>, vector<16x8xf32> -> vector<16x8xf32>
    %379 = arith.addf %373, %378 : vector<16x8xf32>
    %c0_404 = arith.constant 0 : index
    %c11_405 = arith.constant 11 : index
    %c1_406 = arith.constant 1 : index
    %c0_407 = arith.constant 0 : index
    %380 = vector.load %arg1[%c0_404, %c11_405, %c1_406, %c0_407] : memref<1x17x17x12xbf16, #tpu.memory_space<vmem>>, vector<1x1x16x12xbf16>
    %381 = vector.shape_cast %380 : vector<1x1x16x12xbf16> to vector<16x12xbf16>
    %c3_408 = arith.constant 3 : index
    %c0_409 = arith.constant 0 : index
    %c0_410 = arith.constant 0 : index
    %382 = vector.load %arg2[%c3_408, %c0_409, %c0_410] : memref<4x12x8xbf16, #tpu.memory_space<vmem>>, vector<1x12x8xbf16>
    %383 = vector.shape_cast %382 : vector<1x12x8xbf16> to vector<12x8xbf16>
    %cst_411 = arith.constant dense<0.000000e+00> : vector<16x8xf32>
    %384 = tpu.matmul %381, %383, %cst_411 {dimension_numbers = #tpu.dot_dimension_numbers<[1], [0], [0], [1], [0, 0, 1, 1], [], []>} : vector<16x12xbf16>, vector<12x8xbf16>, vector<16x8xf32> -> vector<16x8xf32>
    %385 = arith.addf %379, %384 : vector<16x8xf32>
    %386 = vector.broadcast %0 : vector<1x8xf32> to vector<16x8xf32>
    %387 = arith.addf %385, %386 : vector<16x8xf32>
    %cst_412 = arith.constant 0.000000e+00 : f32
    %388 = vector.broadcast %cst_412 : f32 to vector<16x8xf32>
    %389 = arith.cmpf ogt, %387, %388 : vector<16x8xf32>
    %cst_413 = arith.constant 2.000000e-01 : f32
    %390 = vector.broadcast %cst_413 : f32 to vector<16x8xf32>
    %391 = arith.mulf %390, %387 : vector<16x8xf32>
    %392 = arith.select %389, %387, %391 : vector<16x8xi1>, vector<16x8xf32>
    %393 = arith.truncf %392 : vector<16x8xf32> to vector<16x8xbf16>
    %c0_414 = arith.constant 0 : index
    %c10_415 = arith.constant 10 : index
    %c0_416 = arith.constant 0 : index
    %c0_417 = arith.constant 0 : index
    %394 = vector.load %arg4[%c0_414, %c10_415, %c0_416, %c0_417] : memref<1x16x16x8xbf16, #tpu.memory_space<vmem>>, vector<1x1x16x8xbf16>
    %395 = vector.shape_cast %394 : vector<1x1x16x8xbf16> to vector<16x8xbf16>
    %396 = vector.shape_cast %393 : vector<16x8xbf16> to vector<1x1x16x8xbf16>
    tpu.vector_store %arg4[%c0_414, %c10_415, %c0_416, %c0_417], %396 {strides = array<i32>} : memref<1x16x16x8xbf16, #tpu.memory_space<vmem>>, vector<1x1x16x8xbf16>,
    %cst_418 = arith.constant 0.000000e+00 : f32
    %397 = vector.broadcast %cst_418 : f32 to vector<16x8xf32>
    %c0_419 = arith.constant 0 : index
    %c11_420 = arith.constant 11 : index
    %c0_421 = arith.constant 0 : index
    %c0_422 = arith.constant 0 : index
    %398 = vector.load %arg1[%c0_419, %c11_420, %c0_421, %c0_422] : memref<1x17x17x12xbf16, #tpu.memory_space<vmem>>, vector<1x1x16x12xbf16>
    %399 = vector.shape_cast %398 : vector<1x1x16x12xbf16> to vector<16x12xbf16>
    %c0_423 = arith.constant 0 : index
    %c0_424 = arith.constant 0 : index
    %c0_425 = arith.constant 0 : index
    %400 = vector.load %arg2[%c0_423, %c0_424, %c0_425] : memref<4x12x8xbf16, #tpu.memory_space<vmem>>, vector<1x12x8xbf16>
    %401 = vector.shape_cast %400 : vector<1x12x8xbf16> to vector<12x8xbf16>
    %cst_426 = arith.constant dense<0.000000e+00> : vector<16x8xf32>
    %402 = tpu.matmul %399, %401, %cst_426 {dimension_numbers = #tpu.dot_dimension_numbers<[1], [0], [0], [1], [0, 0, 1, 1], [], []>} : vector<16x12xbf16>, vector<12x8xbf16>, vector<16x8xf32> -> vector<16x8xf32>
    %403 = arith.addf %397, %402 : vector<16x8xf32>
    %c0_427 = arith.constant 0 : index
    %c11_428 = arith.constant 11 : index
    %c1_429 = arith.constant 1 : index
    %c0_430 = arith.constant 0 : index
    %404 = vector.load %arg1[%c0_427, %c11_428, %c1_429, %c0_430] : memref<1x17x17x12xbf16, #tpu.memory_space<vmem>>, vector<1x1x16x12xbf16>
    %405 = vector.shape_cast %404 : vector<1x1x16x12xbf16> to vector<16x12xbf16>
    %c1_431 = arith.constant 1 : index
    %c0_432 = arith.constant 0 : index
    %c0_433 = arith.constant 0 : index
    %406 = vector.load %arg2[%c1_431, %c0_432, %c0_433] : memref<4x12x8xbf16, #tpu.memory_space<vmem>>, vector<1x12x8xbf16>
    %407 = vector.shape_cast %406 : vector<1x12x8xbf16> to vector<12x8xbf16>
    %cst_434 = arith.constant dense<0.000000e+00> : vector<16x8xf32>
    %408 = tpu.matmul %405, %407, %cst_434 {dimension_numbers = #tpu.dot_dimension_numbers<[1], [0], [0], [1], [0, 0, 1, 1], [], []>} : vector<16x12xbf16>, vector<12x8xbf16>, vector<16x8xf32> -> vector<16x8xf32>
    %409 = arith.addf %403, %408 : vector<16x8xf32>
    %c0_435 = arith.constant 0 : index
    %c12 = arith.constant 12 : index
    %c0_436 = arith.constant 0 : index
    %c0_437 = arith.constant 0 : index
    %410 = vector.load %arg1[%c0_435, %c12, %c0_436, %c0_437] : memref<1x17x17x12xbf16, #tpu.memory_space<vmem>>, vector<1x1x16x12xbf16>
    %411 = vector.shape_cast %410 : vector<1x1x16x12xbf16> to vector<16x12xbf16>
    %c2_438 = arith.constant 2 : index
    %c0_439 = arith.constant 0 : index
    %c0_440 = arith.constant 0 : index
    %412 = vector.load %arg2[%c2_438, %c0_439, %c0_440] : memref<4x12x8xbf16, #tpu.memory_space<vmem>>, vector<1x12x8xbf16>
    %413 = vector.shape_cast %412 : vector<1x12x8xbf16> to vector<12x8xbf16>
    %cst_441 = arith.constant dense<0.000000e+00> : vector<16x8xf32>
    %414 = tpu.matmul %411, %413, %cst_441 {dimension_numbers = #tpu.dot_dimension_numbers<[1], [0], [0], [1], [0, 0, 1, 1], [], []>} : vector<16x12xbf16>, vector<12x8xbf16>, vector<16x8xf32> -> vector<16x8xf32>
    %415 = arith.addf %409, %414 : vector<16x8xf32>
    %c0_442 = arith.constant 0 : index
    %c12_443 = arith.constant 12 : index
    %c1_444 = arith.constant 1 : index
    %c0_445 = arith.constant 0 : index
    %416 = vector.load %arg1[%c0_442, %c12_443, %c1_444, %c0_445] : memref<1x17x17x12xbf16, #tpu.memory_space<vmem>>, vector<1x1x16x12xbf16>
    %417 = vector.shape_cast %416 : vector<1x1x16x12xbf16> to vector<16x12xbf16>
    %c3_446 = arith.constant 3 : index
    %c0_447 = arith.constant 0 : index
    %c0_448 = arith.constant 0 : index
    %418 = vector.load %arg2[%c3_446, %c0_447, %c0_448] : memref<4x12x8xbf16, #tpu.memory_space<vmem>>, vector<1x12x8xbf16>
    %419 = vector.shape_cast %418 : vector<1x12x8xbf16> to vector<12x8xbf16>
    %cst_449 = arith.constant dense<0.000000e+00> : vector<16x8xf32>
    %420 = tpu.matmul %417, %419, %cst_449 {dimension_numbers = #tpu.dot_dimension_numbers<[1], [0], [0], [1], [0, 0, 1, 1], [], []>} : vector<16x12xbf16>, vector<12x8xbf16>, vector<16x8xf32> -> vector<16x8xf32>
    %421 = arith.addf %415, %420 : vector<16x8xf32>
    %422 = vector.broadcast %0 : vector<1x8xf32> to vector<16x8xf32>
    %423 = arith.addf %421, %422 : vector<16x8xf32>
    %cst_450 = arith.constant 0.000000e+00 : f32
    %424 = vector.broadcast %cst_450 : f32 to vector<16x8xf32>
    %425 = arith.cmpf ogt, %423, %424 : vector<16x8xf32>
    %cst_451 = arith.constant 2.000000e-01 : f32
    %426 = vector.broadcast %cst_451 : f32 to vector<16x8xf32>
    %427 = arith.mulf %426, %423 : vector<16x8xf32>
    %428 = arith.select %425, %423, %427 : vector<16x8xi1>, vector<16x8xf32>
    %429 = arith.truncf %428 : vector<16x8xf32> to vector<16x8xbf16>
    %c0_452 = arith.constant 0 : index
    %c11_453 = arith.constant 11 : index
    %c0_454 = arith.constant 0 : index
    %c0_455 = arith.constant 0 : index
    %430 = vector.load %arg4[%c0_452, %c11_453, %c0_454, %c0_455] : memref<1x16x16x8xbf16, #tpu.memory_space<vmem>>, vector<1x1x16x8xbf16>
    %431 = vector.shape_cast %430 : vector<1x1x16x8xbf16> to vector<16x8xbf16>
    %432 = vector.shape_cast %429 : vector<16x8xbf16> to vector<1x1x16x8xbf16>
    tpu.vector_store %arg4[%c0_452, %c11_453, %c0_454, %c0_455], %432 {strides = array<i32>} : memref<1x16x16x8xbf16, #tpu.memory_space<vmem>>, vector<1x1x16x8xbf16>,
    %cst_456 = arith.constant 0.000000e+00 : f32
    %433 = vector.broadcast %cst_456 : f32 to vector<16x8xf32>
    %c0_457 = arith.constant 0 : index
    %c12_458 = arith.constant 12 : index
    %c0_459 = arith.constant 0 : index
    %c0_460 = arith.constant 0 : index
    %434 = vector.load %arg1[%c0_457, %c12_458, %c0_459, %c0_460] : memref<1x17x17x12xbf16, #tpu.memory_space<vmem>>, vector<1x1x16x12xbf16>
    %435 = vector.shape_cast %434 : vector<1x1x16x12xbf16> to vector<16x12xbf16>
    %c0_461 = arith.constant 0 : index
    %c0_462 = arith.constant 0 : index
    %c0_463 = arith.constant 0 : index
    %436 = vector.load %arg2[%c0_461, %c0_462, %c0_463] : memref<4x12x8xbf16, #tpu.memory_space<vmem>>, vector<1x12x8xbf16>
    %437 = vector.shape_cast %436 : vector<1x12x8xbf16> to vector<12x8xbf16>
    %cst_464 = arith.constant dense<0.000000e+00> : vector<16x8xf32>
    %438 = tpu.matmul %435, %437, %cst_464 {dimension_numbers = #tpu.dot_dimension_numbers<[1], [0], [0], [1], [0, 0, 1, 1], [], []>} : vector<16x12xbf16>, vector<12x8xbf16>, vector<16x8xf32> -> vector<16x8xf32>
    %439 = arith.addf %433, %438 : vector<16x8xf32>
    %c0_465 = arith.constant 0 : index
    %c12_466 = arith.constant 12 : index
    %c1_467 = arith.constant 1 : index
    %c0_468 = arith.constant 0 : index
    %440 = vector.load %arg1[%c0_465, %c12_466, %c1_467, %c0_468] : memref<1x17x17x12xbf16, #tpu.memory_space<vmem>>, vector<1x1x16x12xbf16>
    %441 = vector.shape_cast %440 : vector<1x1x16x12xbf16> to vector<16x12xbf16>
    %c1_469 = arith.constant 1 : index
    %c0_470 = arith.constant 0 : index
    %c0_471 = arith.constant 0 : index
    %442 = vector.load %arg2[%c1_469, %c0_470, %c0_471] : memref<4x12x8xbf16, #tpu.memory_space<vmem>>, vector<1x12x8xbf16>
    %443 = vector.shape_cast %442 : vector<1x12x8xbf16> to vector<12x8xbf16>
    %cst_472 = arith.constant dense<0.000000e+00> : vector<16x8xf32>
    %444 = tpu.matmul %441, %443, %cst_472 {dimension_numbers = #tpu.dot_dimension_numbers<[1], [0], [0], [1], [0, 0, 1, 1], [], []>} : vector<16x12xbf16>, vector<12x8xbf16>, vector<16x8xf32> -> vector<16x8xf32>
    %445 = arith.addf %439, %444 : vector<16x8xf32>
    %c0_473 = arith.constant 0 : index
    %c13 = arith.constant 13 : index
    %c0_474 = arith.constant 0 : index
    %c0_475 = arith.constant 0 : index
    %446 = vector.load %arg1[%c0_473, %c13, %c0_474, %c0_475] : memref<1x17x17x12xbf16, #tpu.memory_space<vmem>>, vector<1x1x16x12xbf16>
    %447 = vector.shape_cast %446 : vector<1x1x16x12xbf16> to vector<16x12xbf16>
    %c2_476 = arith.constant 2 : index
    %c0_477 = arith.constant 0 : index
    %c0_478 = arith.constant 0 : index
    %448 = vector.load %arg2[%c2_476, %c0_477, %c0_478] : memref<4x12x8xbf16, #tpu.memory_space<vmem>>, vector<1x12x8xbf16>
    %449 = vector.shape_cast %448 : vector<1x12x8xbf16> to vector<12x8xbf16>
    %cst_479 = arith.constant dense<0.000000e+00> : vector<16x8xf32>
    %450 = tpu.matmul %447, %449, %cst_479 {dimension_numbers = #tpu.dot_dimension_numbers<[1], [0], [0], [1], [0, 0, 1, 1], [], []>} : vector<16x12xbf16>, vector<12x8xbf16>, vector<16x8xf32> -> vector<16x8xf32>
    %451 = arith.addf %445, %450 : vector<16x8xf32>
    %c0_480 = arith.constant 0 : index
    %c13_481 = arith.constant 13 : index
    %c1_482 = arith.constant 1 : index
    %c0_483 = arith.constant 0 : index
    %452 = vector.load %arg1[%c0_480, %c13_481, %c1_482, %c0_483] : memref<1x17x17x12xbf16, #tpu.memory_space<vmem>>, vector<1x1x16x12xbf16>
    %453 = vector.shape_cast %452 : vector<1x1x16x12xbf16> to vector<16x12xbf16>
    %c3_484 = arith.constant 3 : index
    %c0_485 = arith.constant 0 : index
    %c0_486 = arith.constant 0 : index
    %454 = vector.load %arg2[%c3_484, %c0_485, %c0_486] : memref<4x12x8xbf16, #tpu.memory_space<vmem>>, vector<1x12x8xbf16>
    %455 = vector.shape_cast %454 : vector<1x12x8xbf16> to vector<12x8xbf16>
    %cst_487 = arith.constant dense<0.000000e+00> : vector<16x8xf32>
    %456 = tpu.matmul %453, %455, %cst_487 {dimension_numbers = #tpu.dot_dimension_numbers<[1], [0], [0], [1], [0, 0, 1, 1], [], []>} : vector<16x12xbf16>, vector<12x8xbf16>, vector<16x8xf32> -> vector<16x8xf32>
    %457 = arith.addf %451, %456 : vector<16x8xf32>
    %458 = vector.broadcast %0 : vector<1x8xf32> to vector<16x8xf32>
    %459 = arith.addf %457, %458 : vector<16x8xf32>
    %cst_488 = arith.constant 0.000000e+00 : f32
    %460 = vector.broadcast %cst_488 : f32 to vector<16x8xf32>
    %461 = arith.cmpf ogt, %459, %460 : vector<16x8xf32>
    %cst_489 = arith.constant 2.000000e-01 : f32
    %462 = vector.broadcast %cst_489 : f32 to vector<16x8xf32>
    %463 = arith.mulf %462, %459 : vector<16x8xf32>
    %464 = arith.select %461, %459, %463 : vector<16x8xi1>, vector<16x8xf32>
    %465 = arith.truncf %464 : vector<16x8xf32> to vector<16x8xbf16>
    %c0_490 = arith.constant 0 : index
    %c12_491 = arith.constant 12 : index
    %c0_492 = arith.constant 0 : index
    %c0_493 = arith.constant 0 : index
    %466 = vector.load %arg4[%c0_490, %c12_491, %c0_492, %c0_493] : memref<1x16x16x8xbf16, #tpu.memory_space<vmem>>, vector<1x1x16x8xbf16>
    %467 = vector.shape_cast %466 : vector<1x1x16x8xbf16> to vector<16x8xbf16>
    %468 = vector.shape_cast %465 : vector<16x8xbf16> to vector<1x1x16x8xbf16>
    tpu.vector_store %arg4[%c0_490, %c12_491, %c0_492, %c0_493], %468 {strides = array<i32>} : memref<1x16x16x8xbf16, #tpu.memory_space<vmem>>, vector<1x1x16x8xbf16>,
    %cst_494 = arith.constant 0.000000e+00 : f32
    %469 = vector.broadcast %cst_494 : f32 to vector<16x8xf32>
    %c0_495 = arith.constant 0 : index
    %c13_496 = arith.constant 13 : index
    %c0_497 = arith.constant 0 : index
    %c0_498 = arith.constant 0 : index
    %470 = vector.load %arg1[%c0_495, %c13_496, %c0_497, %c0_498] : memref<1x17x17x12xbf16, #tpu.memory_space<vmem>>, vector<1x1x16x12xbf16>
    %471 = vector.shape_cast %470 : vector<1x1x16x12xbf16> to vector<16x12xbf16>
    %c0_499 = arith.constant 0 : index
    %c0_500 = arith.constant 0 : index
    %c0_501 = arith.constant 0 : index
    %472 = vector.load %arg2[%c0_499, %c0_500, %c0_501] : memref<4x12x8xbf16, #tpu.memory_space<vmem>>, vector<1x12x8xbf16>
    %473 = vector.shape_cast %472 : vector<1x12x8xbf16> to vector<12x8xbf16>
    %cst_502 = arith.constant dense<0.000000e+00> : vector<16x8xf32>
    %474 = tpu.matmul %471, %473, %cst_502 {dimension_numbers = #tpu.dot_dimension_numbers<[1], [0], [0], [1], [0, 0, 1, 1], [], []>} : vector<16x12xbf16>, vector<12x8xbf16>, vector<16x8xf32> -> vector<16x8xf32>
    %475 = arith.addf %469, %474 : vector<16x8xf32>
    %c0_503 = arith.constant 0 : index
    %c13_504 = arith.constant 13 : index
    %c1_505 = arith.constant 1 : index
    %c0_506 = arith.constant 0 : index
    %476 = vector.load %arg1[%c0_503, %c13_504, %c1_505, %c0_506] : memref<1x17x17x12xbf16, #tpu.memory_space<vmem>>, vector<1x1x16x12xbf16>
    %477 = vector.shape_cast %476 : vector<1x1x16x12xbf16> to vector<16x12xbf16>
    %c1_507 = arith.constant 1 : index
    %c0_508 = arith.constant 0 : index
    %c0_509 = arith.constant 0 : index
    %478 = vector.load %arg2[%c1_507, %c0_508, %c0_509] : memref<4x12x8xbf16, #tpu.memory_space<vmem>>, vector<1x12x8xbf16>
    %479 = vector.shape_cast %478 : vector<1x12x8xbf16> to vector<12x8xbf16>
    %cst_510 = arith.constant dense<0.000000e+00> : vector<16x8xf32>
    %480 = tpu.matmul %477, %479, %cst_510 {dimension_numbers = #tpu.dot_dimension_numbers<[1], [0], [0], [1], [0, 0, 1, 1], [], []>} : vector<16x12xbf16>, vector<12x8xbf16>, vector<16x8xf32> -> vector<16x8xf32>
    %481 = arith.addf %475, %480 : vector<16x8xf32>
    %c0_511 = arith.constant 0 : index
    %c14 = arith.constant 14 : index
    %c0_512 = arith.constant 0 : index
    %c0_513 = arith.constant 0 : index
    %482 = vector.load %arg1[%c0_511, %c14, %c0_512, %c0_513] : memref<1x17x17x12xbf16, #tpu.memory_space<vmem>>, vector<1x1x16x12xbf16>
    %483 = vector.shape_cast %482 : vector<1x1x16x12xbf16> to vector<16x12xbf16>
    %c2_514 = arith.constant 2 : index
    %c0_515 = arith.constant 0 : index
    %c0_516 = arith.constant 0 : index
    %484 = vector.load %arg2[%c2_514, %c0_515, %c0_516] : memref<4x12x8xbf16, #tpu.memory_space<vmem>>, vector<1x12x8xbf16>
    %485 = vector.shape_cast %484 : vector<1x12x8xbf16> to vector<12x8xbf16>
    %cst_517 = arith.constant dense<0.000000e+00> : vector<16x8xf32>
    %486 = tpu.matmul %483, %485, %cst_517 {dimension_numbers = #tpu.dot_dimension_numbers<[1], [0], [0], [1], [0, 0, 1, 1], [], []>} : vector<16x12xbf16>, vector<12x8xbf16>, vector<16x8xf32> -> vector<16x8xf32>
    %487 = arith.addf %481, %486 : vector<16x8xf32>
    %c0_518 = arith.constant 0 : index
    %c14_519 = arith.constant 14 : index
    %c1_520 = arith.constant 1 : index
    %c0_521 = arith.constant 0 : index
    %488 = vector.load %arg1[%c0_518, %c14_519, %c1_520, %c0_521] : memref<1x17x17x12xbf16, #tpu.memory_space<vmem>>, vector<1x1x16x12xbf16>
    %489 = vector.shape_cast %488 : vector<1x1x16x12xbf16> to vector<16x12xbf16>
    %c3_522 = arith.constant 3 : index
    %c0_523 = arith.constant 0 : index
    %c0_524 = arith.constant 0 : index
    %490 = vector.load %arg2[%c3_522, %c0_523, %c0_524] : memref<4x12x8xbf16, #tpu.memory_space<vmem>>, vector<1x12x8xbf16>
    %491 = vector.shape_cast %490 : vector<1x12x8xbf16> to vector<12x8xbf16>
    %cst_525 = arith.constant dense<0.000000e+00> : vector<16x8xf32>
    %492 = tpu.matmul %489, %491, %cst_525 {dimension_numbers = #tpu.dot_dimension_numbers<[1], [0], [0], [1], [0, 0, 1, 1], [], []>} : vector<16x12xbf16>, vector<12x8xbf16>, vector<16x8xf32> -> vector<16x8xf32>
    %493 = arith.addf %487, %492 : vector<16x8xf32>
    %494 = vector.broadcast %0 : vector<1x8xf32> to vector<16x8xf32>
    %495 = arith.addf %493, %494 : vector<16x8xf32>
    %cst_526 = arith.constant 0.000000e+00 : f32
    %496 = vector.broadcast %cst_526 : f32 to vector<16x8xf32>
    %497 = arith.cmpf ogt, %495, %496 : vector<16x8xf32>
    %cst_527 = arith.constant 2.000000e-01 : f32
    %498 = vector.broadcast %cst_527 : f32 to vector<16x8xf32>
    %499 = arith.mulf %498, %495 : vector<16x8xf32>
    %500 = arith.select %497, %495, %499 : vector<16x8xi1>, vector<16x8xf32>
    %501 = arith.truncf %500 : vector<16x8xf32> to vector<16x8xbf16>
    %c0_528 = arith.constant 0 : index
    %c13_529 = arith.constant 13 : index
    %c0_530 = arith.constant 0 : index
    %c0_531 = arith.constant 0 : index
    %502 = vector.load %arg4[%c0_528, %c13_529, %c0_530, %c0_531] : memref<1x16x16x8xbf16, #tpu.memory_space<vmem>>, vector<1x1x16x8xbf16>
    %503 = vector.shape_cast %502 : vector<1x1x16x8xbf16> to vector<16x8xbf16>
    %504 = vector.shape_cast %501 : vector<16x8xbf16> to vector<1x1x16x8xbf16>
    tpu.vector_store %arg4[%c0_528, %c13_529, %c0_530, %c0_531], %504 {strides = array<i32>} : memref<1x16x16x8xbf16, #tpu.memory_space<vmem>>, vector<1x1x16x8xbf16>,
    %cst_532 = arith.constant 0.000000e+00 : f32
    %505 = vector.broadcast %cst_532 : f32 to vector<16x8xf32>
    %c0_533 = arith.constant 0 : index
    %c14_534 = arith.constant 14 : index
    %c0_535 = arith.constant 0 : index
    %c0_536 = arith.constant 0 : index
    %506 = vector.load %arg1[%c0_533, %c14_534, %c0_535, %c0_536] : memref<1x17x17x12xbf16, #tpu.memory_space<vmem>>, vector<1x1x16x12xbf16>
    %507 = vector.shape_cast %506 : vector<1x1x16x12xbf16> to vector<16x12xbf16>
    %c0_537 = arith.constant 0 : index
    %c0_538 = arith.constant 0 : index
    %c0_539 = arith.constant 0 : index
    %508 = vector.load %arg2[%c0_537, %c0_538, %c0_539] : memref<4x12x8xbf16, #tpu.memory_space<vmem>>, vector<1x12x8xbf16>
    %509 = vector.shape_cast %508 : vector<1x12x8xbf16> to vector<12x8xbf16>
    %cst_540 = arith.constant dense<0.000000e+00> : vector<16x8xf32>
    %510 = tpu.matmul %507, %509, %cst_540 {dimension_numbers = #tpu.dot_dimension_numbers<[1], [0], [0], [1], [0, 0, 1, 1], [], []>} : vector<16x12xbf16>, vector<12x8xbf16>, vector<16x8xf32> -> vector<16x8xf32>
    %511 = arith.addf %505, %510 : vector<16x8xf32>
    %c0_541 = arith.constant 0 : index
    %c14_542 = arith.constant 14 : index
    %c1_543 = arith.constant 1 : index
    %c0_544 = arith.constant 0 : index
    %512 = vector.load %arg1[%c0_541, %c14_542, %c1_543, %c0_544] : memref<1x17x17x12xbf16, #tpu.memory_space<vmem>>, vector<1x1x16x12xbf16>
    %513 = vector.shape_cast %512 : vector<1x1x16x12xbf16> to vector<16x12xbf16>
    %c1_545 = arith.constant 1 : index
    %c0_546 = arith.constant 0 : index
    %c0_547 = arith.constant 0 : index
    %514 = vector.load %arg2[%c1_545, %c0_546, %c0_547] : memref<4x12x8xbf16, #tpu.memory_space<vmem>>, vector<1x12x8xbf16>
    %515 = vector.shape_cast %514 : vector<1x12x8xbf16> to vector<12x8xbf16>
    %cst_548 = arith.constant dense<0.000000e+00> : vector<16x8xf32>
    %516 = tpu.matmul %513, %515, %cst_548 {dimension_numbers = #tpu.dot_dimension_numbers<[1], [0], [0], [1], [0, 0, 1, 1], [], []>} : vector<16x12xbf16>, vector<12x8xbf16>, vector<16x8xf32> -> vector<16x8xf32>
    %517 = arith.addf %511, %516 : vector<16x8xf32>
    %c0_549 = arith.constant 0 : index
    %c15 = arith.constant 15 : index
    %c0_550 = arith.constant 0 : index
    %c0_551 = arith.constant 0 : index
    %518 = vector.load %arg1[%c0_549, %c15, %c0_550, %c0_551] : memref<1x17x17x12xbf16, #tpu.memory_space<vmem>>, vector<1x1x16x12xbf16>
    %519 = vector.shape_cast %518 : vector<1x1x16x12xbf16> to vector<16x12xbf16>
    %c2_552 = arith.constant 2 : index
    %c0_553 = arith.constant 0 : index
    %c0_554 = arith.constant 0 : index
    %520 = vector.load %arg2[%c2_552, %c0_553, %c0_554] : memref<4x12x8xbf16, #tpu.memory_space<vmem>>, vector<1x12x8xbf16>
    %521 = vector.shape_cast %520 : vector<1x12x8xbf16> to vector<12x8xbf16>
    %cst_555 = arith.constant dense<0.000000e+00> : vector<16x8xf32>
    %522 = tpu.matmul %519, %521, %cst_555 {dimension_numbers = #tpu.dot_dimension_numbers<[1], [0], [0], [1], [0, 0, 1, 1], [], []>} : vector<16x12xbf16>, vector<12x8xbf16>, vector<16x8xf32> -> vector<16x8xf32>
    %523 = arith.addf %517, %522 : vector<16x8xf32>
    %c0_556 = arith.constant 0 : index
    %c15_557 = arith.constant 15 : index
    %c1_558 = arith.constant 1 : index
    %c0_559 = arith.constant 0 : index
    %524 = vector.load %arg1[%c0_556, %c15_557, %c1_558, %c0_559] : memref<1x17x17x12xbf16, #tpu.memory_space<vmem>>, vector<1x1x16x12xbf16>
    %525 = vector.shape_cast %524 : vector<1x1x16x12xbf16> to vector<16x12xbf16>
    %c3_560 = arith.constant 3 : index
    %c0_561 = arith.constant 0 : index
    %c0_562 = arith.constant 0 : index
    %526 = vector.load %arg2[%c3_560, %c0_561, %c0_562] : memref<4x12x8xbf16, #tpu.memory_space<vmem>>, vector<1x12x8xbf16>
    %527 = vector.shape_cast %526 : vector<1x12x8xbf16> to vector<12x8xbf16>
    %cst_563 = arith.constant dense<0.000000e+00> : vector<16x8xf32>
    %528 = tpu.matmul %525, %527, %cst_563 {dimension_numbers = #tpu.dot_dimension_numbers<[1], [0], [0], [1], [0, 0, 1, 1], [], []>} : vector<16x12xbf16>, vector<12x8xbf16>, vector<16x8xf32> -> vector<16x8xf32>
    %529 = arith.addf %523, %528 : vector<16x8xf32>
    %530 = vector.broadcast %0 : vector<1x8xf32> to vector<16x8xf32>
    %531 = arith.addf %529, %530 : vector<16x8xf32>
    %cst_564 = arith.constant 0.000000e+00 : f32
    %532 = vector.broadcast %cst_564 : f32 to vector<16x8xf32>
    %533 = arith.cmpf ogt, %531, %532 : vector<16x8xf32>
    %cst_565 = arith.constant 2.000000e-01 : f32
    %534 = vector.broadcast %cst_565 : f32 to vector<16x8xf32>
    %535 = arith.mulf %534, %531 : vector<16x8xf32>
    %536 = arith.select %533, %531, %535 : vector<16x8xi1>, vector<16x8xf32>
    %537 = arith.truncf %536 : vector<16x8xf32> to vector<16x8xbf16>
    %c0_566 = arith.constant 0 : index
    %c14_567 = arith.constant 14 : index
    %c0_568 = arith.constant 0 : index
    %c0_569 = arith.constant 0 : index
    %538 = vector.load %arg4[%c0_566, %c14_567, %c0_568, %c0_569] : memref<1x16x16x8xbf16, #tpu.memory_space<vmem>>, vector<1x1x16x8xbf16>
    %539 = vector.shape_cast %538 : vector<1x1x16x8xbf16> to vector<16x8xbf16>
    %540 = vector.shape_cast %537 : vector<16x8xbf16> to vector<1x1x16x8xbf16>
    tpu.vector_store %arg4[%c0_566, %c14_567, %c0_568, %c0_569], %540 {strides = array<i32>} : memref<1x16x16x8xbf16, #tpu.memory_space<vmem>>, vector<1x1x16x8xbf16>,
    %cst_570 = arith.constant 0.000000e+00 : f32
    %541 = vector.broadcast %cst_570 : f32 to vector<16x8xf32>
    %c0_571 = arith.constant 0 : index
    %c15_572 = arith.constant 15 : index
    %c0_573 = arith.constant 0 : index
    %c0_574 = arith.constant 0 : index
    %542 = vector.load %arg1[%c0_571, %c15_572, %c0_573, %c0_574] : memref<1x17x17x12xbf16, #tpu.memory_space<vmem>>, vector<1x1x16x12xbf16>
    %543 = vector.shape_cast %542 : vector<1x1x16x12xbf16> to vector<16x12xbf16>
    %c0_575 = arith.constant 0 : index
    %c0_576 = arith.constant 0 : index
    %c0_577 = arith.constant 0 : index
    %544 = vector.load %arg2[%c0_575, %c0_576, %c0_577] : memref<4x12x8xbf16, #tpu.memory_space<vmem>>, vector<1x12x8xbf16>
    %545 = vector.shape_cast %544 : vector<1x12x8xbf16> to vector<12x8xbf16>
    %cst_578 = arith.constant dense<0.000000e+00> : vector<16x8xf32>
    %546 = tpu.matmul %543, %545, %cst_578 {dimension_numbers = #tpu.dot_dimension_numbers<[1], [0], [0], [1], [0, 0, 1, 1], [], []>} : vector<16x12xbf16>, vector<12x8xbf16>, vector<16x8xf32> -> vector<16x8xf32>
    %547 = arith.addf %541, %546 : vector<16x8xf32>
    %c0_579 = arith.constant 0 : index
    %c15_580 = arith.constant 15 : index
    %c1_581 = arith.constant 1 : index
    %c0_582 = arith.constant 0 : index
    %548 = vector.load %arg1[%c0_579, %c15_580, %c1_581, %c0_582] : memref<1x17x17x12xbf16, #tpu.memory_space<vmem>>, vector<1x1x16x12xbf16>
    %549 = vector.shape_cast %548 : vector<1x1x16x12xbf16> to vector<16x12xbf16>
    %c1_583 = arith.constant 1 : index
    %c0_584 = arith.constant 0 : index
    %c0_585 = arith.constant 0 : index
    %550 = vector.load %arg2[%c1_583, %c0_584, %c0_585] : memref<4x12x8xbf16, #tpu.memory_space<vmem>>, vector<1x12x8xbf16>
    %551 = vector.shape_cast %550 : vector<1x12x8xbf16> to vector<12x8xbf16>
    %cst_586 = arith.constant dense<0.000000e+00> : vector<16x8xf32>
    %552 = tpu.matmul %549, %551, %cst_586 {dimension_numbers = #tpu.dot_dimension_numbers<[1], [0], [0], [1], [0, 0, 1, 1], [], []>} : vector<16x12xbf16>, vector<12x8xbf16>, vector<16x8xf32> -> vector<16x8xf32>
    %553 = arith.addf %547, %552 : vector<16x8xf32>
    %c0_587 = arith.constant 0 : index
    %c16 = arith.constant 16 : index
    %c0_588 = arith.constant 0 : index
    %c0_589 = arith.constant 0 : index
    %554 = vector.load %arg1[%c0_587, %c16, %c0_588, %c0_589] : memref<1x17x17x12xbf16, #tpu.memory_space<vmem>>, vector<1x1x16x12xbf16>
    %555 = vector.shape_cast %554 : vector<1x1x16x12xbf16> to vector<16x12xbf16>
    %c2_590 = arith.constant 2 : index
    %c0_591 = arith.constant 0 : index
    %c0_592 = arith.constant 0 : index
    %556 = vector.load %arg2[%c2_590, %c0_591, %c0_592] : memref<4x12x8xbf16, #tpu.memory_space<vmem>>, vector<1x12x8xbf16>
    %557 = vector.shape_cast %556 : vector<1x12x8xbf16> to vector<12x8xbf16>
    %cst_593 = arith.constant dense<0.000000e+00> : vector<16x8xf32>
    %558 = tpu.matmul %555, %557, %cst_593 {dimension_numbers = #tpu.dot_dimension_numbers<[1], [0], [0], [1], [0, 0, 1, 1], [], []>} : vector<16x12xbf16>, vector<12x8xbf16>, vector<16x8xf32> -> vector<16x8xf32>
    %559 = arith.addf %553, %558 : vector<16x8xf32>
    %c0_594 = arith.constant 0 : index
    %c16_595 = arith.constant 16 : index
    %c1_596 = arith.constant 1 : index
    %c0_597 = arith.constant 0 : index
    %560 = vector.load %arg1[%c0_594, %c16_595, %c1_596, %c0_597] : memref<1x17x17x12xbf16, #tpu.memory_space<vmem>>, vector<1x1x16x12xbf16>
    %561 = vector.shape_cast %560 : vector<1x1x16x12xbf16> to vector<16x12xbf16>
    %c3_598 = arith.constant 3 : index
    %c0_599 = arith.constant 0 : index
    %c0_600 = arith.constant 0 : index
    %562 = vector.load %arg2[%c3_598, %c0_599, %c0_600] : memref<4x12x8xbf16, #tpu.memory_space<vmem>>, vector<1x12x8xbf16>
    %563 = vector.shape_cast %562 : vector<1x12x8xbf16> to vector<12x8xbf16>
    %cst_601 = arith.constant dense<0.000000e+00> : vector<16x8xf32>
    %564 = tpu.matmul %561, %563, %cst_601 {dimension_numbers = #tpu.dot_dimension_numbers<[1], [0], [0], [1], [0, 0, 1, 1], [], []>} : vector<16x12xbf16>, vector<12x8xbf16>, vector<16x8xf32> -> vector<16x8xf32>
    %565 = arith.addf %559, %564 : vector<16x8xf32>
    %566 = vector.broadcast %0 : vector<1x8xf32> to vector<16x8xf32>
    %567 = arith.addf %565, %566 : vector<16x8xf32>
    %cst_602 = arith.constant 0.000000e+00 : f32
    %568 = vector.broadcast %cst_602 : f32 to vector<16x8xf32>
    %569 = arith.cmpf ogt, %567, %568 : vector<16x8xf32>
    %cst_603 = arith.constant 2.000000e-01 : f32
    %570 = vector.broadcast %cst_603 : f32 to vector<16x8xf32>
    %571 = arith.mulf %570, %567 : vector<16x8xf32>
    %572 = arith.select %569, %567, %571 : vector<16x8xi1>, vector<16x8xf32>
    %573 = arith.truncf %572 : vector<16x8xf32> to vector<16x8xbf16>
    %c0_604 = arith.constant 0 : index
    %c15_605 = arith.constant 15 : index
    %c0_606 = arith.constant 0 : index
    %c0_607 = arith.constant 0 : index
    %574 = vector.load %arg4[%c0_604, %c15_605, %c0_606, %c0_607] : memref<1x16x16x8xbf16, #tpu.memory_space<vmem>>, vector<1x1x16x8xbf16>
    %575 = vector.shape_cast %574 : vector<1x1x16x8xbf16> to vector<16x8xbf16>
    %576 = vector.shape_cast %573 : vector<16x8xbf16> to vector<1x1x16x8xbf16>
    tpu.vector_store %arg4[%c0_604, %c15_605, %c0_606, %c0_607], %576 {strides = array<i32>} : memref<1x16x16x8xbf16, #tpu.memory_space<vmem>>, vector<1x1x16x8xbf16>,
    return
  }
  func.func @transform_0(%arg0: i32) -> (i32, i32, i32, i32) {
    %c0_i32 = arith.constant 0 : i32
    %c0_i32_0 = arith.constant 0 : i32
    %c0_i32_1 = arith.constant 0 : i32
    %c0_i32_2 = arith.constant 0 : i32
    return %arg0, %c0_i32, %c0_i32_0, %c0_i32_1 : i32, i32, i32, i32
  }
  func.func @transform_1(%arg0: i32) -> (i32, i32, i32) {
    %c0_i32 = arith.constant 0 : i32
    %c0_i32_0 = arith.constant 0 : i32
    %c0_i32_1 = arith.constant 0 : i32
    %c0_i32_2 = arith.constant 0 : i32
    return %c0_i32, %c0_i32_0, %c0_i32_1 : i32, i32, i32
  }
  func.func @transform_2(%arg0: i32) -> (i32, i32) {
    %c0_i32 = arith.constant 0 : i32
    %c0_i32_0 = arith.constant 0 : i32
    %c0_i32_1 = arith.constant 0 : i32
    return %c0_i32, %c0_i32_0 : i32, i32
  }
  func.func @transform_3(%arg0: i32) -> (i32, i32, i32, i32) {
    %c0_i32 = arith.constant 0 : i32
    %c0_i32_0 = arith.constant 0 : i32
    %c0_i32_1 = arith.constant 0 : i32
    %c0_i32_2 = arith.constant 0 : i32
    return %arg0, %c0_i32, %c0_i32_0, %c0_i32_1 : i32, i32, i32, i32
  }
}

</mosaic_0001>

<bundles_post_ra>
// kernel: tpu_custom_call.1
= control target key start
LH: loop header
LB: loop body
LE: loop exit
PB: predicated region body
PF: predicated region fallthrough
CT: control target
= control target key end

     0   :  { %s6145_s12 = smov 0   ;;  %s6903_s0 = inlined_call_operand.vmem [shape: bf16[2,17,17,12], index: 0, kind: input, shape index: {}]   ;;  %s6904_s1 = inlined_call_operand.vmem [shape: bf16[4,12,8], index: 1, kind: input, shape index: {}]   ;;  %s6905_s2 = inlined_call_operand.vmem [shape: f32[1,8], index: 2, kind: input, shape index: {}]   ;;  %s6906_s3 = inlined_call_operand.vmem [shape: bf16[2,16,16,8], index: 3, kind: output, shape index: {}]  }
   0x1 LB: > { %s4912_s13 = sadd.s32 4294967295, %s6121_s12   ;;  %p4916_p0 = scmp.ge.s32.totalorder %s6121_s12, 1  ;;  %s6121_s12 = sphi %s6145_s12, %s13_s12  }
   0x2   : > { %p137_p1 = scmp.lt.s32.totalorder %s6121_s12, 3 }
   0x4   : > { %p138_p2 = pnand %p4916_p0, %p137_p1 }
   0x5   : > { %vm211_vm0 = vcmask (!%p138_p2), 1045504   ;;  %v6123_v0 = vmov (!%p138_p2), 0.0   ;;  %v5970_v1 = vld [vmem:[%s6904_s1 + $0x8] sm:$0x3f] (!%p138_p2)   ;;  %v5971_v2 = vld [vmem:[%s6904_s1] sm:$0x3f] (!%p138_p2)  }
   0x6   : > { %141 = sbr.rel (%p138_p2) target bundleno = 499 (0x1f3), region = 32  ;;  %5575 = vmatprep.subr.bf16.mxu0 (!%p138_p2), %v6123_v0  ;;  %5581 = vmatprep.subr.bf16.mxu1 (!%p138_p2), %v6123_v0  ;;  %p161_p3 = scmp.lt.s32.totalorder (!%p138_p2), %s4912_s13, 1  ;;  %v213_v3 = vsel (!%p138_p2), %vm211_vm0, %v5970_v1, 0  ;;  %vm6124_vm1 = vmmov (!%p138_p2), 0   ;;  %v264_v4 = vsel (!%p138_p2), %vm211_vm0, %v5971_v2, 0  ;;  %vm207_vm2 = vcmask (!%p138_p2), 97280  }
   0x7   : > { %5583 = vmatprep.mubr.msk.bf16.mxu1 (!%p138_p2), %vm6124_vm1, %v6123_v0  ;;  %5577 = vmatprep.mubr.msk.bf16.mxu0 (!%p138_p2), %vm6124_vm1, %v6123_v0  ;;  %v5975_v5 = vld [vmem:[%s6904_s1 + $0x18] sm:$0x3f] (!%p138_p2)   ;;  %vm189_vm3 = vsmask.f32 (!%p138_p2), 7424  ;;  %v5974_v9 = vld [vmem:[%s6904_s1 + $0x10] sm:$0x3f] (!%p138_p2)  }
   0x8   : > { %5576 = vmatpush3.bf16.msra.mxu0 (!%p138_p2), %v213_v3  ;;  %5582 = vmatpush3.bf16.msra.mxu1 (!%p138_p2), %v264_v4  ;;  %v407_v7 = vsel (!%p138_p2), %vm211_vm0, %v5975_v5, 0  ;;  %v5980_v20 = vld [vmem:[%s6904_s1] sm:$0x3f] (!%p138_p2)   ;;  %v327_v24 = vsel (!%p138_p2), %vm211_vm0, %v5974_v9, 0  ;;  %v5979_v29 = vld [vmem:[%s6904_s1 + $0x8] sm:$0x3f] (!%p138_p2)  }
   0x9   : > { %5587 = vmatprep.subr.bf16.mxu0 (!%p138_p2), %v6123_v0  ;;  %5593 = vmatprep.subr.bf16.mxu1 (!%p138_p2), %v6123_v0  ;;  %v564_v30 = vsel (!%p138_p2), %vm211_vm0, %v5980_v20, 0  ;;  %v5984_v37 = vld [vmem:[%s6904_s1 + $0x18] sm:$0x3f] (!%p138_p2)   ;;  %v513_v41 = vsel (!%p138_p2), %vm211_vm0, %v5979_v29, 0  ;;  %v5983_v48 = vld [vmem:[%s6904_s1 + $0x10] sm:$0x3f] (!%p138_p2)  }
   0xa   : > { %v705_v45 = vsel (!%p138_p2), %vm211_vm0, %v5984_v37, 0  ;;  %v5989_v51 = vld [vmem:[%s6904_s1] sm:$0x3f] (!%p138_p2)   ;;  %v626_v55 = vsel (!%p138_p2), %vm211_vm0, %v5983_v48, 0  ;;  %v5988_v59 = vld [vmem:[%s6904_s1 + $0x8] sm:$0x3f] (!%p138_p2)  }
   0xb   : > { %v856_v58 = vsel (!%p138_p2), %vm211_vm0, %v5989_v51, 0  ;;  %v5993_v2 = vld [vmem:[%s6904_s1 + $0x18] sm:$0x3f] (!%p138_p2)   ;;  %v805_v5 = vsel (!%p138_p2), %vm211_vm0, %v5988_v59, 0  ;;  %vm474_vm5 = vcmask (!%p138_p2), 60416  }
   0xd   : > { %s6908_s13 = smov (!%p161_p3, %s4912_s13), 1 }
   0xe   : > { %s5959_s20 = smul.u32 204, %s6908_s13  ;;  %s5414_s21 = sshll.u32 %s6908_s13, 7 }
   0xf   : > { %s6777_s26 = scalar_lea.vmem %s6906_s3, %s5414_s21 }
  0x10   : > { %s6178_s23 = scalar_lea.vmem %s6903_s0, %s5959_s20 }
  0x11   : > { %v5972_v6 = vld [vmem:[%s6178_s23] sm:$0xff]   ;;  %v5973_v8 = vld [vmem:[%s6178_s23 + $0x8] ss:$0 sps:$4 sm:$0x11]   ;;  %v5976_v10 = vld [vmem:[%s6178_s23 + $0xc] sm:$0xff]  }
  0x12   : > { %5584 = vmatmul.mubr.msk.bf16.vlgmr.msra.gmra.mrb[0].mxu1 %vm207_vm2, %v5972_v6  ;;  %v191_v11 = vshrl.u32 %v5972_v6, 16  ;;  %v193_v12 = vshll.u32 %v5972_v6, 16  ;;  %v198_v13 = vshll.u32 %v5973_v8, 16  ;;  %v5977_v14 = vld [vmem:[%s6178_s23 + $0x14] ss:$0 sps:$4 sm:$0x11]  }
  0x13   : > { %5594 = vmatpush3.bf16.msra.mxu1 %v407_v7  ;;  %5595 = vmatprep.mubr.msk.bf16.mxu1 %vm6124_vm1, %v6123_v0  ;;  %v387_v16 = vshrl.u32 %v5976_v10, 16  ;;  %v389_v17 = vshll.u32 %v5976_v10, 16  ;;  %v394_v19 = vshll.u32 %v5977_v14, 16  ;;  %v5981_v23 = vld [vmem:[%s6178_s23 + $0xc] sm:$0xff]   ;;  %v5985_v28 = vld [vmem:[%s6178_s23 + $0x18] sm:$0xff]   ;;  %v5994_v57 = vld [vmem:[%s6178_s23 + $0x24] sm:$0xff]  }
  0x14   : > { %v195_v15 = vrot.slane %v193_v12, 1  ;;  %5605 = vmatprep.subr.bf16.mxu1 %v6123_v0  ;;  %v200_v18 = vrot.slane %v198_v13, 1  ;;  %v5982_v32 = vld [vmem:[%s6178_s23 + $0x14] ss:$0 sps:$4 sm:$0x11]   ;;  %v495_v33 = vshll.u32 %v5981_v23, 16 }
  0x15   : > { %v391_v22 = vrot.slane %v389_v17, 1  ;;  %v396_v25 = vrot.slane %v394_v19, 1  ;;  %v5978_v34 = vld [vmem:[%s6178_s23 + $0xc] sm:$0xff]   ;;  %v5986_v35 = vld [vmem:[%s6178_s23 + $0x20] ss:$0 sps:$4 sm:$0x11]  }
  0x16   : > { %v196_v21 = vor.u32 %v195_v15, %v191_v11  ;;  %v687_v36 = vshll.u32 %v5985_v28, 16  ;;  %v493_v38 = vshrl.u32 %v5981_v23, 16  ;;  %v497_v39 = vrot.slane %v495_v33, 1  ;;  %v5990_v53 = vld [vmem:[%s6178_s23 + $0x18] sm:$0xff]   ;;  %v5992_v12 = vld [vmem:[%s6904_s1 + $0x10] sm:$0x3f]  }
  0x17   : > { %v392_v27 = vor.u32 %v391_v22, %v387_v16  ;;  %v500_v40 = vshll.u32 %v5982_v32, 16  ;;  %v685_v42 = vshrl.u32 %v5985_v28, 16  ;;  %v692_v44 = vshll.u32 %v5986_v35, 16  ;;  %v5991_v54 = vld [vmem:[%s6178_s23 + $0x20] ss:$0 sps:$4 sm:$0x11]  }
  0x18   : > { %v201_v26 = vsel %vm189_vm3, %v196_v21, %v200_v18  ;;  %v689_v43 = vrot.slane %v687_v36, 1  ;;  %v498_v46 = vor.u32 %v497_v39, %v493_v38  ;;  %v787_v60 = vshll.u32 %v5990_v53, 16  ;;  %v5987_v61 = vld [vmem:[%s6178_s23 + $0x18] sm:$0xff]   ;;  %v5995_v63 = vld [vmem:[%s6178_s23 + $0x2c] ss:$0 sps:$4 sm:$0x11]  }
  0x19   : > { %5578 = vmatmul.mubr.msk.bf16.vlgmr.msra.gmra.mrb[0].mxu0 %vm207_vm2, %v201_v26  ;;  %v397_v31 = vsel %vm189_vm3, %v392_v27, %v396_v25  ;;  %v502_v47 = vrot.slane %v500_v40, 1  ;;  %v694_v50 = vrot.slane %v692_v44, 1  ;;  %v792_v62 = vshll.u32 %v5991_v54, 16  ;;  %v5998_v15 = vld [vmem:[%s6904_s1] sm:$0x3f]   ;;  %v6003_v20 = vld [vmem:[%s6178_s23 + $0x30] sm:$0xff]  }
  0x1a   : > { %5588 = vmatpush3.bf16.msra.mxu0 %v327_v24  ;;  %5589 = vmatprep.mubr.msk.bf16.mxu0 %vm6124_vm1, %v6123_v0  ;;  %v690_v49 = vor.u32 %v689_v43, %v685_v42  ;;  %v979_v1 = vshll.u32 %v5994_v57, 16  ;;  %v785_v3 = vshrl.u32 %v5990_v53, 16  ;;  %v789_v4 = vrot.slane %v787_v60, 1  ;;  %v5999_v17 = vld [vmem:[%s6178_s23 + $0x24] sm:$0xff]   ;;  %v6002_v28 = vld [vmem:[%s6904_s1 + $0x18] sm:$0x3f]  }
  0x1b   : > { %5596 = vmatmul.mubr.msk.bf16.vlgmr.msra.gmra.mrb[4].mxu1 %vm207_vm2, %v397_v31  ;;  %5599 = vmatprep.subr.bf16.mxu0 %v6123_v0  ;;  %v503_v52 = vsel %vm189_vm3, %v498_v46, %v502_v47  ;;  %v977_v6 = vshrl.u32 %v5994_v57, 16  ;;  %v984_v8 = vshll.u32 %v5995_v63, 16  ;;  %v794_v9 = vrot.slane %v792_v62, 1  ;;  %v5997_v21 = vld [vmem:[%s6904_s1 + $0x8] sm:$0x3f]   ;;  %v6012_v48 = vld [vmem:[%s6178_s23 + $0x3c] sm:$0xff]  }
  0x1c   : > { %5606 = vmatpush3.bf16.msra.mxu1 %v564_v30  ;;  %5607 = vmatprep.mubr.msk.bf16.mxu1 %vm6124_vm1, %v6123_v0  ;;  %v695_v56 = vsel %vm189_vm3, %v690_v49, %v694_v50  ;;  %v981_v7 = vrot.slane %v979_v1, 1  ;;  %v997_v10 = vsel %vm211_vm0, %v5993_v2, 0  ;;  %v790_v11 = vor.u32 %v789_v4, %v785_v3  ;;  %v6004_v25 = vld [vmem:[%s6178_s23 + $0x38] ss:$0 sps:$4 sm:$0x11]   ;;  %v5996_v26 = vld [vmem:[%s6178_s23 + $0x24] sm:$0xff]  }
  0x1d   : > { %5617 = vmatprep.subr.bf16.mxu1 %v6123_v0  ;;  %v986_v14 = vrot.slane %v984_v8, 1  ;;  %v918_v18 = vsel %vm211_vm0, %v5992_v12, 0  ;;  %v1148_v22 = vsel %vm211_vm0, %v5998_v15, 0  ;;  %v1079_v24 = vshll.u32 %v5999_v17, 16  ;;  %v6001_v36 = vld [vmem:[%s6904_s1 + $0x10] sm:$0x3f]  }
  0x1e   : > { %v982_v13 = vor.u32 %v981_v7, %v977_v6  ;;  %v795_v16 = vsel %vm189_vm3, %v790_v11, %v794_v9  ;;  %v1271_v27 = vshll.u32 %v6003_v20, 16  ;;  %v1077_v29 = vshrl.u32 %v5999_v17, 16  ;;  %v6007_v42 = vld [vmem:[%s6904_s1] sm:$0x3f]   ;;  %v6006_v49 = vld [vmem:[%s6904_s1 + $0x8] sm:$0x3f]  }
  0x1f   : > { %v1081_v30 = vrot.slane %v1079_v24, 1  ;;  %v1097_v32 = vsel %vm211_vm0, %v5997_v21, 0  ;;  %v1269_v33 = vshrl.u32 %v6003_v20, 16  ;;  %v1276_v35 = vshll.u32 %v6004_v25, 16  ;;  %v6005_v54 = vld [vmem:[%s6178_s23 + $0x30] sm:$0xff]   ;;  %v6017_v8 = vld [vmem:[%s6178_s23 + $0x3c] sm:$0xff]  }
  0x20   : > { %v987_v19 = vsel %vm189_vm3, %v982_v13, %v986_v14  ;;  %v1289_v37 = vsel %vm211_vm0, %v6002_v28, 0  ;;  %v1210_v44 = vsel %vm211_vm0, %v6001_v36, 0  ;;  %v6009_v47 = vld [vmem:[%s6178_s23 + $0x38] ss:$0 sps:$4 sm:$0x11]   ;;  %v1440_v50 = vsel %vm211_vm0, %v6007_v42, 0 }
  0x21   : > { %5590 = vmatmul.mubr.msk.bf16.vlgmr.msra.gmra.mrb[4].mxu0 %vm207_vm2, %v5978_v34  ;;  %v1273_v34 = vrot.slane %v1271_v27, 1  ;;  %v1082_v38 = vor.u32 %v1081_v30, %v1077_v29  ;;  %v1389_v59 = vsel %vm211_vm0, %v6006_v49, 0  ;;  %v1561_v60 = vshrl.u32 %v6012_v48, 16  ;;  %v6010_v3 = vld [vmem:[%s6904_s1 + $0x10] sm:$0x3f]  }
  0x22   : > { %5600 = vmatpush3.bf16.msra.mxu0 %v513_v41  ;;  %5601 = vmatprep.mubr.msk.bf16.mxu0 %vm6124_vm1, %v6123_v0  ;;  %v1278_v41 = vrot.slane %v1276_v35, 1  ;;  %v6016_v6 = vld [vmem:[%s6904_s1] sm:$0x3f]   ;;  %v1502_v9 = vsel %vm211_vm0, %v6010_v3, 0  ;;  %v1663_v14 = vshll.u32 %v6017_v8, 16 }
  0x23   : > { %5608 = vmatmul.mubr.msk.bf16.vlgmr.msra.gmra.mrb[8].mxu1 %vm207_vm2, %v5981_v23  ;;  %5611 = vmatprep.subr.bf16.mxu0 %v6123_v0  ;;  %v6000_v23 = vld [vmem:[%s6178_s23 + $0x2c] ss:$0 sps:$4 sm:$0x11]   ;;  %v1274_v40 = vor.u32 %v1273_v34, %v1269_v33  ;;  %v6018_v12 = vld [vmem:[%s6178_s23 + $0x44] ss:$0 sps:$4 sm:$0x11]  }
  0x24   : > { %5618 = vmatpush3.bf16.msra.mxu1 %v705_v45  ;;  %5619 = vmatprep.mubr.msk.bf16.mxu1 %vm6124_vm1, %v6123_v0  ;;  %v1084_v31 = vshll.u32 %v6000_v23, 16  ;;  %v6008_v45 = vld [vmem:[%s6178_s23 + $0x30] sm:$0xff]   ;;  %v1732_v13 = vsel %vm211_vm0, %v6016_v6, 0  ;;  %v6015_v15 = vld [vmem:[%s6904_s1 + $0x8] sm:$0x3f]   ;;  %v1665_v21 = vrot.slane %v1663_v14, 1 }
  0x25   : > { %5629 = vmatprep.subr.bf16.mxu1 %v6123_v0  ;;  %v1279_v46 = vsel %vm189_vm3, %v1274_v40, %v1278_v41  ;;  %v1371_v51 = vshll.u32 %v6008_v45, 16  ;;  %v6020_v20 = vld [vmem:[%s6904_s1 + $0x18] sm:$0x3f]   ;;  %v1681_v23 = vsel %vm211_vm0, %v6015_v15, 0  ;;  %v6019_v30 = vld [vmem:[%s6904_s1 + $0x10] sm:$0x3f]  }
  0x26   : > { %v1086_v39 = vrot.slane %v1084_v31, 1  ;;  %v1873_v27 = vsel %vm211_vm0, %v6020_v20, 0  ;;  %v6025_v31 = vld [vmem:[%s6904_s1] sm:$0x3f]   ;;  %v6026_v34 = vld [vmem:[%s6178_s23 + $0x48] sm:$0xff]   ;;  %v1794_v36 = vsel %vm211_vm0, %v6019_v30, 0 }
  0x27   : > { %v1373_v57 = vrot.slane %v1371_v51, 1  ;;  %v6024_v40 = vld [vmem:[%s6904_s1 + $0x8] sm:$0x3f]   ;;  %v6027_v41 = vld [vmem:[%s6178_s23 + $0x50] ss:$0 sps:$4 sm:$0x11]  }
  0x28   : > { %v1087_v43 = vsel %vm189_vm3, %v1082_v38, %v1086_v39  ;;  %v2024_v38 = vsel %vm211_vm0, %v6025_v31, 0  ;;  %v6030_v39 = vld [vmem:[%s6178_s23 + $0x54] sm:$0xff]   ;;  %v1955_v42 = vshll.u32 %v6026_v34, 16  ;;  %v1960_v49 = vshll.u32 %v6027_v41, 16  ;;  %v6039_v3 = vld [vmem:[%s6178_s23 + $0x60] sm:$0xff]  }
  0x29   : > { %5602 = vmatmul.mubr.msk.bf16.vlgmr.msra.gmra.mrb[8].mxu0 %vm207_vm2, %v503_v52  ;;  %v6013_v52 = vld [vmem:[%s6178_s23 + $0x44] ss:$0 sps:$4 sm:$0x11]   ;;  %v6040_v6 = vld [vmem:[%s6178_s23 + $0x68] ss:$0 sps:$4 sm:$0x11]  }
  0x2a   : > { %5612 = vmatpush3.bf16.msra.mxu0 %v626_v55  ;;  %5613 = vmatprep.mubr.msk.bf16.mxu0 %vm6124_vm1, %v6123_v0  ;;  %v6011_v55 = vld [vmem:[%s6904_s1 + $0x18] sm:$0x3f]   ;;  %v1568_v62 = vshll.u32 %v6013_v52, 16  ;;  %v2145_v52 = vshrl.u32 %v6030_v39, 16  ;;  %v2437_v15 = vshrl.u32 %v6039_v3, 16 }
  0x2b   : > { %5620 = vmatmul.mubr.msk.bf16.vlgmr.msra.gmra.mrb[12].mxu1 %vm207_vm2, %v695_v56  ;;  %5623 = vmatprep.subr.bf16.mxu0 %v6123_v0  ;;  %v1369_v56 = vshrl.u32 %v6008_v45, 16  ;;  %v1581_v63 = vsel %vm211_vm0, %v6011_v55, 0  ;;  %v6045_v31 = vld [vmem:[%s6178_s23 + $0x68] ss:$0 sps:$4 sm:$0x11]  }
  0x2c   : > { %5630 = vmatpush3.bf16.msra.mxu1 %v856_v58  ;;  %5631 = vmatprep.mubr.msk.bf16.mxu1 %vm6124_vm1, %v6123_v0  ;;  %v1376_v58 = vshll.u32 %v6009_v47, 16  ;;  %v1953_v47 = vshrl.u32 %v6026_v34, 16 }
  0x2d   : > { %5641 = vmatprep.subr.bf16.mxu1 %v6123_v0  ;;  %v1374_v1 = vor.u32 %v1373_v57, %v1369_v56  ;;  %v1962_v56 = vrot.slane %v1960_v49, 1  ;;  %v6028_v57 = vld [vmem:[%s6904_s1 + $0x10] sm:$0x3f]  }
  0x2e   : > { %v1378_v2 = vrot.slane %v1376_v58, 1 }
  0x30   : > { %v1379_v7 = vsel %vm189_vm3, %v1374_v1, %v1378_v2  ;;  %v6036_v2 = vld [vmem:[%s6178_s23 + $0x5c] ss:$0 sps:$4 sm:$0x11]  }
  0x31   : > { %5614 = vmatmul.mubr.msk.bf16.vlgmr.msra.gmra.mrb[12].mxu0 %vm207_vm2, %v5987_v61 }
  0x32   : > { %5624 = vmatpush3.bf16.msra.mxu0 %v805_v5  ;;  %5625 = vmatprep.mubr.msk.bf16.mxu0 %vm6124_vm1, %v6123_v0  ;;  %v1570_v5 = vrot.slane %v1568_v62, 1  ;;  %v6035_v62 = vld [vmem:[%s6178_s23 + $0x54] sm:$0xff]  }
  0x33   : > { %5632 = vmatmul.mubr.msk.bf16.vlgmr.msra.gmra.mrb[16].mxu1 %vm207_vm2, %v5990_v53  ;;  %5635 = vmatprep.subr.bf16.mxu0 %v6123_v0  ;;  %v1563_v53 = vshll.u32 %v6012_v48, 16  ;;  %v1957_v48 = vrot.slane %v1955_v42, 1 }
  0x34   : > { %5642 = vmatpush3.bf16.msra.mxu1 %v997_v10  ;;  %5643 = vmatprep.mubr.msk.bf16.mxu1 %vm6124_vm1, %v6123_v0  ;;  %v6021_v10 = vld [vmem:[%s6178_s23 + $0x48] sm:$0xff]  }
  0x35   : > { %5653 = vmatprep.subr.bf16.mxu1 %v6123_v0  ;;  %v1565_v61 = vrot.slane %v1563_v53, 1  ;;  %v1853_v24 = vshrl.u32 %v6021_v10, 16  ;;  %v1958_v55 = vor.u32 %v1957_v48, %v1953_v47  ;;  %v6046_v48 = vld [vmem:[%s6904_s1 + $0x10] sm:$0x3f]  }
  0x37   : > { %v1566_v4 = vor.u32 %v1565_v61, %v1561_v60  ;;  %v6034_v60 = vld [vmem:[%s6904_s1] sm:$0x3f]   ;;  %v1963_v61 = vsel %vm189_vm3, %v1958_v55, %v1962_v56  ;;  %v6057_v56 = vld [vmem:[%s6178_s23 + $0x78] sm:$0xff]  }
  0x39   : > { %5626 = vmatmul.mubr.msk.bf16.vlgmr.msra.gmra.mrb[16].mxu0 %vm207_vm2, %v795_v16  ;;  %v1571_v11 = vsel %vm189_vm3, %v1566_v4, %v1570_v5  ;;  %v6022_v16 = vld [vmem:[%s6178_s23 + $0x50] ss:$0 sps:$4 sm:$0x11]   ;;  %v2316_v4 = vsel %vm211_vm0, %v6034_v60, 0  ;;  %v2247_v5 = vshll.u32 %v6035_v62, 16 }
  0x3a   : > { %5636 = vmatpush3.bf16.msra.mxu0 %v918_v18  ;;  %5637 = vmatprep.mubr.msk.bf16.mxu0 %vm6124_vm1, %v6123_v0  ;;  %v6014_v18 = vld [vmem:[%s6178_s23 + $0x3c] sm:$0xff]  }
  0x3b   : > { %5644 = vmatmul.mubr.msk.bf16.vlgmr.msra.gmra.mrb[20].mxu1 %vm207_vm2, %v987_v19  ;;  %5647 = vmatprep.subr.bf16.mxu0 %v6123_v0  ;;  %v1661_v19 = vshrl.u32 %v6017_v8, 16 }
  0x3c   : > { %5654 = vmatpush3.bf16.msra.mxu1 %v1148_v22  ;;  %5655 = vmatprep.mubr.msk.bf16.mxu1 %vm6124_vm1, %v6123_v0  ;;  %v1668_v22 = vshll.u32 %v6018_v12, 16  ;;  %v2249_v12 = vrot.slane %v2247_v5, 1 }
  0x3d   : > { %5665 = vmatprep.subr.bf16.mxu1 %v6123_v0  ;;  %v1666_v28 = vor.u32 %v1665_v21, %v1661_v19  ;;  %v6037_v21 = vld [vmem:[%s6904_s1 + $0x10] sm:$0x3f]  }
  0x3e   : > { %v1670_v29 = vrot.slane %v1668_v22, 1 }
  0x40   : > { %v1671_v35 = vsel %vm189_vm3, %v1666_v28, %v1670_v29  ;;  %v6048_v29 = vld [vmem:[%s6178_s23 + $0x6c] sm:$0xff]  }
  0x41   : > { %5638 = vmatmul.mubr.msk.bf16.vlgmr.msra.gmra.mrb[20].mxu0 %vm207_vm2, %v5996_v26  ;;  %v1860_v26 = vshll.u32 %v6022_v16, 16  ;;  %v2729_v42 = vshrl.u32 %v6048_v29, 16 }
  0x42   : > { %5648 = vmatpush3.bf16.msra.mxu0 %v1097_v32  ;;  %5649 = vmatprep.mubr.msk.bf16.mxu0 %vm6124_vm1, %v6123_v0 }
  0x43   : > { %5656 = vmatmul.mubr.msk.bf16.vlgmr.msra.gmra.mrb[24].mxu1 %vm207_vm2, %v5999_v17  ;;  %5659 = vmatprep.subr.bf16.mxu0 %v6123_v0  ;;  %v1855_v17 = vshll.u32 %v6021_v10, 16  ;;  %v1862_v33 = vrot.slane %v1860_v26, 1  ;;  %v6038_v10 = vld [vmem:[%s6904_s1 + $0x18] sm:$0x3f]  }
  0x44   : > { %5666 = vmatpush3.bf16.msra.mxu1 %v1289_v37  ;;  %5667 = vmatprep.mubr.msk.bf16.mxu1 %vm6124_vm1, %v6123_v0 }
  0x45   : > { %5677 = vmatprep.subr.bf16.mxu1 %v6123_v0  ;;  %v1857_v25 = vrot.slane %v1855_v17, 1  ;;  %v2444_v17 = vshll.u32 %v6040_v6, 16  ;;  %v3021_v6 = vshrl.u32 %v6057_v56, 16 }
  0x47   : > { %v1858_v32 = vor.u32 %v1857_v25, %v1853_v24  ;;  %v6043_v24 = vld [vmem:[%s6904_s1] sm:$0x3f]  }
  0x48   : > { %v6044_v25 = vld [vmem:[%s6178_s23 + $0x60] sm:$0xff]   ;;  %v2608_v30 = vsel %vm211_vm0, %v6043_v24, 0  ;;  %v6059_v24 = vld [vmem:[%s6178_s23 + $0x78] sm:$0xff]  }
  0x49   : > { %5650 = vmatmul.mubr.msk.bf16.vlgmr.msra.gmra.mrb[24].mxu0 %vm207_vm2, %v1087_v43  ;;  %v1863_v37 = vsel %vm189_vm3, %v1858_v32, %v1862_v33  ;;  %v6029_v43 = vld [vmem:[%s6904_s1 + $0x18] sm:$0x3f]   ;;  %v2539_v32 = vshll.u32 %v6044_v25, 16  ;;  %v6042_v33 = vld [vmem:[%s6904_s1 + $0x8] sm:$0x3f]  }
  0x4a   : > { %5660 = vmatpush3.bf16.msra.mxu0 %v1210_v44  ;;  %5661 = vmatprep.mubr.msk.bf16.mxu0 %vm6124_vm1, %v6123_v0  ;;  %v6031_v44 = vld [vmem:[%s6178_s23 + $0x5c] ss:$0 sps:$4 sm:$0x11]   ;;  %v2165_v51 = vsel %vm211_vm0, %v6029_v43, 0  ;;  %v2557_v41 = vsel %vm211_vm0, %v6042_v33, 0 }
  0x4b   : > { %5668 = vmatmul.mubr.msk.bf16.vlgmr.msra.gmra.mrb[28].mxu1 %vm207_vm2, %v1279_v46  ;;  %5671 = vmatprep.subr.bf16.mxu0 %v6123_v0  ;;  %v6023_v46 = vld [vmem:[%s6178_s23 + $0x48] sm:$0xff]  }
  0x4c   : > { %5678 = vmatpush3.bf16.msra.mxu1 %v1440_v50  ;;  %5679 = vmatprep.mubr.msk.bf16.mxu1 %vm6124_vm1, %v6123_v0  ;;  %v1973_v50 = vsel %vm211_vm0, %v6024_v40, 0  ;;  %v2544_v40 = vshll.u32 %v6045_v31, 16 }
  0x4d   : > { %5689 = vmatprep.subr.bf16.mxu1 %v6123_v0 }
  0x4e   : > { %v2546_v47 = vrot.slane %v2544_v40, 1 }
  0x51   : > { %5662 = vmatmul.mubr.msk.bf16.vlgmr.msra.gmra.mrb[28].mxu0 %vm207_vm2, %v6005_v54  ;;  %v2152_v54 = vshll.u32 %v6031_v44, 16 }
  0x52   : > { %5672 = vmatpush3.bf16.msra.mxu0 %v1389_v59  ;;  %5673 = vmatprep.mubr.msk.bf16.mxu0 %vm6124_vm1, %v6123_v0 }
  0x53   : > { %5680 = vmatmul.mubr.msk.bf16.vlgmr.msra.gmra.mrb[32].mxu1 %vm207_vm2, %v6008_v45  ;;  %5683 = vmatprep.subr.bf16.mxu0 %v6123_v0  ;;  %v2147_v45 = vshll.u32 %v6030_v39, 16  ;;  %v2154_v59 = vrot.slane %v2152_v54, 1  ;;  %v2541_v39 = vrot.slane %v2539_v32, 1  ;;  %v2670_v54 = vsel %vm211_vm0, %v6046_v48, 0 }
  0x54   : > { %5690 = vmatpush3.bf16.msra.mxu1 %v1581_v63  ;;  %5691 = vmatprep.mubr.msk.bf16.mxu1 %vm6124_vm1, %v6123_v0  ;;  %v2086_v63 = vsel %vm211_vm0, %v6028_v57, 0 }
  0x55   : > { %5701 = vmatprep.subr.bf16.mxu1 %v6123_v0  ;;  %v2149_v53 = vrot.slane %v2147_v45, 1 }
  0x57   : > { %v2150_v58 = vor.u32 %v2149_v53, %v2145_v52  ;;  %v6053_v53 = vld [vmem:[%s6178_s23 + $0x6c] sm:$0xff]  }
  0x58   : > { %v2831_v60 = vshll.u32 %v6053_v53, 16 }
  0x59   : > { %5674 = vmatmul.mubr.msk.bf16.vlgmr.msra.gmra.mrb[32].mxu0 %vm207_vm2, %v1379_v7  ;;  %v2155_v1 = vsel %vm189_vm3, %v2150_v58, %v2154_v59  ;;  %v6033_v7 = vld [vmem:[%s6904_s1 + $0x8] sm:$0x3f]   ;;  %v6054_v59 = vld [vmem:[%s6178_s23 + $0x74] ss:$0 sps:$4 sm:$0x11]  }
  0x5a   : > { %5684 = vmatpush3.bf16.msra.mxu0 %v1502_v9  ;;  %5685 = vmatprep.mubr.msk.bf16.mxu0 %vm6124_vm1, %v6123_v0  ;;  %v6032_v9 = vld [vmem:[%s6178_s23 + $0x54] sm:$0xff]   ;;  %v2265_v14 = vsel %vm211_vm0, %v6033_v7, 0  ;;  %v6051_v58 = vld [vmem:[%s6904_s1 + $0x8] sm:$0x3f]  }
  0x5b   : > { %5692 = vmatmul.mubr.msk.bf16.vlgmr.msra.gmra.mrb[36].mxu1 %vm207_vm2, %v1571_v11  ;;  %5695 = vmatprep.subr.bf16.mxu0 %v6123_v0  ;;  %v2245_v11 = vshrl.u32 %v6035_v62, 16  ;;  %v2849_v5 = vsel %vm211_vm0, %v6051_v58, 0 }
  0x5c   : > { %5702 = vmatpush3.bf16.msra.mxu1 %v1732_v13  ;;  %5703 = vmatprep.mubr.msk.bf16.mxu1 %vm6124_vm1, %v6123_v0  ;;  %v2252_v13 = vshll.u32 %v6036_v2, 16  ;;  %v2829_v2 = vshrl.u32 %v6053_v53, 16 }
  0x5d   : > { %5713 = vmatprep.subr.bf16.mxu1 %v6123_v0  ;;  %v2250_v19 = vor.u32 %v2249_v12, %v2245_v11  ;;  %v6055_v12 = vld [vmem:[%s6904_s1 + $0x10] sm:$0x3f]  }
  0x5e   : > { %v2254_v20 = vrot.slane %v2252_v13, 1 }
  0x60   : > { %v2255_v26 = vsel %vm189_vm3, %v2250_v19, %v2254_v20  ;;  %v6066_v20 = vld [vmem:[%s6178_s23 + $0x84] sm:$0xff]  }
  0x61   : > { %5686 = vmatmul.mubr.msk.bf16.vlgmr.msra.gmra.mrb[36].mxu0 %vm207_vm2, %v6014_v18  ;;  %v2457_v18 = vsel %vm211_vm0, %v6038_v10, 0  ;;  %v3313_v33 = vshrl.u32 %v6066_v20, 16 }
  0x62   : > { %5696 = vmatpush3.bf16.msra.mxu0 %v1681_v23  ;;  %5697 = vmatprep.mubr.msk.bf16.mxu0 %vm6124_vm1, %v6123_v0  ;;  %v2446_v23 = vrot.slane %v2444_v17, 1  ;;  %v6062_v17 = vld [vmem:[%s6178_s23 + $0x78] sm:$0xff]  }
  0x63   : > { %5704 = vmatmul.mubr.msk.bf16.vlgmr.msra.gmra.mrb[40].mxu1 %vm207_vm2, %v6017_v8  ;;  %5707 = vmatprep.subr.bf16.mxu0 %v6123_v0  ;;  %v2439_v8 = vshll.u32 %v6039_v3, 16  ;;  %v2833_v3 = vrot.slane %v2831_v60, 1 }
  0x64   : > { %5714 = vmatpush3.bf16.msra.mxu1 %v1873_v27  ;;  %5715 = vmatprep.mubr.msk.bf16.mxu1 %vm6124_vm1, %v6123_v0  ;;  %v2378_v27 = vsel %vm211_vm0, %v6037_v21, 0 }
  0x65   : > { %5725 = vmatprep.subr.bf16.mxu1 %v6123_v0  ;;  %v2441_v16 = vrot.slane %v2439_v8, 1  ;;  %v2834_v10 = vor.u32 %v2833_v3, %v2829_v2  ;;  %v6073_v3 = vld [vmem:[%s6904_s1 + $0x10] sm:$0x3f]  }
  0x67   : > { %v2442_v22 = vor.u32 %v2441_v16, %v2437_v15  ;;  %v6061_v15 = vld [vmem:[%s6904_s1] sm:$0x3f]  }
  0x68   : > { %v3192_v21 = vsel %vm211_vm0, %v6061_v15, 0  ;;  %v6078_v15 = vld [vmem:[%s6904_s1 + $0x8] sm:$0x3f]  }
  0x69   : > { %5698 = vmatmul.mubr.msk.bf16.vlgmr.msra.gmra.mrb[40].mxu0 %vm207_vm2, %v1671_v35  ;;  %v2447_v28 = vsel %vm189_vm3, %v2442_v22, %v2446_v23  ;;  %v2731_v35 = vshll.u32 %v6048_v29, 16  ;;  %v6063_v22 = vld [vmem:[%s6178_s23 + $0x80] ss:$0 sps:$4 sm:$0x11]   ;;  %v3123_v23 = vshll.u32 %v6062_v17, 16  ;;  %v3121_v29 = vshrl.u32 %v6062_v17, 16 }
  0x6a   : > { %5708 = vmatpush3.bf16.msra.mxu0 %v1794_v36  ;;  %5709 = vmatprep.mubr.msk.bf16.mxu0 %vm6124_vm1, %v6123_v0  ;;  %v6041_v36 = vld [vmem:[%s6178_s23 + $0x60] sm:$0xff]   ;;  %v3128_v31 = vshll.u32 %v6063_v22, 16 }
  0x6b   : > { %5716 = vmatmul.mubr.msk.bf16.vlgmr.msra.gmra.mrb[44].mxu1 %vm207_vm2, %v1863_v37  ;;  %5719 = vmatprep.subr.bf16.mxu0 %v6123_v0  ;;  %v2537_v37 = vshrl.u32 %v6044_v25, 16  ;;  %v2733_v43 = vrot.slane %v2731_v35, 1 }
  0x6c   : > { %5726 = vmatpush3.bf16.msra.mxu1 %v2024_v38  ;;  %5727 = vmatprep.mubr.msk.bf16.mxu1 %vm6124_vm1, %v6123_v0  ;;  %v6047_v38 = vld [vmem:[%s6904_s1 + $0x18] sm:$0x3f]  }
  0x6d   : > { %5737 = vmatprep.subr.bf16.mxu1 %v6123_v0  ;;  %v2749_v45 = vsel %vm211_vm0, %v6047_v38, 0  ;;  %v2734_v49 = vor.u32 %v2733_v43, %v2729_v42  ;;  %v3130_v38 = vrot.slane %v3128_v31, 1  ;;  %v6070_v42 = vld [vmem:[%s6904_s1] sm:$0x3f]  }
  0x6e   : > { %v3484_v48 = vsel %vm211_vm0, %v6070_v42, 0  ;;  %v6087_v42 = vld [vmem:[%s6904_s1 + $0x8] sm:$0x3f]  }
  0x71   : > { %5710 = vmatmul.mubr.msk.bf16.vlgmr.msra.gmra.mrb[44].mxu0 %vm207_vm2, %v6023_v46  ;;  %v2542_v46 = vor.u32 %v2541_v39, %v2537_v37  ;;  %v6064_v39 = vld [vmem:[%s6904_s1 + $0x10] sm:$0x3f]  }
  0x72   : > { %5720 = vmatpush3.bf16.msra.mxu0 %v1973_v50  ;;  %5721 = vmatprep.mubr.msk.bf16.mxu0 %vm6124_vm1, %v6123_v0 }
  0x73   : > { %5728 = vmatmul.mubr.msk.bf16.vlgmr.msra.gmra.mrb[48].mxu1 %vm207_vm2, %v6026_v34  ;;  %5731 = vmatprep.subr.bf16.mxu0 %v6123_v0  ;;  %v6049_v34 = vld [vmem:[%s6178_s23 + $0x74] ss:$0 sps:$4 sm:$0x11]   ;;  %v2547_v52 = vsel %vm189_vm3, %v2542_v46, %v2546_v47 }
  0x74   : > { %5738 = vmatpush3.bf16.msra.mxu1 %v2165_v51  ;;  %5739 = vmatprep.mubr.msk.bf16.mxu1 %vm6124_vm1, %v6123_v0  ;;  %v2736_v44 = vshll.u32 %v6049_v34, 16  ;;  %v6052_v51 = vld [vmem:[%s6904_s1] sm:$0x3f]   ;;  %v6075_v47 = vld [vmem:[%s6178_s23 + $0x90] sm:$0xff]  }
  0x75   : > { %5749 = vmatprep.subr.bf16.mxu1 %v6123_v0  ;;  %v2900_v57 = vsel %vm211_vm0, %v6052_v51, 0  ;;  %v6069_v51 = vld [vmem:[%s6904_s1 + $0x8] sm:$0x3f]   ;;  %v3605_v60 = vshrl.u32 %v6075_v47, 16 }
  0x76   : > { %v2738_v50 = vrot.slane %v2736_v44, 1  ;;  %v6071_v44 = vld [vmem:[%s6178_s23 + $0x84] sm:$0xff]  }
  0x78   : > { %v2739_v55 = vsel %vm189_vm3, %v2734_v49, %v2738_v50  ;;  %v6072_v49 = vld [vmem:[%s6178_s23 + $0x8c] ss:$0 sps:$4 sm:$0x11]   ;;  %v3415_v50 = vshll.u32 %v6071_v44, 16 }
  0x79   : > { %5722 = vmatmul.mubr.msk.bf16.vlgmr.msra.gmra.mrb[48].mxu0 %vm207_vm2, %v1963_v61  ;;  %v6050_v61 = vld [vmem:[%s6178_s23 + $0x6c] sm:$0xff]   ;;  %v3420_v58 = vshll.u32 %v6072_v49, 16 }
  0x7a   : > { %5732 = vmatpush3.bf16.msra.mxu0 %v2086_v63  ;;  %5733 = vmatprep.mubr.msk.bf16.mxu0 %vm6124_vm1, %v6123_v0  ;;  %v3023_v63 = vshll.u32 %v6057_v56, 16  ;;  %v3413_v56 = vshrl.u32 %v6071_v44, 16 }
  0x7b   : > { %5740 = vmatmul.mubr.msk.bf16.vlgmr.msra.gmra.mrb[52].mxu1 %vm207_vm2, %v2155_v1  ;;  %5743 = vmatprep.subr.bf16.mxu0 %v6123_v0  ;;  %v6056_v1 = vld [vmem:[%s6904_s1 + $0x18] sm:$0x3f]   ;;  %v3422_v2 = vrot.slane %v3420_v58, 1 }
  0x7c   : > { %5750 = vmatpush3.bf16.msra.mxu1 %v2316_v4  ;;  %5751 = vmatprep.mubr.msk.bf16.mxu1 %vm6124_vm1, %v6123_v0  ;;  %v2836_v4 = vshll.u32 %v6054_v59, 16  ;;  %v3025_v7 = vrot.slane %v3023_v63, 1  ;;  %v3433_v59 = vsel %vm211_vm0, %v6069_v51, 0 }
  0x7d   : > { %5761 = vmatprep.subr.bf16.mxu1 %v6123_v0 }
  0x7e   : > { %v2838_v11 = vrot.slane %v2836_v4, 1  ;;  %v3026_v13 = vor.u32 %v3025_v7, %v3021_v6  ;;  %v6079_v6 = vld [vmem:[%s6904_s1] sm:$0x3f]  }
  0x80   : > { %v2839_v16 = vsel %vm189_vm3, %v2834_v10, %v2838_v11  ;;  %v6084_v11 = vld [vmem:[%s6178_s23 + $0x9c] sm:$0xff]  }
  0x81   : > { %5734 = vmatmul.mubr.msk.bf16.vlgmr.msra.gmra.mrb[52].mxu0 %vm207_vm2, %v6032_v9  ;;  %v3041_v9 = vsel %vm211_vm0, %v6056_v1, 0 }
  0x82   : > { %5744 = vmatpush3.bf16.msra.mxu0 %v2265_v14  ;;  %5745 = vmatprep.mubr.msk.bf16.mxu0 %vm6124_vm1, %v6123_v0 }
  0x83   : > { %5752 = vmatmul.mubr.msk.bf16.vlgmr.msra.gmra.mrb[56].mxu1 %vm207_vm2, %v6035_v62  ;;  %5755 = vmatprep.subr.bf16.mxu0 %v6123_v0  ;;  %v6058_v62 = vld [vmem:[%s6178_s23 + $0x80] ss:$0 sps:$4 sm:$0x11]  }
  0x84   : > { %5762 = vmatpush3.bf16.msra.mxu1 %v2457_v18  ;;  %5763 = vmatprep.mubr.msk.bf16.mxu1 %vm6124_vm1, %v6123_v0  ;;  %v3028_v8 = vshll.u32 %v6058_v62, 16  ;;  %v2962_v18 = vsel %vm211_vm0, %v6055_v12, 0  ;;  %v3776_v12 = vsel %vm211_vm0, %v6079_v6, 0  ;;  %v6102_v6 = vld [vmem:[%s6178_s23 + $0xb4] sm:$0xff]  }
  0x85   : > { %5773 = vmatprep.subr.bf16.mxu1 %v6123_v0 }
  0x86   : > { %v3030_v14 = vrot.slane %v3028_v8, 1  ;;  %v6080_v8 = vld [vmem:[%s6178_s23 + $0x90] sm:$0xff]  }
  0x88   : > { %v3031_v19 = vsel %vm189_vm3, %v3026_v13, %v3030_v14  ;;  %v6081_v13 = vld [vmem:[%s6178_s23 + $0x98] ss:$0 sps:$4 sm:$0x11]   ;;  %v3707_v14 = vshll.u32 %v6080_v8, 16 }
  0x89   : > { %5746 = vmatmul.mubr.msk.bf16.vlgmr.msra.gmra.mrb[56].mxu0 %vm207_vm2, %v2255_v26  ;;  %v6067_v26 = vld [vmem:[%s6178_s23 + $0x8c] ss:$0 sps:$4 sm:$0x11]   ;;  %v3712_v22 = vshll.u32 %v6081_v13, 16  ;;  %v4483_v13 = vshll.u32 %v6102_v6, 16 }
  0x8a   : > { %5756 = vmatpush3.bf16.msra.mxu0 %v2378_v27  ;;  %5757 = vmatprep.mubr.msk.bf16.mxu0 %vm6124_vm1, %v6123_v0  ;;  %v3315_v27 = vshll.u32 %v6066_v20, 16  ;;  %v3320_v35 = vshll.u32 %v6067_v26, 16  ;;  %v3705_v20 = vshrl.u32 %v6080_v8, 16 }
  0x8b   : > { %5764 = vmatmul.mubr.msk.bf16.vlgmr.msra.gmra.mrb[60].mxu1 %vm207_vm2, %v2447_v28  ;;  %5767 = vmatprep.subr.bf16.mxu0 %v6123_v0  ;;  %v6065_v28 = vld [vmem:[%s6904_s1 + $0x18] sm:$0x3f]  }
  0x8c   : > { %5774 = vmatpush3.bf16.msra.mxu1 %v2608_v30  ;;  %5775 = vmatprep.mubr.msk.bf16.mxu1 %vm6124_vm1, %v6123_v0  ;;  %v3125_v30 = vrot.slane %v3123_v23, 1  ;;  %v3317_v34 = vrot.slane %v3315_v27, 1  ;;  %v3725_v23 = vsel %vm211_vm0, %v6078_v15, 0 }
  0x8d   : > { %5785 = vmatprep.subr.bf16.mxu1 %v6123_v0 }
  0x8e   : > { %v3126_v37 = vor.u32 %v3125_v30, %v3121_v29  ;;  %v3318_v40 = vor.u32 %v3317_v34, %v3313_v33  ;;  %v3714_v29 = vrot.slane %v3712_v22, 1  ;;  %v6082_v30 = vld [vmem:[%s6904_s1 + $0x10] sm:$0x3f]   ;;  %v6088_v33 = vld [vmem:[%s6904_s1] sm:$0x3f]  }
  0x90   : > { %v3131_v43 = vsel %vm189_vm3, %v3126_v37, %v3130_v38  ;;  %v6093_v38 = vld [vmem:[%s6178_s23 + $0xa8] sm:$0xff]  }
  0x91   : > { %5758 = vmatmul.mubr.msk.bf16.vlgmr.msra.gmra.mrb[60].mxu0 %vm207_vm2, %v6041_v36  ;;  %v3333_v36 = vsel %vm211_vm0, %v6065_v28, 0  ;;  %v4189_v51 = vshrl.u32 %v6093_v38, 16 }
  0x92   : > { %5768 = vmatpush3.bf16.msra.mxu0 %v2557_v41  ;;  %5769 = vmatprep.mubr.msk.bf16.mxu0 %vm6124_vm1, %v6123_v0  ;;  %v3322_v41 = vrot.slane %v3320_v35, 1  ;;  %v6089_v35 = vld [vmem:[%s6178_s23 + $0x9c] sm:$0xff]  }
  0x93   : > { %5776 = vmatmul.mubr.msk.bf16.vlgmr.msra.gmra.mrb[64].mxu1 %vm207_vm2, %v6044_v25  ;;  %5779 = vmatprep.subr.bf16.mxu0 %v6123_v0  ;;  %v6060_v25 = vld [vmem:[%s6904_s1 + $0x8] sm:$0x3f]  }
  0x94   : > { %5786 = vmatpush3.bf16.msra.mxu1 %v2749_v45  ;;  %5787 = vmatprep.mubr.msk.bf16.mxu1 %vm6124_vm1, %v6123_v0  ;;  %v3141_v32 = vsel %vm211_vm0, %v6060_v25, 0  ;;  %v3254_v45 = vsel %vm211_vm0, %v6064_v39, 0  ;;  %v3323_v46 = vsel %vm189_vm3, %v3318_v40, %v3322_v41  ;;  %v4068_v39 = vsel %vm211_vm0, %v6088_v33, 0  ;;  %v6090_v40 = vld [vmem:[%s6178_s23 + $0xa4] ss:$0 sps:$4 sm:$0x11]  }
  0x95   : > { %5797 = vmatprep.subr.bf16.mxu1 %v6123_v0  ;;  %v3999_v41 = vshll.u32 %v6089_v35, 16  ;;  %v4004_v49 = vshll.u32 %v6090_v40, 16 }
  0x99   : > { %5770 = vmatmul.mubr.msk.bf16.vlgmr.msra.gmra.mrb[64].mxu0 %vm207_vm2, %v2547_v52  ;;  %v6076_v52 = vld [vmem:[%s6178_s23 + $0x98] ss:$0 sps:$4 sm:$0x11]  }
  0x9a   : > { %5780 = vmatpush3.bf16.msra.mxu0 %v2670_v54  ;;  %5781 = vmatprep.mubr.msk.bf16.mxu0 %vm6124_vm1, %v6123_v0  ;;  %v6068_v54 = vld [vmem:[%s6178_s23 + $0x84] sm:$0xff]   ;;  %v3612_v62 = vshll.u32 %v6076_v52, 16 }
  0x9b   : > { %5788 = vmatmul.mubr.msk.bf16.vlgmr.msra.gmra.mrb[68].mxu1 %vm207_vm2, %v2739_v55  ;;  %5791 = vmatprep.subr.bf16.mxu0 %v6123_v0  ;;  %v6074_v55 = vld [vmem:[%s6904_s1 + $0x18] sm:$0x3f]  }
  0x9c   : > { %5798 = vmatpush3.bf16.msra.mxu1 %v2900_v57  ;;  %5799 = vmatprep.mubr.msk.bf16.mxu1 %vm6124_vm1, %v6123_v0  ;;  %v3417_v57 = vrot.slane %v3415_v50, 1  ;;  %v3625_v63 = vsel %vm211_vm0, %v6074_v55, 0  ;;  %v4017_v50 = vsel %vm211_vm0, %v6087_v42, 0  ;;  %v6744_v42 = vld [vmem:[%s6905_s2] ss:$0 sm:$0xff] }
  0x9d   : > { %5809 = vmatprep.subr.bf16.mxu1 %v6123_v0 }
  0x9e   : > { %v3418_v1 = vor.u32 %v3417_v57, %v3413_v56  ;;  %v4006_v56 = vrot.slane %v4004_v49, 1  ;;  %v6091_v57 = vld [vmem:[%s6904_s1 + $0x10] sm:$0x3f]  }
  0xa0   : > { %v3423_v7 = vsel %vm189_vm3, %v3418_v1, %v3422_v2  ;;  %v6098_v1 = vld [vmem:[%s6178_s23 + $0xa8] sm:$0xff]   ;;  %v4130_v2 = vsel %vm211_vm0, %v6091_v57, 0 }
  0xa1   : > { %5782 = vmatmul.mubr.msk.bf16.vlgmr.msra.gmra.mrb[68].mxu0 %vm207_vm2, %v6050_v61 }
  0xa2   : > { %5792 = vmatpush3.bf16.msra.mxu0 %v2849_v5  ;;  %5793 = vmatprep.mubr.msk.bf16.mxu0 %vm6124_vm1, %v6123_v0  ;;  %v3614_v5 = vrot.slane %v3612_v62, 1 }
  0xa3   : > { %5800 = vmatmul.mubr.msk.bf16.vlgmr.msra.gmra.mrb[72].mxu1 %vm207_vm2, %v6053_v53  ;;  %5803 = vmatprep.subr.bf16.mxu0 %v6123_v0  ;;  %v3607_v53 = vshll.u32 %v6075_v47, 16  ;;  %v3997_v47 = vshrl.u32 %v6089_v35, 16 }
  0xa4   : > { %5810 = vmatpush3.bf16.msra.mxu1 %v3041_v9  ;;  %5811 = vmatprep.mubr.msk.bf16.mxu1 %vm6124_vm1, %v6123_v0  ;;  %v3546_v9 = vsel %vm211_vm0, %v6073_v3, 0 }
  0xa5   : > { %5821 = vmatprep.subr.bf16.mxu1 %v6123_v0  ;;  %v3609_v61 = vrot.slane %v3607_v53, 1 }
  0xa7   : > { %v3610_v4 = vor.u32 %v3609_v61, %v3605_v60  ;;  %v6097_v61 = vld [vmem:[%s6904_s1] sm:$0x3f]  }
  0xa9   : > { %5794 = vmatmul.mubr.msk.bf16.vlgmr.msra.gmra.mrb[72].mxu0 %vm207_vm2, %v2839_v16  ;;  %v3615_v10 = vsel %vm189_vm3, %v3610_v4, %v3614_v5  ;;  %v6085_v16 = vld [vmem:[%s6178_s23 + $0xa4] ss:$0 sps:$4 sm:$0x11]  }
  0xaa   : > { %5804 = vmatpush3.bf16.msra.mxu0 %v2962_v18  ;;  %5805 = vmatprep.mubr.msk.bf16.mxu0 %vm6124_vm1, %v6123_v0  ;;  %v6077_v18 = vld [vmem:[%s6178_s23 + $0x90] sm:$0xff]   ;;  %v3904_v26 = vshll.u32 %v6085_v16, 16  ;;  %v6095_v16 = vld [vmem:[%s6178_s23 + $0xa8] sm:$0xff]  }
  0xab   : > { %5812 = vmatmul.mubr.msk.bf16.vlgmr.msra.gmra.mrb[76].mxu1 %vm207_vm2, %v3031_v19  ;;  %5815 = vmatprep.subr.bf16.mxu0 %v6123_v0  ;;  %v6083_v19 = vld [vmem:[%s6904_s1 + $0x18] sm:$0x3f]  }
  0xac   : > { %5822 = vmatpush3.bf16.msra.mxu1 %v3192_v21  ;;  %5823 = vmatprep.mubr.msk.bf16.mxu1 %vm6124_vm1, %v6123_v0  ;;  %v3709_v21 = vrot.slane %v3707_v14, 1  ;;  %v3917_v27 = vsel %vm211_vm0, %v6083_v19, 0 }
  0xad   : > { %5833 = vmatprep.subr.bf16.mxu1 %v6123_v0 }
  0xae   : > { %v3710_v28 = vor.u32 %v3709_v21, %v3705_v20  ;;  %v4289_v20 = vshrl.u32 %v6098_v1, 16 }
  0xb0   : > { %v3715_v34 = vsel %vm189_vm3, %v3710_v28, %v3714_v29  ;;  %v4481_v28 = vshrl.u32 %v6102_v6, 16  ;;  %v4485_v29 = vrot.slane %v4483_v13, 1 }
  0xb1   : > { %5806 = vmatmul.mubr.msk.bf16.vlgmr.msra.gmra.mrb[76].mxu0 %vm207_vm2, %v6059_v24  ;;  %v3897_v24 = vshrl.u32 %v6084_v11, 16 }
  0xb2   : > { %5816 = vmatpush3.bf16.msra.mxu0 %v3141_v32  ;;  %5817 = vmatprep.mubr.msk.bf16.mxu0 %vm6124_vm1, %v6123_v0  ;;  %v3906_v32 = vrot.slane %v3904_v26, 1 }
  0xb3   : > { %5824 = vmatmul.mubr.msk.bf16.vlgmr.msra.gmra.mrb[80].mxu1 %vm207_vm2, %v6062_v17  ;;  %5827 = vmatprep.subr.bf16.mxu0 %v6123_v0  ;;  %v3899_v17 = vshll.u32 %v6084_v11, 16 }
  0xb4   : > { %5834 = vmatpush3.bf16.msra.mxu1 %v3333_v36  ;;  %5835 = vmatprep.mubr.msk.bf16.mxu1 %vm6124_vm1, %v6123_v0  ;;  %v3838_v36 = vsel %vm211_vm0, %v6082_v30, 0 }
  0xb5   : > { %5845 = vmatprep.subr.bf16.mxu1 %v6123_v0  ;;  %v3901_v25 = vrot.slane %v3899_v17, 1  ;;  %v6101_v17 = vld [vmem:[%s6904_s1 + $0x18] sm:$0x3f]  }
  0xb7   : > { %v3902_v31 = vor.u32 %v3901_v25, %v3897_v24 }
  0xb9   : > { %5818 = vmatmul.mubr.msk.bf16.vlgmr.msra.gmra.mrb[80].mxu0 %vm207_vm2, %v3131_v43  ;;  %v3907_v37 = vsel %vm189_vm3, %v3902_v31, %v3906_v32  ;;  %v6094_v43 = vld [vmem:[%s6178_s23 + $0xb0] ss:$0 sps:$4 sm:$0x11]   ;;  %v4501_v32 = vsel %vm211_vm0, %v6101_v17, 0 }
  0xba   : > { %5828 = vmatpush3.bf16.msra.mxu0 %v3254_v45  ;;  %5829 = vmatprep.mubr.msk.bf16.mxu0 %vm6124_vm1, %v6123_v0  ;;  %v6086_v45 = vld [vmem:[%s6178_s23 + $0x9c] sm:$0xff]   ;;  %v4196_v53 = vshll.u32 %v6094_v43, 16 }
  0xbb   : > { %5836 = vmatmul.mubr.msk.bf16.vlgmr.msra.gmra.mrb[84].mxu1 %vm207_vm2, %v3323_v46  ;;  %5839 = vmatprep.subr.bf16.mxu0 %v6123_v0  ;;  %v6092_v46 = vld [vmem:[%s6904_s1 + $0x18] sm:$0x3f]  }
  0xbc   : > { %5846 = vmatpush3.bf16.msra.mxu1 %v3484_v48  ;;  %5847 = vmatprep.mubr.msk.bf16.mxu1 %vm6124_vm1, %v6123_v0  ;;  %v4001_v48 = vrot.slane %v3999_v41, 1  ;;  %v6106_v41 = vld [vmem:[%s6904_s1] sm:$0x3f]  }
  0xbd   : > { %5857 = vmatprep.subr.bf16.mxu1 %v6123_v0 }
  0xbe   : > { %v4002_v55 = vor.u32 %v4001_v48, %v3997_v47 }
  0xc0   : > { %v4007_v62 = vsel %vm189_vm3, %v4002_v55, %v4006_v56 }
  0xc1   : > { %5830 = vmatmul.mubr.msk.bf16.vlgmr.msra.gmra.mrb[84].mxu0 %vm207_vm2, %v6068_v54  ;;  %v4209_v54 = vsel %vm211_vm0, %v6092_v46, 0  ;;  %v6748_v46 = vld [vmem:[%s6178_s23 + $0xb4] sm:$0xff]  }
  0xc2   : > { %5840 = vmatpush3.bf16.msra.mxu0 %v3433_v59  ;;  %5841 = vmatprep.mubr.msk.bf16.mxu0 %vm6124_vm1, %v6123_v0  ;;  %v4198_v59 = vrot.slane %v4196_v53, 1  ;;  %v4581_v13 = vshrl.u32 %v6748_v46, 16 }
  0xc3   : > { %5848 = vmatmul.mubr.msk.bf16.vlgmr.msra.gmra.mrb[88].mxu1 %vm207_vm2, %v6071_v44  ;;  %5851 = vmatprep.subr.bf16.mxu0 %v6123_v0  ;;  %v4191_v44 = vshll.u32 %v6093_v38, 16 }
  0xc4   : > { %5858 = vmatpush3.bf16.msra.mxu1 %v3625_v63  ;;  %5859 = vmatprep.mubr.msk.bf16.mxu1 %vm6124_vm1, %v6123_v0 }
  0xc5   : > { %5869 = vmatprep.subr.bf16.mxu1 %v6123_v0  ;;  %v4193_v52 = vrot.slane %v4191_v44, 1 }
  0xc7   : > { %v4194_v58 = vor.u32 %v4193_v52, %v4189_v51 }
  0xc9   : > { %5842 = vmatmul.mubr.msk.bf16.vlgmr.msra.gmra.mrb[88].mxu0 %vm207_vm2, %v3423_v7  ;;  %v4199_v5 = vsel %vm189_vm3, %v4194_v58, %v4198_v59  ;;  %v4360_v7 = vsel %vm211_vm0, %v6097_v61, 0  ;;  %v4652_v58 = vsel %vm211_vm0, %v6106_v41, 0  ;;  %v6108_v59 = vld [vmem:[%s6178_s23 + $0xbc] ss:$0 sps:$4 sm:$0x11]  }
  0xca   : > { %5852 = vmatpush3.bf16.msra.mxu0 %v3546_v9  ;;  %5853 = vmatprep.mubr.msk.bf16.mxu0 %vm6124_vm1, %v6123_v0  ;;  %v4291_v9 = vshll.u32 %v6098_v1, 16 }
  0xcb   : > { %5860 = vmatmul.mubr.msk.bf16.vlgmr.msra.gmra.mrb[92].mxu1 %vm207_vm2, %v3615_v10  ;;  %5863 = vmatprep.subr.bf16.mxu0 %v6123_v0  ;;  %v6096_v10 = vld [vmem:[%s6904_s1 + $0x8] sm:$0x3f]  }
  0xcc   : > { %5870 = vmatpush3.bf16.msra.mxu1 %v3776_v12  ;;  %5871 = vmatprep.mubr.msk.bf16.mxu1 %vm6124_vm1, %v6123_v0  ;;  %v6103_v12 = vld [vmem:[%s6178_s23 + $0xbc] ss:$0 sps:$4 sm:$0x11]   ;;  %v4293_v21 = vrot.slane %v4291_v9, 1  ;;  %v4309_v25 = vsel %vm211_vm0, %v6096_v10, 0 }
  0xcd   : > { %5881 = vmatprep.subr.bf16.mxu1 %v6123_v0  ;;  %v4488_v30 = vshll.u32 %v6103_v12, 16  ;;  %v6110_v9 = vld [vmem:[%s6904_s1 + $0x18] sm:$0x3f]  }
  0xce   : > { %v4294_v33 = vor.u32 %v4293_v21, %v4289_v20 }
  0xcf   : > { %v4490_v38 = vrot.slane %v4488_v30, 1  ;;  %v6109_v30 = vld [vmem:[%s6904_s1 + $0x10] sm:$0x3f]  }
  0xd1   : > { %5854 = vmatmul.mubr.msk.bf16.vlgmr.msra.gmra.mrb[92].mxu0 %vm207_vm2, %v6077_v18 }
  0xd2   : > { %5864 = vmatpush3.bf16.msra.mxu0 %v3725_v23  ;;  %5865 = vmatprep.mubr.msk.bf16.mxu0 %vm6124_vm1, %v6123_v0 }
  0xd3   : > { %5872 = vmatmul.mubr.msk.bf16.vlgmr.msra.gmra.mrb[96].mxu1 %vm207_vm2, %v6080_v8  ;;  %5875 = vmatprep.subr.bf16.mxu0 %v6123_v0  ;;  %v6099_v8 = vld [vmem:[%s6178_s23 + $0xb0] ss:$0 sps:$4 sm:$0x11]  }
  0xd4   : > { %5882 = vmatpush3.bf16.msra.mxu1 %v3917_v27  ;;  %5883 = vmatprep.mubr.msk.bf16.mxu1 %vm6124_vm1, %v6123_v0  ;;  %v4296_v22 = vshll.u32 %v6099_v8, 16 }
  0xd5   : > { %5893 = vmatprep.subr.bf16.mxu1 %v6123_v0 }
  0xd9   : > { %5866 = vmatmul.mubr.msk.bf16.vlgmr.msra.gmra.mrb[96].mxu0 %vm207_vm2, %v3715_v34  ;;  %v4298_v34 = vrot.slane %v4296_v22, 1 }
  0xda   : > { %5876 = vmatpush3.bf16.msra.mxu0 %v3838_v36  ;;  %5877 = vmatprep.mubr.msk.bf16.mxu0 %vm6124_vm1, %v6123_v0 }
  0xdb   : > { %5884 = vmatmul.mubr.msk.bf16.vlgmr.msra.gmra.mrb[100].mxu1 %vm207_vm2, %v3907_v37  ;;  %5887 = vmatprep.subr.bf16.mxu0 %v6123_v0  ;;  %v4486_v37 = vor.u32 %v4485_v29, %v4481_v28  ;;  %v4299_v44 = vsel %vm189_vm3, %v4294_v33, %v4298_v34 }
  0xdc   : > { %5894 = vmatpush3.bf16.msra.mxu1 %v4068_v39  ;;  %5895 = vmatprep.mubr.msk.bf16.mxu1 %vm6124_vm1, %v6123_v0 }
  0xdd   : > { %5905 = vmatprep.subr.bf16.mxu1 %v6123_v0  ;;  %v4491_v53 = vsel %vm189_vm3, %v4486_v37, %v4490_v38 }
  0xe1   : > { %5878 = vmatmul.mubr.msk.bf16.vlgmr.msra.gmra.mrb[100].mxu0 %vm207_vm2, %v6086_v45 }
  0xe2   : > { %5888 = vmatpush3.bf16.msra.mxu0 %v4017_v50  ;;  %5889 = vmatprep.mubr.msk.bf16.mxu0 %vm6124_vm1, %v6123_v0 }
  0xe3   : > { %5896 = vmatmul.mubr.msk.bf16.vlgmr.msra.gmra.mrb[104].mxu1 %vm207_vm2, %v6089_v35  ;;  %5899 = vmatprep.subr.bf16.mxu0 %v6123_v0  ;;  %v6100_v35 = vld [vmem:[%s6904_s1 + $0x10] sm:$0x3f]  }
  0xe4   : > { %5906 = vmatpush3.bf16.msra.mxu1 %v4209_v54  ;;  %5907 = vmatprep.mubr.msk.bf16.mxu1 %vm6124_vm1, %v6123_v0  ;;  %v4422_v50 = vsel %vm211_vm0, %v6100_v35, 0  ;;  %v6753_v54 = vld [vmem:[%s6178_s23 + $0xc0] sm:$0xff]  }
  0xe5   : > { %v300_v60 = vpop.f32.mrb[0].mxu1  ;;  %5917 = vmatprep.subr.bf16.mxu1 %v6123_v0 }
  0xe6   : > { %v5585_v63 = vpop.f32.mrb[1].mxu1 }
  0xe7   : > { %v303_v3 = vpop.f32.mrb[2].mxu1  ;;  %v6105_v63 = vld [vmem:[%s6904_s1 + $0x8] sm:$0x3f]  }
  0xe8   : > { %v5586_v4 = vpop.f32.mrb[3].mxu1 }
  0xe9   : > { %5890 = vmatmul.mubr.msk.bf16.vlgmr.msra.gmra.mrb[104].mxu0 %vm207_vm2, %v4007_v62  ;;  %v4775_v4 = vshll.u32 %v6753_v54, 16 }
  0xea   : > { %5900 = vmatpush3.bf16.msra.mxu0 %v4130_v2  ;;  %5901 = vmatprep.mubr.msk.bf16.mxu0 %vm6124_vm1, %v6123_v0  ;;  %v6104_v2 = vld [vmem:[%s6178_s23 + $0xb4] sm:$0xff]  }
  0xeb   : > { %5908 = vmatmul.mubr.msk.bf16.vlgmr.msra.gmra.mrb[108].mxu1 %vm207_vm2, %v4199_v5  ;;  %5911 = vmatprep.subr.bf16.mxu0 %v6123_v0 }
  0xec   : > { %v249_v11 = vpop.f32.mrb[0].mxu0  ;;  %5918 = vmatpush3.bf16.msra.mxu1 %v4360_v7  ;;  %5919 = vmatprep.mubr.msk.bf16.mxu1 %vm6124_vm1, %v6123_v0 }
  0xed   : > { %v301_v14 = vadd.f32 %v300_v60, %v249_v11  ;;  %v5579_v15 = vpop.f32.mrb[1].mxu0  ;;  %5929 = vmatprep.subr.bf16.mxu1 %v6123_v0  ;;  %v4583_v60 = vshll.u32 %v6748_v46, 16 }
  0xee   : > { %v252_v18 = vpop.f32.mrb[2].mxu0  ;;  %v443_v19 = vpop.f32.mrb[4].mxu1  ;;  %v4588_v15 = vshll.u32 %v6108_v59, 16 }
  0xef   : > { %v304_v23 = vadd.f32 %v303_v3, %v252_v18  ;;  %v5580_v24 = vpop.f32.mrb[3].mxu0  ;;  %v5597_v26 = vpop.f32.mrb[5].mxu1  ;;  %v6112_v3 = vld [vmem:[%s6178_s23 + $0xc8] ss:$0 sps:$4 sm:$0x11]  }
  0xf0   : > { %v446_v27 = vpop.f32.mrb[6].mxu1  ;;  %v4777_v24 = vrot.slane %v4775_v4, 1  ;;  %v4590_v29 = vrot.slane %v4588_v15, 1 }
  0xf1   : > { %5902 = vmatmul.mubr.msk.bf16.vlgmr.msra.gmra.mrb[108].mxu0 %vm207_vm2, %v6095_v16  ;;  %v5598_v31 = vpop.f32.mrb[7].mxu1 }
  0xf2   : > { %5912 = vmatpush3.bf16.msra.mxu0 %v4309_v25  ;;  %5913 = vmatprep.mubr.msk.bf16.mxu0 %vm6124_vm1, %v6123_v0  ;;  %v4780_v25 = vshll.u32 %v6112_v3, 16 }
  0xf3   : > { %5920 = vmatmul.mubr.msk.bf16.vlgmr.msra.gmra.mrb[112].mxu1 %vm207_vm2, %v6098_v1  ;;  %5923 = vmatprep.subr.bf16.mxu0 %v6123_v0 }
  0xf4   : > { %v363_v36 = vpop.f32.mrb[4].mxu0  ;;  %5930 = vmatpush3.bf16.msra.mxu1 %v4501_v32  ;;  %5931 = vmatprep.mubr.msk.bf16.mxu1 %vm6124_vm1, %v6123_v0  ;;  %v4782_v33 = vrot.slane %v4780_v25, 1 }
  0xf5   : > { %v370_v39 = vadd.f32 %v363_v36, %v301_v14  ;;  %v5591_v40 = vpop.f32.mrb[5].mxu0  ;;  %5941 = vmatprep.subr.bf16.mxu1 %v6123_v0  ;;  %v4585_v14 = vrot.slane %v4583_v60, 1 }
  0xf6   : > { %v366_v43 = vpop.f32.mrb[6].mxu0  ;;  %v600_v45 = vpop.f32.mrb[8].mxu1 }
  0xf7   : > { %v450_v47 = vadd.f32 %v443_v19, %v370_v39  ;;  %v371_v48 = vadd.f32 %v366_v43, %v304_v23  ;;  %v5592_v49 = vpop.f32.mrb[7].mxu0  ;;  %v5609_v51 = vpop.f32.mrb[9].mxu1  ;;  %v4601_v19 = vsel %vm211_vm0, %v6105_v63, 0  ;;  %v4773_v23 = vshrl.u32 %v6753_v54, 16 }
  0xf8   : > { %v603_v52 = vpop.f32.mrb[10].mxu1  ;;  %v4586_v28 = vor.u32 %v4585_v14, %v4581_v13  ;;  %v4714_v43 = vsel %vm211_vm0, %v6109_v30, 0 }
  0xf9   : > { %v458_v55 = vadd.f32 %v6744_v42, %v450_v47  ;;  %v451_v56 = vadd.f32 %v446_v27, %v371_v48  ;;  %5914 = vmatmul.mubr.msk.bf16.vlgmr.msra.gmra.mrb[112].mxu0 %vm207_vm2, %v4299_v44  ;;  %v5610_v57 = vpop.f32.mrb[11].mxu1  ;;  %v4793_v27 = vsel %vm211_vm0, %v6110_v9, 0  ;;  %v4778_v32 = vor.u32 %v4777_v24, %v4773_v23 }
  0xfa   : > { %5924 = vmatpush3.bf16.msra.mxu0 %v4422_v50  ;;  %5925 = vmatprep.mubr.msk.bf16.mxu0 %vm6124_vm1, %v6123_v0  ;;  %v4591_v37 = vsel %vm189_vm3, %v4586_v28, %v4590_v29  ;;  %v6113_v57 = vld [vmem:[%s6178_s23 + $0xc0] sm:$0xff]  }
  0xfb   : > { %vm460_vm4 = vcmp.gt.f32.partialorder %v458_v55, 0.0  ;;  %v462_v61 = vmul.f32 0.2, %v458_v55  ;;  %v459_v62 = vadd.f32 %v6744_v42, %v451_v56  ;;  %5932 = vmatmul.mubr.msk.bf16.vlgmr.msra.gmra.mrb[116].mxu1 %vm207_vm2, %v4491_v53  ;;  %5935 = vmatprep.subr.bf16.mxu0 %v6123_v0 }
  0xfc   : > { %v549_v1 = vpop.f32.mrb[8].mxu0  ;;  %5942 = vmatpush3.bf16.msra.mxu1 %v4652_v58  ;;  %5943 = vmatprep.mubr.msk.bf16.mxu1 %vm6124_vm1, %v6123_v0 }
  0xfd   : > { %v464_v5 = vsel %vm460_vm4, %v458_v55, %v462_v61  ;;  %vm461_vm6 = vcmp.gt.f32.partialorder %v459_v62, 0.0  ;;  %v463_v6 = vmul.f32 0.2, %v459_v62  ;;  %v601_v7 = vadd.f32 %v600_v45, %v549_v1  ;;  %v5603_v8 = vpop.f32.mrb[9].mxu0  ;;  %5953 = vmatprep.subr.bf16.mxu1 %v6123_v0 }
  0xfe   : > { %v5415_v10 = vpack.c.bf16 %v464_v5, %v464_v5  ;;  %v552_v11 = vpop.f32.mrb[10].mxu0  ;;  %v741_v12 = vpop.f32.mrb[12].mxu1 }
  0xff   : > { %v465_v16 = vsel %vm461_vm6, %v459_v62, %v463_v6  ;;  %v604_v17 = vadd.f32 %v603_v52, %v552_v11  ;;  %v5604_v18 = vpop.f32.mrb[11].mxu0  ;;  %v5621_v20 = vpop.f32.mrb[13].mxu1 }
 0x100   : > { %475 = vst.msk [vmem:[%s6777_s26] sm:$0xf] %vm474_vm5, %v5415_v10  ;;  %v5416_v21 = vpack.c.bf16 %v465_v16, %v465_v16  ;;  %v744_v22 = vpop.f32.mrb[14].mxu1 }
 0x101   : > { %5926 = vmatmul.mubr.msk.bf16.vlgmr.msra.gmra.mrb[116].mxu0 %vm207_vm2, %v6104_v2  ;;  %v5622_v26 = vpop.f32.mrb[15].mxu1 }
 0x102   : > { %476 = vst.msk [vmem:[%s6777_s26 + $0x4] sm:$0xf] %vm474_vm5, %v5416_v21  ;;  %5936 = vmatpush3.bf16.msra.mxu0 %v4601_v19  ;;  %5937 = vmatprep.mubr.msk.bf16.mxu0 %vm6124_vm1, %v6123_v0 }
 0x103   : > { %5944 = vmatmul.mubr.msk.bf16.vlgmr.msra.gmra.mrb[120].mxu1 %vm207_vm2, %v6748_v46  ;;  %5947 = vmatprep.subr.bf16.mxu0 %v6123_v0  ;;  %v4783_v46 = vsel %vm189_vm3, %v4778_v32, %v4782_v33 }
 0x104   : > { %v662_v31 = vpop.f32.mrb[12].mxu0  ;;  %5954 = vmatpush3.bf16.msra.mxu1 %v4793_v27  ;;  %5955 = vmatprep.mubr.msk.bf16.mxu1 %vm6124_vm1, %v6123_v0 }
 0x105   : > { %v669_v34 = vadd.f32 %v662_v31, %v601_v7  ;;  %v5615_v35 = vpop.f32.mrb[13].mxu0 }
 0x106   : > { %v665_v36 = vpop.f32.mrb[14].mxu0  ;;  %v892_v38 = vpop.f32.mrb[16].mxu1 }
 0x107   : > { %v748_v39 = vadd.f32 %v741_v12, %v669_v34  ;;  %v670_v40 = vadd.f32 %v665_v36, %v604_v17  ;;  %v5616_v41 = vpop.f32.mrb[15].mxu0  ;;  %v5633_v44 = vpop.f32.mrb[17].mxu1 }
 0x108   : > { %v895_v45 = vpop.f32.mrb[18].mxu1 }
 0x109   : > { %v750_v47 = vadd.f32 %v6744_v42, %v748_v39  ;;  %v749_v48 = vadd.f32 %v744_v22, %v670_v40  ;;  %5938 = vmatmul.mubr.msk.bf16.vlgmr.msra.gmra.mrb[120].mxu0 %vm207_vm2, %v4591_v37  ;;  %v5634_v49 = vpop.f32.mrb[19].mxu1 }
 0x10a   : > { %5948 = vmatpush3.bf16.msra.mxu0 %v4714_v43  ;;  %5949 = vmatprep.mubr.msk.bf16.mxu0 %vm6124_vm1, %v6123_v0 }
 0x10b   : > { %vm752_vm7 = vcmp.gt.f32.partialorder %v750_v47, 0.0  ;;  %v754_v50 = vmul.f32 0.2, %v750_v47  ;;  %v751_v51 = vadd.f32 %v6744_v42, %v749_v48  ;;  %5956 = vmatmul.mubr.msk.bf16.vlgmr.msra.gmra.mrb[124].mxu1 %vm207_vm2, %v4783_v46 }
 0x10c   : > { %v841_v52 = vpop.f32.mrb[16].mxu0 }
 0x10d   : > { %v756_v53 = vsel %vm752_vm7, %v750_v47, %v754_v50  ;;  %vm753_vm8 = vcmp.gt.f32.partialorder %v751_v51, 0.0  ;;  %v755_v54 = vmul.f32 0.2, %v751_v51  ;;  %v893_v55 = vadd.f32 %v892_v38, %v841_v52  ;;  %v5627_v56 = vpop.f32.mrb[17].mxu0 }
 0x10e   : > { %v5417_v58 = vpack.c.bf16 %v756_v53, %v756_v53  ;;  %v844_v59 = vpop.f32.mrb[18].mxu0  ;;  %v1033_v60 = vpop.f32.mrb[20].mxu1 }
 0x10f   : > { %v757_v61 = vsel %vm753_vm8, %v751_v51, %v755_v54  ;;  %v896_v0 = vadd.f32 %v895_v45, %v844_v59  ;;  %v5628_v62 = vpop.f32.mrb[19].mxu0  ;;  %v5645_v63 = vpop.f32.mrb[21].mxu1 }
 0x110   : > { %4976 = vst.msk [vmem:[%s6777_s26 + $0x8] sm:$0xf] %vm474_vm5, %v5417_v58  ;;  %v5418_v1 = vpack.c.bf16 %v757_v61, %v757_v61  ;;  %v1036_v2 = vpop.f32.mrb[22].mxu1 }
 0x111   : > { %5950 = vmatmul.mubr.msk.bf16.vlgmr.msra.gmra.mrb[124].mxu0 %vm207_vm2, %v6113_v57  ;;  %v5646_v3 = vpop.f32.mrb[23].mxu1 }
 0x112   : > { %4977 = vst.msk [vmem:[%s6777_s26 + $0xc] sm:$0xf] %vm474_vm5, %v5418_v1 }
 0x114   : > { %v954_v4 = vpop.f32.mrb[20].mxu0 }
 0x115   : > { %v961_v5 = vadd.f32 %v954_v4, %v893_v55  ;;  %v5639_v6 = vpop.f32.mrb[21].mxu0 }
 0x116   : > { %v957_v7 = vpop.f32.mrb[22].mxu0  ;;  %v1184_v8 = vpop.f32.mrb[24].mxu1 }
 0x117   : > { %v1040_v9 = vadd.f32 %v1033_v60, %v961_v5  ;;  %v962_v10 = vadd.f32 %v957_v7, %v896_v0  ;;  %v5640_v11 = vpop.f32.mrb[23].mxu0  ;;  %v5657_v12 = vpop.f32.mrb[25].mxu1 }
 0x118   : > { %v1187_v13 = vpop.f32.mrb[26].mxu1 }
 0x119   : > { %v1042_v14 = vadd.f32 %v6744_v42, %v1040_v9  ;;  %v1041_v15 = vadd.f32 %v1036_v2, %v962_v10  ;;  %v5658_v16 = vpop.f32.mrb[27].mxu1 }
 0x11b   : > { %vm1044_vm9 = vcmp.gt.f32.partialorder %v1042_v14, 0.0  ;;  %v1046_v17 = vmul.f32 0.2, %v1042_v14  ;;  %v1043_v18 = vadd.f32 %v6744_v42, %v1041_v15 }
 0x11c   : > { %v1133_v19 = vpop.f32.mrb[24].mxu0 }
 0x11d   : > { %v1048_v20 = vsel %vm1044_vm9, %v1042_v14, %v1046_v17  ;;  %vm1045_vm10 = vcmp.gt.f32.partialorder %v1043_v18, 0.0  ;;  %v1047_v21 = vmul.f32 0.2, %v1043_v18  ;;  %v1185_v22 = vadd.f32 %v1184_v8, %v1133_v19  ;;  %v5651_v23 = vpop.f32.mrb[25].mxu0 }
 0x11e   : > { %v5419_v24 = vpack.c.bf16 %v1048_v20, %v1048_v20  ;;  %v1136_v25 = vpop.f32.mrb[26].mxu0  ;;  %v1325_v26 = vpop.f32.mrb[28].mxu1 }
 0x11f   : > { %v1049_v27 = vsel %vm1045_vm10, %v1043_v18, %v1047_v21  ;;  %v1188_v28 = vadd.f32 %v1187_v13, %v1136_v25  ;;  %v5652_v29 = vpop.f32.mrb[27].mxu0  ;;  %v5669_v30 = vpop.f32.mrb[29].mxu1 }
 0x120   : > { %5007 = vst.msk [vmem:[%s6777_s26 + $0x10] sm:$0xf] %vm474_vm5, %v5419_v24  ;;  %v5420_v31 = vpack.c.bf16 %v1049_v27, %v1049_v27  ;;  %v1328_v32 = vpop.f32.mrb[30].mxu1 }
 0x121   : > { %v5670_v33 = vpop.f32.mrb[31].mxu1 }
 0x122   : > { %5008 = vst.msk [vmem:[%s6777_s26 + $0x14] sm:$0xf] %vm474_vm5, %v5420_v31 }
 0x124   : > { %v1246_v34 = vpop.f32.mrb[28].mxu0 }
 0x125   : > { %v1253_v35 = vadd.f32 %v1246_v34, %v1185_v22  ;;  %v5663_v36 = vpop.f32.mrb[29].mxu0 }
 0x126   : > { %v1249_v37 = vpop.f32.mrb[30].mxu0  ;;  %v1476_v38 = vpop.f32.mrb[32].mxu1 }
 0x127   : > { %v1332_v39 = vadd.f32 %v1325_v26, %v1253_v35  ;;  %v1254_v40 = vadd.f32 %v1249_v37, %v1188_v28  ;;  %v5664_v41 = vpop.f32.mrb[31].mxu0  ;;  %v5681_v43 = vpop.f32.mrb[33].mxu1 }
 0x128   : > { %v1479_v44 = vpop.f32.mrb[34].mxu1 }
 0x129   : > { %v1334_v45 = vadd.f32 %v6744_v42, %v1332_v39  ;;  %v1333_v46 = vadd.f32 %v1328_v32, %v1254_v40  ;;  %v5682_v47 = vpop.f32.mrb[35].mxu1 }
 0x12b   : > { %vm1336_vm11 = vcmp.gt.f32.partialorder %v1334_v45, 0.0  ;;  %v1338_v48 = vmul.f32 0.2, %v1334_v45  ;;  %v1335_v49 = vadd.f32 %v6744_v42, %v1333_v46 }
 0x12c   : > { %v1425_v50 = vpop.f32.mrb[32].mxu0 }
 0x12d   : > { %v1340_v51 = vsel %vm1336_vm11, %v1334_v45, %v1338_v48  ;;  %vm1337_vm12 = vcmp.gt.f32.partialorder %v1335_v49, 0.0  ;;  %v1339_v52 = vmul.f32 0.2, %v1335_v49  ;;  %v1477_v53 = vadd.f32 %v1476_v38, %v1425_v50  ;;  %v5675_v54 = vpop.f32.mrb[33].mxu0 }
 0x12e   : > { %v5421_v55 = vpack.c.bf16 %v1340_v51, %v1340_v51  ;;  %v1428_v56 = vpop.f32.mrb[34].mxu0  ;;  %v1617_v57 = vpop.f32.mrb[36].mxu1 }
 0x12f   : > { %v1341_v58 = vsel %vm1337_vm12, %v1335_v49, %v1339_v52  ;;  %v1480_v59 = vadd.f32 %v1479_v44, %v1428_v56  ;;  %v5676_v60 = vpop.f32.mrb[35].mxu0  ;;  %v5693_v61 = vpop.f32.mrb[37].mxu1 }
 0x130   : > { %5038 = vst.msk [vmem:[%s6777_s26 + $0x18] sm:$0xf] %vm474_vm5, %v5421_v55  ;;  %v5422_v0 = vpack.c.bf16 %v1341_v58, %v1341_v58  ;;  %v1620_v62 = vpop.f32.mrb[38].mxu1 }
 0x131   : > { %v5694_v63 = vpop.f32.mrb[39].mxu1 }
 0x132   : > { %5039 = vst.msk [vmem:[%s6777_s26 + $0x1c] sm:$0xf] %vm474_vm5, %v5422_v0 }
 0x134   : > { %v1538_v1 = vpop.f32.mrb[36].mxu0 }
 0x135   : > { %v1545_v2 = vadd.f32 %v1538_v1, %v1477_v53  ;;  %v5687_v3 = vpop.f32.mrb[37].mxu0 }
 0x136   : > { %v1541_v4 = vpop.f32.mrb[38].mxu0  ;;  %v1768_v5 = vpop.f32.mrb[40].mxu1 }
 0x137   : > { %v1624_v6 = vadd.f32 %v1617_v57, %v1545_v2  ;;  %v1546_v7 = vadd.f32 %v1541_v4, %v1480_v59  ;;  %v5688_v8 = vpop.f32.mrb[39].mxu0  ;;  %v5705_v9 = vpop.f32.mrb[41].mxu1 }
 0x138   : > { %v1771_v10 = vpop.f32.mrb[42].mxu1 }
 0x139   : > { %v1626_v11 = vadd.f32 %v6744_v42, %v1624_v6  ;;  %v1625_v12 = vadd.f32 %v1620_v62, %v1546_v7  ;;  %v5706_v13 = vpop.f32.mrb[43].mxu1 }
 0x13b   : > { %vm1628_vm13 = vcmp.gt.f32.partialorder %v1626_v11, 0.0  ;;  %v1630_v14 = vmul.f32 0.2, %v1626_v11  ;;  %v1627_v15 = vadd.f32 %v6744_v42, %v1625_v12 }
 0x13c   : > { %v1717_v16 = vpop.f32.mrb[40].mxu0 }
 0x13d   : > { %v1632_v17 = vsel %vm1628_vm13, %v1626_v11, %v1630_v14  ;;  %vm1629_vm14 = vcmp.gt.f32.partialorder %v1627_v15, 0.0  ;;  %v1631_v18 = vmul.f32 0.2, %v1627_v15  ;;  %v1769_v19 = vadd.f32 %v1768_v5, %v1717_v16  ;;  %v5699_v20 = vpop.f32.mrb[41].mxu0 }
 0x13e   : > { %v5423_v21 = vpack.c.bf16 %v1632_v17, %v1632_v17  ;;  %v1720_v22 = vpop.f32.mrb[42].mxu0  ;;  %v1909_v23 = vpop.f32.mrb[44].mxu1 }
 0x13f   : > { %v1633_v24 = vsel %vm1629_vm14, %v1627_v15, %v1631_v18  ;;  %v1772_v25 = vadd.f32 %v1771_v10, %v1720_v22  ;;  %v5700_v26 = vpop.f32.mrb[43].mxu0  ;;  %v5717_v27 = vpop.f32.mrb[45].mxu1 }
 0x140   : > { %5069 = vst.msk [vmem:[%s6777_s26 + $0x20] sm:$0xf] %vm474_vm5, %v5423_v21  ;;  %v5424_v28 = vpack.c.bf16 %v1633_v24, %v1633_v24  ;;  %v1912_v29 = vpop.f32.mrb[46].mxu1 }
 0x141   : > { %v5718_v30 = vpop.f32.mrb[47].mxu1 }
 0x142   : > { %5070 = vst.msk [vmem:[%s6777_s26 + $0x24] sm:$0xf] %vm474_vm5, %v5424_v28 }
 0x144   : > { %v1830_v31 = vpop.f32.mrb[44].mxu0 }
 0x145   : > { %v1837_v32 = vadd.f32 %v1830_v31, %v1769_v19  ;;  %v5711_v33 = vpop.f32.mrb[45].mxu0 }
 0x146   : > { %v1833_v34 = vpop.f32.mrb[46].mxu0  ;;  %v2060_v35 = vpop.f32.mrb[48].mxu1 }
 0x147   : > { %v1916_v36 = vadd.f32 %v1909_v23, %v1837_v32  ;;  %v1838_v37 = vadd.f32 %v1833_v34, %v1772_v25  ;;  %v5712_v38 = vpop.f32.mrb[47].mxu0  ;;  %v5729_v39 = vpop.f32.mrb[49].mxu1 }
 0x148   : > { %v2063_v40 = vpop.f32.mrb[50].mxu1 }
 0x149   : > { %v1918_v41 = vadd.f32 %v6744_v42, %v1916_v36  ;;  %v1917_v43 = vadd.f32 %v1912_v29, %v1838_v37  ;;  %v5730_v44 = vpop.f32.mrb[51].mxu1 }
 0x14b   : > { %vm1920_vm15 = vcmp.gt.f32.partialorder %v1918_v41, 0.0  ;;  %v1922_v45 = vmul.f32 0.2, %v1918_v41  ;;  %v1919_v46 = vadd.f32 %v6744_v42, %v1917_v43 }
 0x14c   : > { %v2009_v47 = vpop.f32.mrb[48].mxu0 }
 0x14d   : > { %v1924_v48 = vsel %vm1920_vm15, %v1918_v41, %v1922_v45  ;;  %vm1921_vm0 = vcmp.gt.f32.partialorder %v1919_v46, 0.0  ;;  %v1923_v49 = vmul.f32 0.2, %v1919_v46  ;;  %v2061_v50 = vadd.f32 %v2060_v35, %v2009_v47  ;;  %v5723_v51 = vpop.f32.mrb[49].mxu0 }
 0x14e   : > { %v5425_v52 = vpack.c.bf16 %v1924_v48, %v1924_v48  ;;  %v2012_v53 = vpop.f32.mrb[50].mxu0  ;;  %v2201_v54 = vpop.f32.mrb[52].mxu1 }
 0x14f   : > { %v1925_v55 = vsel %vm1921_vm0, %v1919_v46, %v1923_v49  ;;  %v2064_v56 = vadd.f32 %v2063_v40, %v2012_v53  ;;  %v5724_v57 = vpop.f32.mrb[51].mxu0  ;;  %v5741_v58 = vpop.f32.mrb[53].mxu1 }
 0x150   : > { %5100 = vst.msk [vmem:[%s6777_s26 + $0x28] sm:$0xf] %vm474_vm5, %v5425_v52  ;;  %v5426_v59 = vpack.c.bf16 %v1925_v55, %v1925_v55  ;;  %v2204_v60 = vpop.f32.mrb[54].mxu1 }
 0x151   : > { %v5742_v61 = vpop.f32.mrb[55].mxu1 }
 0x152   : > { %5101 = vst.msk [vmem:[%s6777_s26 + $0x2c] sm:$0xf] %vm474_vm5, %v5426_v59 }
 0x154   : > { %v2122_v0 = vpop.f32.mrb[52].mxu0 }
 0x155   : > { %v2129_v62 = vadd.f32 %v2122_v0, %v2061_v50  ;;  %v5735_v63 = vpop.f32.mrb[53].mxu0 }
 0x156   : > { %v2125_v1 = vpop.f32.mrb[54].mxu0  ;;  %v2352_v2 = vpop.f32.mrb[56].mxu1 }
 0x157   : > { %v2208_v3 = vadd.f32 %v2201_v54, %v2129_v62  ;;  %v2130_v4 = vadd.f32 %v2125_v1, %v2064_v56  ;;  %v5736_v5 = vpop.f32.mrb[55].mxu0  ;;  %v5753_v6 = vpop.f32.mrb[57].mxu1 }
 0x158   : > { %v2355_v7 = vpop.f32.mrb[58].mxu1 }
 0x159   : > { %v2210_v8 = vadd.f32 %v6744_v42, %v2208_v3  ;;  %v2209_v9 = vadd.f32 %v2204_v60, %v2130_v4  ;;  %v5754_v10 = vpop.f32.mrb[59].mxu1 }
 0x15b   : > { %vm2212_vm1 = vcmp.gt.f32.partialorder %v2210_v8, 0.0  ;;  %v2214_v11 = vmul.f32 0.2, %v2210_v8  ;;  %v2211_v12 = vadd.f32 %v6744_v42, %v2209_v9 }
 0x15c   : > { %v2301_v13 = vpop.f32.mrb[56].mxu0 }
 0x15d   : > { %v2216_v14 = vsel %vm2212_vm1, %v2210_v8, %v2214_v11  ;;  %vm2213_vm2 = vcmp.gt.f32.partialorder %v2211_v12, 0.0  ;;  %v2215_v15 = vmul.f32 0.2, %v2211_v12  ;;  %v2353_v16 = vadd.f32 %v2352_v2, %v2301_v13  ;;  %v5747_v17 = vpop.f32.mrb[57].mxu0 }
 0x15e   : > { %v5427_v18 = vpack.c.bf16 %v2216_v14, %v2216_v14  ;;  %v2304_v19 = vpop.f32.mrb[58].mxu0  ;;  %v2493_v20 = vpop.f32.mrb[60].mxu1 }
 0x15f   : > { %v2217_v21 = vsel %vm2213_vm2, %v2211_v12, %v2215_v15  ;;  %v2356_v22 = vadd.f32 %v2355_v7, %v2304_v19  ;;  %v5748_v23 = vpop.f32.mrb[59].mxu0  ;;  %v5765_v24 = vpop.f32.mrb[61].mxu1 }
 0x160   : > { %5131 = vst.msk [vmem:[%s6777_s26 + $0x30] sm:$0xf] %vm474_vm5, %v5427_v18  ;;  %v5428_v25 = vpack.c.bf16 %v2217_v21, %v2217_v21  ;;  %v2496_v26 = vpop.f32.mrb[62].mxu1 }
 0x161   : > { %v5766_v27 = vpop.f32.mrb[63].mxu1 }
 0x162   : > { %5132 = vst.msk [vmem:[%s6777_s26 + $0x34] sm:$0xf] %vm474_vm5, %v5428_v25 }
 0x164   : > { %v2414_v28 = vpop.f32.mrb[60].mxu0 }
 0x165   : > { %v2421_v29 = vadd.f32 %v2414_v28, %v2353_v16  ;;  %v5759_v30 = vpop.f32.mrb[61].mxu0 }
 0x166   : > { %v2417_v31 = vpop.f32.mrb[62].mxu0  ;;  %v2644_v32 = vpop.f32.mrb[64].mxu1 }
 0x167   : > { %v2500_v33 = vadd.f32 %v2493_v20, %v2421_v29  ;;  %v2422_v34 = vadd.f32 %v2417_v31, %v2356_v22  ;;  %v5760_v35 = vpop.f32.mrb[63].mxu0  ;;  %v5777_v36 = vpop.f32.mrb[65].mxu1 }
 0x168   : > { %v2647_v37 = vpop.f32.mrb[66].mxu1 }
 0x169   : > { %v2502_v38 = vadd.f32 %v6744_v42, %v2500_v33  ;;  %v2501_v39 = vadd.f32 %v2496_v26, %v2422_v34  ;;  %v5778_v40 = vpop.f32.mrb[67].mxu1 }
 0x16b   : > { %vm2504_vm3 = vcmp.gt.f32.partialorder %v2502_v38, 0.0  ;;  %v2506_v41 = vmul.f32 0.2, %v2502_v38  ;;  %v2503_v43 = vadd.f32 %v6744_v42, %v2501_v39 }
 0x16c   : > { %v2593_v44 = vpop.f32.mrb[64].mxu0 }
 0x16d   : > { %v2508_v45 = vsel %vm2504_vm3, %v2502_v38, %v2506_v41  ;;  %vm2505_vm4 = vcmp.gt.f32.partialorder %v2503_v43, 0.0  ;;  %v2507_v46 = vmul.f32 0.2, %v2503_v43  ;;  %v2645_v47 = vadd.f32 %v2644_v32, %v2593_v44  ;;  %v5771_v48 = vpop.f32.mrb[65].mxu0 }
 0x16e   : > { %v5429_v49 = vpack.c.bf16 %v2508_v45, %v2508_v45  ;;  %v2596_v50 = vpop.f32.mrb[66].mxu0  ;;  %v2785_v51 = vpop.f32.mrb[68].mxu1 }
 0x16f   : > { %v2509_v52 = vsel %vm2505_vm4, %v2503_v43, %v2507_v46  ;;  %v2648_v53 = vadd.f32 %v2647_v37, %v2596_v50  ;;  %v5772_v54 = vpop.f32.mrb[67].mxu0  ;;  %v5789_v55 = vpop.f32.mrb[69].mxu1 }
 0x170   : > { %5162 = vst.msk [vmem:[%s6777_s26 + $0x38] sm:$0xf] %vm474_vm5, %v5429_v49  ;;  %v5430_v56 = vpack.c.bf16 %v2509_v52, %v2509_v52  ;;  %v2788_v57 = vpop.f32.mrb[70].mxu1 }
 0x171   : > { %v5790_v58 = vpop.f32.mrb[71].mxu1 }
 0x172   : > { %5163 = vst.msk [vmem:[%s6777_s26 + $0x3c] sm:$0xf] %vm474_vm5, %v5430_v56 }
 0x174   : > { %v2706_v59 = vpop.f32.mrb[68].mxu0 }
 0x175   : > { %v2713_v60 = vadd.f32 %v2706_v59, %v2645_v47  ;;  %v5783_v61 = vpop.f32.mrb[69].mxu0 }
 0x176   : > { %v2709_v0 = vpop.f32.mrb[70].mxu0  ;;  %v2936_v62 = vpop.f32.mrb[72].mxu1 }
 0x177   : > { %v2792_v63 = vadd.f32 %v2785_v51, %v2713_v60  ;;  %v2714_v1 = vadd.f32 %v2709_v0, %v2648_v53  ;;  %v5784_v2 = vpop.f32.mrb[71].mxu0  ;;  %v5801_v3 = vpop.f32.mrb[73].mxu1 }
 0x178   : > { %v2939_v4 = vpop.f32.mrb[74].mxu1 }
 0x179   : > { %v2794_v5 = vadd.f32 %v6744_v42, %v2792_v63  ;;  %v2793_v6 = vadd.f32 %v2788_v57, %v2714_v1  ;;  %v5802_v7 = vpop.f32.mrb[75].mxu1 }
 0x17b   : > { %vm2796_vm6 = vcmp.gt.f32.partialorder %v2794_v5, 0.0  ;;  %v2798_v8 = vmul.f32 0.2, %v2794_v5  ;;  %v2795_v9 = vadd.f32 %v6744_v42, %v2793_v6 }
 0x17c   : > { %v2885_v10 = vpop.f32.mrb[72].mxu0 }
 0x17d   : > { %v2800_v11 = vsel %vm2796_vm6, %v2794_v5, %v2798_v8  ;;  %vm2797_vm7 = vcmp.gt.f32.partialorder %v2795_v9, 0.0  ;;  %v2799_v12 = vmul.f32 0.2, %v2795_v9  ;;  %v2937_v13 = vadd.f32 %v2936_v62, %v2885_v10  ;;  %v5795_v14 = vpop.f32.mrb[73].mxu0 }
 0x17e   : > { %v5431_v15 = vpack.c.bf16 %v2800_v11, %v2800_v11  ;;  %v2888_v16 = vpop.f32.mrb[74].mxu0  ;;  %v3077_v17 = vpop.f32.mrb[76].mxu1 }
 0x17f   : > { %v2801_v18 = vsel %vm2797_vm7, %v2795_v9, %v2799_v12  ;;  %v2940_v19 = vadd.f32 %v2939_v4, %v2888_v16  ;;  %v5796_v20 = vpop.f32.mrb[75].mxu0  ;;  %v5813_v21 = vpop.f32.mrb[77].mxu1 }
 0x180   : > { %5193 = vst.msk [vmem:[%s6777_s26 + $0x40] sm:$0xf] %vm474_vm5, %v5431_v15  ;;  %v5432_v22 = vpack.c.bf16 %v2801_v18, %v2801_v18  ;;  %v3080_v23 = vpop.f32.mrb[78].mxu1 }
 0x181   : > { %v5814_v24 = vpop.f32.mrb[79].mxu1 }
 0x182   : > { %5194 = vst.msk [vmem:[%s6777_s26 + $0x44] sm:$0xf] %vm474_vm5, %v5432_v22 }
 0x184   : > { %v2998_v25 = vpop.f32.mrb[76].mxu0 }
 0x185   : > { %v3005_v26 = vadd.f32 %v2998_v25, %v2937_v13  ;;  %v5807_v27 = vpop.f32.mrb[77].mxu0 }
 0x186   : > { %v3001_v28 = vpop.f32.mrb[78].mxu0  ;;  %v3228_v29 = vpop.f32.mrb[80].mxu1 }
 0x187   : > { %v3084_v30 = vadd.f32 %v3077_v17, %v3005_v26  ;;  %v3006_v31 = vadd.f32 %v3001_v28, %v2940_v19  ;;  %v5808_v32 = vpop.f32.mrb[79].mxu0  ;;  %v5825_v33 = vpop.f32.mrb[81].mxu1 }
 0x188   : > { %v3231_v34 = vpop.f32.mrb[82].mxu1 }
 0x189   : > { %v3086_v35 = vadd.f32 %v6744_v42, %v3084_v30  ;;  %v3085_v36 = vadd.f32 %v3080_v23, %v3006_v31  ;;  %v5826_v37 = vpop.f32.mrb[83].mxu1 }
 0x18b   : > { %vm3088_vm8 = vcmp.gt.f32.partialorder %v3086_v35, 0.0  ;;  %v3090_v38 = vmul.f32 0.2, %v3086_v35  ;;  %v3087_v39 = vadd.f32 %v6744_v42, %v3085_v36 }
 0x18c   : > { %v3177_v40 = vpop.f32.mrb[80].mxu0 }
 0x18d   : > { %v3092_v41 = vsel %vm3088_vm8, %v3086_v35, %v3090_v38  ;;  %vm3089_vm9 = vcmp.gt.f32.partialorder %v3087_v39, 0.0  ;;  %v3091_v43 = vmul.f32 0.2, %v3087_v39  ;;  %v3229_v44 = vadd.f32 %v3228_v29, %v3177_v40  ;;  %v5819_v45 = vpop.f32.mrb[81].mxu0 }
 0x18e   : > { %v5433_v46 = vpack.c.bf16 %v3092_v41, %v3092_v41  ;;  %v3180_v47 = vpop.f32.mrb[82].mxu0  ;;  %v3369_v48 = vpop.f32.mrb[84].mxu1 }
 0x18f   : > { %v3093_v49 = vsel %vm3089_vm9, %v3087_v39, %v3091_v43  ;;  %v3232_v50 = vadd.f32 %v3231_v34, %v3180_v47  ;;  %v5820_v51 = vpop.f32.mrb[83].mxu0  ;;  %v5837_v52 = vpop.f32.mrb[85].mxu1 }
 0x190   : > { %5224 = vst.msk [vmem:[%s6777_s26 + $0x48] sm:$0xf] %vm474_vm5, %v5433_v46  ;;  %v5434_v53 = vpack.c.bf16 %v3093_v49, %v3093_v49  ;;  %v3372_v54 = vpop.f32.mrb[86].mxu1 }
 0x191   : > { %v5838_v55 = vpop.f32.mrb[87].mxu1 }
 0x192   : > { %5225 = vst.msk [vmem:[%s6777_s26 + $0x4c] sm:$0xf] %vm474_vm5, %v5434_v53 }
 0x194   : > { %v3290_v56 = vpop.f32.mrb[84].mxu0 }
 0x195   : > { %v3297_v57 = vadd.f32 %v3290_v56, %v3229_v44  ;;  %v5831_v58 = vpop.f32.mrb[85].mxu0 }
 0x196   : > { %v3293_v59 = vpop.f32.mrb[86].mxu0  ;;  %v3520_v60 = vpop.f32.mrb[88].mxu1 }
 0x197   : > { %v3376_v61 = vadd.f32 %v3369_v48, %v3297_v57  ;;  %v3298_v0 = vadd.f32 %v3293_v59, %v3232_v50  ;;  %v5832_v62 = vpop.f32.mrb[87].mxu0  ;;  %v5849_v63 = vpop.f32.mrb[89].mxu1 }
 0x198   : > { %v3523_v1 = vpop.f32.mrb[90].mxu1 }
 0x199   : > { %v3378_v2 = vadd.f32 %v6744_v42, %v3376_v61  ;;  %v3377_v3 = vadd.f32 %v3372_v54, %v3298_v0  ;;  %v5850_v4 = vpop.f32.mrb[91].mxu1 }
 0x19b   : > { %vm3380_vm10 = vcmp.gt.f32.partialorder %v3378_v2, 0.0  ;;  %v3382_v5 = vmul.f32 0.2, %v3378_v2  ;;  %v3379_v6 = vadd.f32 %v6744_v42, %v3377_v3 }
 0x19c   : > { %v3469_v7 = vpop.f32.mrb[88].mxu0 }
 0x19d   : > { %v3384_v8 = vsel %vm3380_vm10, %v3378_v2, %v3382_v5  ;;  %vm3381_vm11 = vcmp.gt.f32.partialorder %v3379_v6, 0.0  ;;  %v3383_v9 = vmul.f32 0.2, %v3379_v6  ;;  %v3521_v10 = vadd.f32 %v3520_v60, %v3469_v7  ;;  %v5843_v11 = vpop.f32.mrb[89].mxu0 }
 0x19e   : > { %v5435_v12 = vpack.c.bf16 %v3384_v8, %v3384_v8  ;;  %v3472_v13 = vpop.f32.mrb[90].mxu0  ;;  %v3661_v14 = vpop.f32.mrb[92].mxu1 }
 0x19f   : > { %v3385_v15 = vsel %vm3381_vm11, %v3379_v6, %v3383_v9  ;;  %v3524_v16 = vadd.f32 %v3523_v1, %v3472_v13  ;;  %v5844_v17 = vpop.f32.mrb[91].mxu0  ;;  %v5861_v18 = vpop.f32.mrb[93].mxu1 }
 0x1a0   : > { %5255 = vst.msk [vmem:[%s6777_s26 + $0x50] sm:$0xf] %vm474_vm5, %v5435_v12  ;;  %v5436_v19 = vpack.c.bf16 %v3385_v15, %v3385_v15  ;;  %v3664_v20 = vpop.f32.mrb[94].mxu1 }
 0x1a1   : > { %v5862_v21 = vpop.f32.mrb[95].mxu1 }
 0x1a2   : > { %5256 = vst.msk [vmem:[%s6777_s26 + $0x54] sm:$0xf] %vm474_vm5, %v5436_v19 }
 0x1a4   : > { %v3582_v22 = vpop.f32.mrb[92].mxu0 }
 0x1a5   : > { %v3589_v23 = vadd.f32 %v3582_v22, %v3521_v10  ;;  %v5855_v24 = vpop.f32.mrb[93].mxu0 }
 0x1a6   : > { %v3585_v25 = vpop.f32.mrb[94].mxu0  ;;  %v3812_v26 = vpop.f32.mrb[96].mxu1 }
 0x1a7   : > { %v3668_v27 = vadd.f32 %v3661_v14, %v3589_v23  ;;  %v3590_v28 = vadd.f32 %v3585_v25, %v3524_v16  ;;  %v5856_v29 = vpop.f32.mrb[95].mxu0  ;;  %v5873_v30 = vpop.f32.mrb[97].mxu1 }
 0x1a8   : > { %v3815_v31 = vpop.f32.mrb[98].mxu1 }
 0x1a9   : > { %v3670_v32 = vadd.f32 %v6744_v42, %v3668_v27  ;;  %v3669_v33 = vadd.f32 %v3664_v20, %v3590_v28  ;;  %v5874_v34 = vpop.f32.mrb[99].mxu1 }
 0x1ab   : > { %vm3672_vm12 = vcmp.gt.f32.partialorder %v3670_v32, 0.0  ;;  %v3674_v35 = vmul.f32 0.2, %v3670_v32  ;;  %v3671_v36 = vadd.f32 %v6744_v42, %v3669_v33 }
 0x1ac   : > { %v3761_v37 = vpop.f32.mrb[96].mxu0 }
 0x1ad   : > { %v3676_v38 = vsel %vm3672_vm12, %v3670_v32, %v3674_v35  ;;  %vm3673_vm13 = vcmp.gt.f32.partialorder %v3671_v36, 0.0  ;;  %v3675_v39 = vmul.f32 0.2, %v3671_v36  ;;  %v3813_v40 = vadd.f32 %v3812_v26, %v3761_v37  ;;  %v5867_v41 = vpop.f32.mrb[97].mxu0 }
 0x1ae   : > { %v5437_v43 = vpack.c.bf16 %v3676_v38, %v3676_v38  ;;  %v3764_v44 = vpop.f32.mrb[98].mxu0  ;;  %v3953_v45 = vpop.f32.mrb[100].mxu1 }
 0x1af   : > { %v3677_v46 = vsel %vm3673_vm13, %v3671_v36, %v3675_v39  ;;  %v3816_v47 = vadd.f32 %v3815_v31, %v3764_v44  ;;  %v5868_v48 = vpop.f32.mrb[99].mxu0  ;;  %v5885_v49 = vpop.f32.mrb[101].mxu1 }
 0x1b0   : > { %5286 = vst.msk [vmem:[%s6777_s26 + $0x58] sm:$0xf] %vm474_vm5, %v5437_v43  ;;  %v5438_v50 = vpack.c.bf16 %v3677_v46, %v3677_v46  ;;  %v3956_v51 = vpop.f32.mrb[102].mxu1 }
 0x1b1   : > { %v5886_v52 = vpop.f32.mrb[103].mxu1 }
 0x1b2   : > { %5287 = vst.msk [vmem:[%s6777_s26 + $0x5c] sm:$0xf] %vm474_vm5, %v5438_v50 }
 0x1b4   : > { %v3874_v53 = vpop.f32.mrb[100].mxu0 }
 0x1b5   : > { %v3881_v54 = vadd.f32 %v3874_v53, %v3813_v40  ;;  %v5879_v55 = vpop.f32.mrb[101].mxu0 }
 0x1b6   : > { %v3877_v56 = vpop.f32.mrb[102].mxu0  ;;  %v4104_v57 = vpop.f32.mrb[104].mxu1 }
 0x1b7   : > { %v3960_v58 = vadd.f32 %v3953_v45, %v3881_v54  ;;  %v3882_v59 = vadd.f32 %v3877_v56, %v3816_v47  ;;  %v5880_v60 = vpop.f32.mrb[103].mxu0  ;;  %v5897_v61 = vpop.f32.mrb[105].mxu1 }
 0x1b8   : > { %v4107_v0 = vpop.f32.mrb[106].mxu1 }
 0x1b9   : > { %v3962_v62 = vadd.f32 %v6744_v42, %v3960_v58  ;;  %v3961_v63 = vadd.f32 %v3956_v51, %v3882_v59  ;;  %v5898_v1 = vpop.f32.mrb[107].mxu1  ;;  %v6114_v59 = vld [vmem:[%s6905_s2] ss:$0 sm:$0xff] }
 0x1bb   : > { %vm3964_vm14 = vcmp.gt.f32.partialorder %v3962_v62, 0.0  ;;  %v3966_v2 = vmul.f32 0.2, %v3962_v62  ;;  %v3963_v3 = vadd.f32 %v6744_v42, %v3961_v63 }
 0x1bc   : > { %v4053_v4 = vpop.f32.mrb[104].mxu0 }
 0x1bd   : > { %v3968_v5 = vsel %vm3964_vm14, %v3962_v62, %v3966_v2  ;;  %vm3965_vm15 = vcmp.gt.f32.partialorder %v3963_v3, 0.0  ;;  %v3967_v6 = vmul.f32 0.2, %v3963_v3  ;;  %v4105_v7 = vadd.f32 %v4104_v57, %v4053_v4  ;;  %v5891_v8 = vpop.f32.mrb[105].mxu0 }
 0x1be   : > { %v5439_v9 = vpack.c.bf16 %v3968_v5, %v3968_v5  ;;  %v4056_v10 = vpop.f32.mrb[106].mxu0  ;;  %v4245_v11 = vpop.f32.mrb[108].mxu1 }
 0x1bf   : > { %v3969_v12 = vsel %vm3965_vm15, %v3963_v3, %v3967_v6  ;;  %v4108_v13 = vadd.f32 %v4107_v0, %v4056_v10  ;;  %v5892_v14 = vpop.f32.mrb[107].mxu0  ;;  %v5909_v15 = vpop.f32.mrb[109].mxu1 }
 0x1c0   : > { %5317 = vst.msk [vmem:[%s6777_s26 + $0x60] sm:$0xf] %vm474_vm5, %v5439_v9  ;;  %v5440_v16 = vpack.c.bf16 %v3969_v12, %v3969_v12  ;;  %v4248_v17 = vpop.f32.mrb[110].mxu1 }
 0x1c1   : > { %v5910_v18 = vpop.f32.mrb[111].mxu1 }
 0x1c2   : > { %5318 = vst.msk [vmem:[%s6777_s26 + $0x64] sm:$0xf] %vm474_vm5, %v5440_v16 }
 0x1c4   : > { %v4166_v19 = vpop.f32.mrb[108].mxu0 }
 0x1c5   : > { %v4173_v20 = vadd.f32 %v4166_v19, %v4105_v7  ;;  %v5903_v21 = vpop.f32.mrb[109].mxu0 }
 0x1c6   : > { %v4169_v22 = vpop.f32.mrb[110].mxu0  ;;  %v4396_v23 = vpop.f32.mrb[112].mxu1 }
 0x1c7   : > { %v4252_v24 = vadd.f32 %v4245_v11, %v4173_v20  ;;  %v4174_v25 = vadd.f32 %v4169_v22, %v4108_v13  ;;  %v5904_v26 = vpop.f32.mrb[111].mxu0  ;;  %v5921_v27 = vpop.f32.mrb[113].mxu1 }
 0x1c8   : > { %v4399_v28 = vpop.f32.mrb[114].mxu1 }
 0x1c9   : > { %v4254_v29 = vadd.f32 %v6744_v42, %v4252_v24  ;;  %v4253_v30 = vadd.f32 %v4248_v17, %v4174_v25  ;;  %v5922_v31 = vpop.f32.mrb[115].mxu1 }
 0x1cb   : > { %vm4256_vm0 = vcmp.gt.f32.partialorder %v4254_v29, 0.0  ;;  %v4258_v32 = vmul.f32 0.2, %v4254_v29  ;;  %v4255_v33 = vadd.f32 %v6744_v42, %v4253_v30 }
 0x1cc   : > { %v4345_v34 = vpop.f32.mrb[112].mxu0 }
 0x1cd   : > { %v4260_v35 = vsel %vm4256_vm0, %v4254_v29, %v4258_v32  ;;  %vm4257_vm1 = vcmp.gt.f32.partialorder %v4255_v33, 0.0  ;;  %v4259_v36 = vmul.f32 0.2, %v4255_v33  ;;  %v4397_v37 = vadd.f32 %v4396_v23, %v4345_v34  ;;  %v5915_v38 = vpop.f32.mrb[113].mxu0 }
 0x1ce   : > { %v5441_v39 = vpack.c.bf16 %v4260_v35, %v4260_v35  ;;  %v4348_v40 = vpop.f32.mrb[114].mxu0  ;;  %v4537_v41 = vpop.f32.mrb[116].mxu1 }
 0x1cf   : > { %v4261_v43 = vsel %vm4257_vm1, %v4255_v33, %v4259_v36  ;;  %v4400_v44 = vadd.f32 %v4399_v28, %v4348_v40  ;;  %v5916_v45 = vpop.f32.mrb[115].mxu0  ;;  %v5933_v46 = vpop.f32.mrb[117].mxu1 }
 0x1d0   : > { %5348 = vst.msk [vmem:[%s6777_s26 + $0x68] sm:$0xf] %vm474_vm5, %v5441_v39  ;;  %v5442_v47 = vpack.c.bf16 %v4261_v43, %v4261_v43  ;;  %v4540_v48 = vpop.f32.mrb[118].mxu1 }
 0x1d1   : > { %v5934_v49 = vpop.f32.mrb[119].mxu1 }
 0x1d2   : > { %5349 = vst.msk [vmem:[%s6777_s26 + $0x6c] sm:$0xf] %vm474_vm5, %v5442_v47 }
 0x1d4   : > { %v4458_v42 = vpop.f32.mrb[116].mxu0 }
 0x1d5   : > { %v4465_v50 = vadd.f32 %v4458_v42, %v4397_v37  ;;  %v5927_v51 = vpop.f32.mrb[117].mxu0 }
 0x1d6   : > { %v4461_v52 = vpop.f32.mrb[118].mxu0  ;;  %v4688_v53 = vpop.f32.mrb[120].mxu1 }
 0x1d7   : > { %v4544_v54 = vadd.f32 %v4537_v41, %v4465_v50  ;;  %v4466_v55 = vadd.f32 %v4461_v52, %v4400_v44  ;;  %v5928_v56 = vpop.f32.mrb[119].mxu0  ;;  %v5945_v57 = vpop.f32.mrb[121].mxu1 }
 0x1d8   : > { %v4691_v58 = vpop.f32.mrb[122].mxu1 }
 0x1d9   : > { %v4546_v60 = vadd.f32 %v6114_v59, %v4544_v54  ;;  %v4545_v61 = vadd.f32 %v4540_v48, %v4466_v55  ;;  %v5946_v0 = vpop.f32.mrb[123].mxu1 }
 0x1db   : > { %vm4548_vm2 = vcmp.gt.f32.partialorder %v4546_v60, 0.0  ;;  %v4550_v62 = vmul.f32 0.2, %v4546_v60  ;;  %v4547_v63 = vadd.f32 %v6114_v59, %v4545_v61 }
 0x1dc   : > { %v4637_v1 = vpop.f32.mrb[120].mxu0 }
 0x1dd   : > { %v4552_v2 = vsel %vm4548_vm2, %v4546_v60, %v4550_v62  ;;  %vm4549_vm3 = vcmp.gt.f32.partialorder %v4547_v63, 0.0  ;;  %v4551_v3 = vmul.f32 0.2, %v4547_v63  ;;  %v4689_v4 = vadd.f32 %v4688_v53, %v4637_v1  ;;  %v5939_v5 = vpop.f32.mrb[121].mxu0 }
 0x1de   : > { %v5443_v6 = vpack.c.bf16 %v4552_v2, %v4552_v2  ;;  %v4640_v7 = vpop.f32.mrb[122].mxu0  ;;  %v4829_v8 = vpop.f32.mrb[124].mxu1 }
 0x1df   : > { %v4553_v9 = vsel %vm4549_vm3, %v4547_v63, %v4551_v3  ;;  %v4692_v10 = vadd.f32 %v4691_v58, %v4640_v7  ;;  %v5940_v11 = vpop.f32.mrb[123].mxu0  ;;  %v5957_v12 = vpop.f32.mrb[125].mxu1 }
 0x1e0   : > { %5379 = vst.msk [vmem:[%s6777_s26 + $0x70] sm:$0xf] %vm474_vm5, %v5443_v6  ;;  %v5444_v13 = vpack.c.bf16 %v4553_v9, %v4553_v9  ;;  %v4832_v14 = vpop.f32.mrb[126].mxu1 }
 0x1e1   : > { %v5958_v15 = vpop.f32.mrb[127].mxu1 }
 0x1e2   : > { %5380 = vst.msk [vmem:[%s6777_s26 + $0x74] sm:$0xf] %vm474_vm5, %v5444_v13 }
 0x1e4   : > { %v4750_v16 = vpop.f32.mrb[124].mxu0 }
 0x1e5   : > { %v4757_v17 = vadd.f32 %v4750_v16, %v4689_v4  ;;  %v5951_v18 = vpop.f32.mrb[125].mxu0 }
 0x1e6   : > { %v4753_v19 = vpop.f32.mrb[126].mxu0 }
 0x1e7   : > { %v4836_v20 = vadd.f32 %v4829_v8, %v4757_v17  ;;  %v4758_v21 = vadd.f32 %v4753_v19, %v4692_v10  ;;  %v5952_v22 = vpop.f32.mrb[127].mxu0 }
 0x1e9   : > { %v4838_v23 = vadd.f32 %v6114_v59, %v4836_v20  ;;  %v4837_v24 = vadd.f32 %v4832_v14, %v4758_v21 }
 0x1eb   : > { %vm4840_vm4 = vcmp.gt.f32.partialorder %v4838_v23, 0.0  ;;  %v4842_v25 = vmul.f32 0.2, %v4838_v23  ;;  %v4839_v26 = vadd.f32 %v6114_v59, %v4837_v24 }
 0x1ed   : > { %v4844_v27 = vsel %vm4840_vm4, %v4838_v23, %v4842_v25  ;;  %vm4841_vm6 = vcmp.gt.f32.partialorder %v4839_v26, 0.0  ;;  %v4843_v28 = vmul.f32 0.2, %v4839_v26 }
 0x1ee   : > { %v5445_v29 = vpack.c.bf16 %v4844_v27, %v4844_v27 }
 0x1ef   : > { %v4845_v30 = vsel %vm4841_vm6, %v4839_v26, %v4843_v28 }
 0x1f0   : > { %5410 = vst.msk [vmem:[%s6777_s26 + $0x78] sm:$0xf] %vm474_vm5, %v5445_v29  ;;  %v5446_v31 = vpack.c.bf16 %v4845_v30, %v4845_v30 }
 0x1f2   : > { %5411 = vst.msk [vmem:[%s6777_s26 + $0x7c] sm:$0xf] %vm474_vm5, %v5446_v31 }
 0x1f3 PF: > { %s13_s12 = sadd.s32 1, %s6121_s12  }
 0x1f4   : > { %p10_p4 = scmp.ge.s32.totalorder %s13_s12, 4  }
 0x1f6   :  { %12 = sbr.rel (!%p10_p4) target bundleno = 1 (0x1), region = 96 }

</bundles_post_ra>
